<compile_context>
chip_gen: v6e
topology: v6e:2x2x1
jax: 0.10.0
libtpu: 0.0.40
codegen_flags: <defaults>
</compile_context>

<pallas_src>
import functools

import jax
import jax.numpy as jnp
import numpy as np
from jax.experimental import pallas as pl
from jax.experimental.pallas import tpu as pltpu

# Set to jnp.bfloat16 on v6e / v7x (f32 accumulation is kept via
# preferred_element_type); f32 default preserves the module's numerics.
MATMUL_DTYPE = jnp.float32


# ----------------------------- fused Pallas kernel -----------------------------

def _sampled_tcn_kernel(
    x_ref,       # (1, bb*T, dim)   input, batches stacked on the M/sublane axis
    mask_ref,    # (1, bb*Tp, 1)    mask, zero on per-batch halo rows
    w_in_ref,    # (dim, C)         folded downsamble_conv @ conv_1x1
    b_in_ref,    # (1, C)
    w0_ref,      # (3L, C, C)       layer l taps: [3l]=x[t-d], [3l+1]=x[t], [3l+2]=x[t+d]
    b0_ref,      # (L, 1, C)
    w1_ref,      # (L, C, C)        layer l 1x1 conv
    b1_ref,      # (L, 1, C)
    w_out_ref,   # (C, KP)          prediction_conv, lane-padded to KP
    b_out_ref,   # (1, KP)
    w_up_ref,    # (KP, KP)         upsample_conv (ConvTranspose1d k=1 == 1x1 matmul)
    b_up_ref,    # (1, KP)
    o_ref,       # (1, bb*T, KP)
    act_ref,     # VMEM scratch (2H + bb*Tp, C), f32; zero guards/halos give Conv1d padding
    *,
    bb,
    t,
    halo,
    num_layers,
):
    H = halo
    Tp = t + 2 * H              # per-batch padded length
    N = bb * Tp                 # slab rows (per-batch halos included)
    C = act_ref.shape[1]
    KP = o_ref.shape[2]

    def mm(a, w):               # MXU dot, operands in the weight's dtype, f32 accumulate
        return jnp.dot(a.astype(w.dtype), w, preferred_element_type=jnp.float32)

    mask = mask_ref[0]                                    # (N, 1)
    mask_c = jnp.broadcast_to(mask, (N, C))               # hoisted, reused every layer
    mask_k = jnp.broadcast_to(mask, (N, KP))

    # ---- zero the scratch (global guards + per-batch halos), seed with the fused
    #      input 1x1 conv (downsamble_conv o conv_1x1 folded on host) ----
    act_ref[...] = jnp.zeros(act_ref.shape, jnp.float32)
    h0 = mm(x_ref[0], w_in_ref[...]) + b_in_ref[...]      # (bb*t, C)
    for i in range(bb):
        act_ref[pl.ds(2 * H + i * Tp, t), :] = h0[i * t:(i + 1) * t, :]

    # ---- L dilated residual layers, fully unrolled (static dilation d = l+1) ----
    for l in range(num_layers):
        d = l + 1
        a_c = act_ref[pl.ds(H, N), :]                     # x[t]
        a_l = act_ref[pl.ds(H - d, N), :]                 # x[t-d] (zeros via halo rows)
        a_r = act_ref[pl.ds(H + d, N), :]                 # x[t+d] (zeros via halo rows)
        h = (mm(a_l, w0_ref[3 * l]) + mm(a_c, w0_ref[3 * l + 1])
             + mm(a_r, w0_ref[3 * l + 2]) + b0_ref[l])
        h = jnp.maximum(h, 0.0)                           # ReLU
        y = mm(h, w1_ref[l]) + b1_ref[l]
        # residual add then mask; halo rows stay exactly zero (mask == 0 there)
        act_ref[pl.ds(H, N), :] = (y + a_c) * mask_c

    # ---- prediction conv + upsample conv on the full slab, lane-dense output ----
    a = act_ref[pl.ds(H, N), :]
    p = (mm(a, w_out_ref[...]) + b_out_ref[...]) * mask_k
    u = (mm(p, w_up_ref[...]) + b_up_ref[...]) * mask_k
    u_valid = jnp.concatenate(
        [u[i * Tp + H:i * Tp + H + t, :] for i in range(bb)], axis=0)
    o_ref[0] = u_valid.astype(o_ref.dtype)


# ----------------------------- wrapper -----------------------------

def sampled_tcn_forward(params, x, mask, *, batch_block=None):
    """x: (B, T, dim) f32; mask: (B, T, 1) f32 (== torch mask[:, 0:1, :] transposed)."""
    B, T, dim = x.shape
    L, _, C, _ = params["w0"].shape
    K = params["w_out"].shape[1]

    # Batch stacking on the MXU M axis. On v7x you may want bb such that
    # B // bb >= 2 so both TensorCores get a grid block.
    if batch_block is None:
        bb = min(B, max(1, 128 // T))
        while B % bb != 0:
            bb -= 1
    else:
        bb = batch_block
    assert B % bb == 0, (B, bb)

    H = ((L + 7) // 8) * 8            # per-batch halo (>= max dilation), 8-aligned
    Tp = T + 2 * H
    KP = ((K + 127) // 128) * 128     # lane-dense padded output width

    hp = jax.lax.Precision.HIGHEST
    cdt = MATMUL_DTYPE

    # Fold the two back-to-back 1x1 convs (no nonlinearity in between).
    w_in_f = jnp.dot(params["w_ds"], params["w_in"], precision=hp)
    b_in_f = (jnp.dot(params["b_ds"][None, :], params["w_in"], precision=hp)
              + params["b_in"][None, :])

    # Lane-pad the output-side weights/biases to KP (zeros -> exact result in [:K]).
    w_out_p = jnp.pad(params["w_out"], ((0, 0), (0, KP - K)))
    b_out_p = jnp.pad(params["b_out"][None, :], ((0, 0), (0, KP - K)))
    w_up_p = jnp.pad(params["w_up"], ((0, KP - K), (0, KP - K)))
    b_up_p = jnp.pad(params["b_up"][None, :], ((0, 0), (0, KP - K)))

    # Host-side layout prep: stack bb batches on the row axis; pad mask with the
    # per-batch halo rows (zeros) so it lines up with the kernel's scratch slab.
    x_blk = x.astype(cdt).reshape(B // bb, bb * T, dim)
    mask_p = jnp.pad(mask, ((0, 0), (H, H), (0, 0))).reshape(B // bb, bb * Tp, 1)

    kernel = functools.partial(_sampled_tcn_kernel, bb=bb, t=T, halo=H, num_layers=L)

    out_p = pl.pallas_call(
        kernel,
        out_shape=jax.ShapeDtypeStruct((B // bb, bb * T, KP), jnp.float32),
        grid=(B // bb,),
        in_specs=[
            pl.BlockSpec((1, bb * T, dim), lambda b: (b, 0, 0)),     # x
            pl.BlockSpec((1, bb * Tp, 1), lambda b: (b, 0, 0)),      # mask (halo-padded)
            pl.BlockSpec((dim, C), lambda b: (0, 0)),                # w_in (folded)
            pl.BlockSpec((1, C), lambda b: (0, 0)),                  # b_in (folded)
            pl.BlockSpec((3 * L, C, C), lambda b: (0, 0, 0)),        # w0 taps
            pl.BlockSpec((L, 1, C), lambda b: (0, 0, 0)),            # b0
            pl.BlockSpec((L, C, C), lambda b: (0, 0, 0)),            # w1
            pl.BlockSpec((L, 1, C), lambda b: (0, 0, 0)),            # b1
            pl.BlockSpec((C, KP), lambda b: (0, 0)),                 # w_out (padded)
            pl.BlockSpec((1, KP), lambda b: (0, 0)),                 # b_out
            pl.BlockSpec((KP, KP), lambda b: (0, 0)),                # w_up (padded)
            pl.BlockSpec((1, KP), lambda b: (0, 0)),                 # b_up
        ],
        out_specs=pl.BlockSpec((1, bb * T, KP), lambda b: (b, 0, 0)),
        scratch_shapes=[pltpu.VMEM((2 * H + bb * Tp, C), jnp.float32)],
        compiler_params=pltpu.CompilerParams(
            dimension_semantics=("parallel",)),
    )(
        x_blk, mask_p,
        w_in_f.astype(cdt), b_in_f,
        params["w0"].reshape(3 * L, C, C).astype(cdt),
        params["b0"].reshape(L, 1, C),
        params["w1"].astype(cdt), params["b1"].reshape(L, 1, C),
        w_out_p.astype(cdt), b_out_p,
        w_up_p.astype(cdt), b_up_p,
    )
    return out_p.reshape(B, T, KP)[:, :, :K]


# ----------------------------- parameters -----------------------------

def init_params(key, dim, num_f_maps, num_classes, num_layers):
    C, K, L = num_f_maps, num_classes, num_layers
    keys = jax.random.split(key, 12)

    def nrm(k, shape, scale=0.1):
        return (scale * jax.random.normal(k, shape)).astype(jnp.float32)

    return {
        "w_ds": nrm(keys[0], (dim, dim)),    "b_ds": nrm(keys[1], (dim,)),
        "w_in": nrm(keys[2], (dim, C)),      "b_in": nrm(keys[3], (C,)),
        "w0":   nrm(keys[4], (L, 3, C, C)),  "b0":   nrm(keys[5], (L, C)),
        "w1":   nrm(keys[6], (L, C, C)),     "b1":   nrm(keys[7], (L, C)),
        "w_out": nrm(keys[8], (C, K)),       "b_out": nrm(keys[9], (K,)),
        "w_up": nrm(keys[10], (K, K)),       "b_up": nrm(keys[11], (K,)),
    }


# ----------------------------- pure-JAX reference -----------------------------

def _ref_forward(params, x, mask):
    ein = lambda a, w: jnp.einsum("btc,cd->btd", a, w,
                                  precision=jax.lax.Precision.HIGHEST)
    out = ein(x, params["w_ds"]) + params["b_ds"]
    out = ein(out, params["w_in"]) + params["b_in"]
    T = x.shape[1]
    L = params["w0"].shape[0]
    for i in range(L):
        d = i + 1
        zeros = jnp.zeros_like(out[:, :d])
        xl = jnp.concatenate([zeros, out[:, : T - d]], axis=1)
        xr = jnp.concatenate([out[:, d:], zeros], axis=1)
        w0 = params["w0"][i]
        h = ein(xl, w0[0]) + ein(out, w0[1]) + ein(xr, w0[2]) + params["b0"][i]
        h = jnp.maximum(h, 0.0)
        out = (ein(h, params["w1"][i]) + params["b1"][i] + out) * mask
    out = (ein(out, params["w_out"]) + params["b_out"]) * mask
    out = (ein(out, params["w_up"]) + params["b_up"]) * mask
    return out


# ----------------------------- main -----------------------------

if __name__ == "__main__":
    # Small shapes consistent with SampledTCN's forward semantics.
    B, T = 2, 64
    dim, num_f_maps, num_classes, num_layers = 64, 64, 16, 4
    sampling_factor = 2   # dilation on the k=1 down/up-sample convs: no effect on math

    key = jax.random.PRNGKey(0)
    k_x, k_p = jax.random.split(key)

    # PyTorch-convention input (B, dim, T), transposed once to kernel layout (B, T, dim).
    x_nct = jax.random.normal(k_x, (B, dim, T), dtype=jnp.float32)
    x = jnp.transpose(x_nct, (0, 2, 1))

    # mask[:, 0:1, :] in torch == per-(batch, time) validity; kernel layout (B, T, 1).
    lens = jnp.array([T, T - 19])
    mask = (jnp.arange(T)[None, :] < lens[:, None]).astype(jnp.float32)[:, :, None]

    params = init_params(k_p, dim, num_f_maps, num_classes, num_layers)

    out = sampled_tcn_forward(params, x, mask)
    out = jax.block_until_ready(out)
    assert out.shape == (B, T, num_classes), out.shape

    ref = _ref_forward(params, x, mask)
    np.testing.assert_allclose(np.asarray(out), np.asarray(ref),
                               rtol=1e-2, atol=1e-2)
    print("KERNEL_OK")
</pallas_src>

<mosaic_0001>
module attributes {stable_mosaic.version = 11 : i64} {
  func.func @_sampled_tcn_kernel(%arg0: i32, %arg1: memref<1x128x64xf32, #tpu.memory_space<vmem>>, %arg2: memref<1x160x1xf32, #tpu.memory_space<vmem>>, %arg3: memref<64x64xf32, #tpu.memory_space<vmem>>, %arg4: memref<1x64xf32, #tpu.memory_space<vmem>>, %arg5: memref<12x64x64xf32, #tpu.memory_space<vmem>>, %arg6: memref<4x1x64xf32, #tpu.memory_space<vmem>>, %arg7: memref<4x64x64xf32, #tpu.memory_space<vmem>>, %arg8: memref<4x1x64xf32, #tpu.memory_space<vmem>>, %arg9: memref<64x128xf32, #tpu.memory_space<vmem>>, %arg10: memref<1x128xf32, #tpu.memory_space<vmem>>, %arg11: memref<128x128xf32, #tpu.memory_space<vmem>>, %arg12: memref<1x128xf32, #tpu.memory_space<vmem>>, %arg13: memref<1x128x128xf32, #tpu.memory_space<vmem>>, %arg14: memref<176x64xf32, #tpu.memory_space<vmem>>) attributes {dimension_semantics = [#tpu.dimension_semantics<parallel>], iteration_bounds = array<i64: 1>, scalar_prefetch = 0 : i64, scratch_operands = 1 : i64, tpu.core_type = #tpu.core_type<tc>, window_params = [{transform_indices = @transform_0, window_bounds = array<i64: 1, 128, 64>}, {transform_indices = @transform_1, window_bounds = array<i64: 1, 160, 1>}, {pipeline_mode = #tpu.pipeline_mode<synchronous>, transform_indices = @transform_2, window_bounds = array<i64: 64, 64>}, {pipeline_mode = #tpu.pipeline_mode<synchronous>, transform_indices = @transform_3, window_bounds = array<i64: 1, 64>}, {pipeline_mode = #tpu.pipeline_mode<synchronous>, transform_indices = @transform_4, window_bounds = array<i64: 12, 64, 64>}, {pipeline_mode = #tpu.pipeline_mode<synchronous>, transform_indices = @transform_5, window_bounds = array<i64: 4, 1, 64>}, {pipeline_mode = #tpu.pipeline_mode<synchronous>, transform_indices = @transform_6, window_bounds = array<i64: 4, 64, 64>}, {pipeline_mode = #tpu.pipeline_mode<synchronous>, transform_indices = @transform_7, window_bounds = array<i64: 4, 1, 64>}, {pipeline_mode = #tpu.pipeline_mode<synchronous>, transform_indices = @transform_8, window_bounds = array<i64: 64, 128>}, {pipeline_mode = #tpu.pipeline_mode<synchronous>, transform_indices = @transform_9, window_bounds = array<i64: 1, 128>}, {pipeline_mode = #tpu.pipeline_mode<synchronous>, transform_indices = @transform_10, window_bounds = array<i64: 128, 128>}, {pipeline_mode = #tpu.pipeline_mode<synchronous>, transform_indices = @transform_11, window_bounds = array<i64: 1, 128>}, {transform_indices = @transform_12, window_bounds = array<i64: 1, 128, 128>}]} {
    %c0 = arith.constant 0 : index
    %c0_0 = arith.constant 0 : index
    %c0_1 = arith.constant 0 : index
    %0 = vector.load %arg2[%c0, %c0_0, %c0_1] : memref<1x160x1xf32, #tpu.memory_space<vmem>>, vector<1x160x1xf32>
    %1 = vector.shape_cast %0 : vector<1x160x1xf32> to vector<160x1xf32>
    %2 = vector.shape_cast %1 : vector<160x1xf32> to vector<160x1xf32>
    %3 = vector.broadcast %2 : vector<160x1xf32> to vector<160x64xf32>
    %4 = vector.shape_cast %1 : vector<160x1xf32> to vector<160x1xf32>
    %5 = vector.broadcast %4 : vector<160x1xf32> to vector<160x128xf32>
    %cst = arith.constant 0.000000e+00 : f32
    %6 = vector.broadcast %cst : f32 to vector<176x64xf32>
    %c0_2 = arith.constant 0 : index
    %c0_3 = arith.constant 0 : index
    %7 = vector.load %arg14[%c0_2, %c0_3] : memref<176x64xf32, #tpu.memory_space<vmem>>, vector<176x64xf32>
    tpu.vector_store %arg14[%c0_2, %c0_3], %6 {strides = array<i32>} : memref<176x64xf32, #tpu.memory_space<vmem>>, vector<176x64xf32>,
    %c0_4 = arith.constant 0 : index
    %c0_5 = arith.constant 0 : index
    %c0_6 = arith.constant 0 : index
    %8 = vector.load %arg1[%c0_4, %c0_5, %c0_6] : memref<1x128x64xf32, #tpu.memory_space<vmem>>, vector<1x128x64xf32>
    %9 = vector.shape_cast %8 : vector<1x128x64xf32> to vector<128x64xf32>
    %c0_7 = arith.constant 0 : index
    %c0_8 = arith.constant 0 : index
    %10 = vector.load %arg3[%c0_7, %c0_8] : memref<64x64xf32, #tpu.memory_space<vmem>>, vector<64x64xf32>
    %cst_9 = arith.constant dense<0.000000e+00> : vector<128x64xf32>
    %11 = tpu.matmul %9, %10, %cst_9 {dimension_numbers = #tpu.dot_dimension_numbers<[1], [0], [0], [1], [0, 0, 1, 1], [], []>} : vector<128x64xf32>, vector<64x64xf32>, vector<128x64xf32> -> vector<128x64xf32>
    %c0_10 = arith.constant 0 : index
    %c0_11 = arith.constant 0 : index
    %12 = vector.load %arg4[%c0_10, %c0_11] : memref<1x64xf32, #tpu.memory_space<vmem>>, vector<1x64xf32>
    %13 = vector.broadcast %12 : vector<1x64xf32> to vector<128x64xf32>
    %14 = arith.addf %11, %13 : vector<128x64xf32>
    %15 = vector.extract_strided_slice %14 {offsets = [0, 0], sizes = [64, 64], strides = [1, 1]} : vector<128x64xf32> to vector<64x64xf32>
    %c16 = arith.constant 16 : index
    %c0_12 = arith.constant 0 : index
    %16 = vector.load %arg14[%c16, %c0_12] : memref<176x64xf32, #tpu.memory_space<vmem>>, vector<64x64xf32>
    tpu.vector_store %arg14[%c16, %c0_12], %15 {strides = array<i32>} : memref<176x64xf32, #tpu.memory_space<vmem>>, vector<64x64xf32>,
    %17 = vector.extract_strided_slice %14 {offsets = [64, 0], sizes = [64, 64], strides = [1, 1]} : vector<128x64xf32> to vector<64x64xf32>
    %c96 = arith.constant 96 : index
    %c0_13 = arith.constant 0 : index
    %18 = vector.load %arg14[%c96, %c0_13] : memref<176x64xf32, #tpu.memory_space<vmem>>, vector<64x64xf32>
    tpu.vector_store %arg14[%c96, %c0_13], %17 {strides = array<i32>} : memref<176x64xf32, #tpu.memory_space<vmem>>, vector<64x64xf32>,
    %c8 = arith.constant 8 : index
    %c0_14 = arith.constant 0 : index
    %19 = vector.load %arg14[%c8, %c0_14] : memref<176x64xf32, #tpu.memory_space<vmem>>, vector<160x64xf32>
    %c7 = arith.constant 7 : index
    %c0_15 = arith.constant 0 : index
    %20 = vector.load %arg14[%c7, %c0_15] : memref<176x64xf32, #tpu.memory_space<vmem>>, vector<160x64xf32>
    %c9 = arith.constant 9 : index
    %c0_16 = arith.constant 0 : index
    %21 = vector.load %arg14[%c9, %c0_16] : memref<176x64xf32, #tpu.memory_space<vmem>>, vector<160x64xf32>
    %c0_17 = arith.constant 0 : index
    %c0_18 = arith.constant 0 : index
    %c0_19 = arith.constant 0 : index
    %22 = vector.load %arg5[%c0_17, %c0_18, %c0_19] : memref<12x64x64xf32, #tpu.memory_space<vmem>>, vector<1x64x64xf32>
    %23 = vector.shape_cast %22 : vector<1x64x64xf32> to vector<64x64xf32>
    %cst_20 = arith.constant dense<0.000000e+00> : vector<160x64xf32>
    %24 = tpu.matmul %20, %23, %cst_20 {dimension_numbers = #tpu.dot_dimension_numbers<[1], [0], [0], [1], [0, 0, 1, 1], [], []>} : vector<160x64xf32>, vector<64x64xf32>, vector<160x64xf32> -> vector<160x64xf32>
    %c1 = arith.constant 1 : index
    %c0_21 = arith.constant 0 : index
    %c0_22 = arith.constant 0 : index
    %25 = vector.load %arg5[%c1, %c0_21, %c0_22] : memref<12x64x64xf32, #tpu.memory_space<vmem>>, vector<1x64x64xf32>
    %26 = vector.shape_cast %25 : vector<1x64x64xf32> to vector<64x64xf32>
    %cst_23 = arith.constant dense<0.000000e+00> : vector<160x64xf32>
    %27 = tpu.matmul %19, %26, %cst_23 {dimension_numbers = #tpu.dot_dimension_numbers<[1], [0], [0], [1], [0, 0, 1, 1], [], []>} : vector<160x64xf32>, vector<64x64xf32>, vector<160x64xf32> -> vector<160x64xf32>
    %28 = arith.addf %24, %27 : vector<160x64xf32>
    %c2 = arith.constant 2 : index
    %c0_24 = arith.constant 0 : index
    %c0_25 = arith.constant 0 : index
    %29 = vector.load %arg5[%c2, %c0_24, %c0_25] : memref<12x64x64xf32, #tpu.memory_space<vmem>>, vector<1x64x64xf32>
    %30 = vector.shape_cast %29 : vector<1x64x64xf32> to vector<64x64xf32>
    %cst_26 = arith.constant dense<0.000000e+00> : vector<160x64xf32>
    %31 = tpu.matmul %21, %30, %cst_26 {dimension_numbers = #tpu.dot_dimension_numbers<[1], [0], [0], [1], [0, 0, 1, 1], [], []>} : vector<160x64xf32>, vector<64x64xf32>, vector<160x64xf32> -> vector<160x64xf32>
    %32 = arith.addf %28, %31 : vector<160x64xf32>
    %c0_27 = arith.constant 0 : index
    %c0_28 = arith.constant 0 : index
    %c0_29 = arith.constant 0 : index
    %33 = vector.load %arg6[%c0_27, %c0_28, %c0_29] : memref<4x1x64xf32, #tpu.memory_space<vmem>>, vector<1x1x64xf32>
    %34 = vector.shape_cast %33 : vector<1x1x64xf32> to vector<1x64xf32>
    %35 = vector.broadcast %34 : vector<1x64xf32> to vector<160x64xf32>
    %36 = arith.addf %32, %35 : vector<160x64xf32>
    %cst_30 = arith.constant 0.000000e+00 : f32
    %37 = vector.broadcast %cst_30 : f32 to vector<160x64xf32>
    %38 = arith.maximumf %36, %37 : vector<160x64xf32>
    %c0_31 = arith.constant 0 : index
    %c0_32 = arith.constant 0 : index
    %c0_33 = arith.constant 0 : index
    %39 = vector.load %arg7[%c0_31, %c0_32, %c0_33] : memref<4x64x64xf32, #tpu.memory_space<vmem>>, vector<1x64x64xf32>
    %40 = vector.shape_cast %39 : vector<1x64x64xf32> to vector<64x64xf32>
    %cst_34 = arith.constant dense<0.000000e+00> : vector<160x64xf32>
    %41 = tpu.matmul %38, %40, %cst_34 {dimension_numbers = #tpu.dot_dimension_numbers<[1], [0], [0], [1], [0, 0, 1, 1], [], []>} : vector<160x64xf32>, vector<64x64xf32>, vector<160x64xf32> -> vector<160x64xf32>
    %c0_35 = arith.constant 0 : index
    %c0_36 = arith.constant 0 : index
    %c0_37 = arith.constant 0 : index
    %42 = vector.load %arg8[%c0_35, %c0_36, %c0_37] : memref<4x1x64xf32, #tpu.memory_space<vmem>>, vector<1x1x64xf32>
    %43 = vector.shape_cast %42 : vector<1x1x64xf32> to vector<1x64xf32>
    %44 = vector.broadcast %43 : vector<1x64xf32> to vector<160x64xf32>
    %45 = arith.addf %41, %44 : vector<160x64xf32>
    %46 = arith.addf %45, %19 : vector<160x64xf32>
    %47 = arith.mulf %46, %3 : vector<160x64xf32>
    %c8_38 = arith.constant 8 : index
    %c0_39 = arith.constant 0 : index
    %48 = vector.load %arg14[%c8_38, %c0_39] : memref<176x64xf32, #tpu.memory_space<vmem>>, vector<160x64xf32>
    tpu.vector_store %arg14[%c8_38, %c0_39], %47 {strides = array<i32>} : memref<176x64xf32, #tpu.memory_space<vmem>>, vector<160x64xf32>,
    %c8_40 = arith.constant 8 : index
    %c0_41 = arith.constant 0 : index
    %49 = vector.load %arg14[%c8_40, %c0_41] : memref<176x64xf32, #tpu.memory_space<vmem>>, vector<160x64xf32>
    %c6 = arith.constant 6 : index
    %c0_42 = arith.constant 0 : index
    %50 = vector.load %arg14[%c6, %c0_42] : memref<176x64xf32, #tpu.memory_space<vmem>>, vector<160x64xf32>
    %c10 = arith.constant 10 : index
    %c0_43 = arith.constant 0 : index
    %51 = vector.load %arg14[%c10, %c0_43] : memref<176x64xf32, #tpu.memory_space<vmem>>, vector<160x64xf32>
    %c3 = arith.constant 3 : index
    %c0_44 = arith.constant 0 : index
    %c0_45 = arith.constant 0 : index
    %52 = vector.load %arg5[%c3, %c0_44, %c0_45] : memref<12x64x64xf32, #tpu.memory_space<vmem>>, vector<1x64x64xf32>
    %53 = vector.shape_cast %52 : vector<1x64x64xf32> to vector<64x64xf32>
    %cst_46 = arith.constant dense<0.000000e+00> : vector<160x64xf32>
    %54 = tpu.matmul %50, %53, %cst_46 {dimension_numbers = #tpu.dot_dimension_numbers<[1], [0], [0], [1], [0, 0, 1, 1], [], []>} : vector<160x64xf32>, vector<64x64xf32>, vector<160x64xf32> -> vector<160x64xf32>
    %c4 = arith.constant 4 : index
    %c0_47 = arith.constant 0 : index
    %c0_48 = arith.constant 0 : index
    %55 = vector.load %arg5[%c4, %c0_47, %c0_48] : memref<12x64x64xf32, #tpu.memory_space<vmem>>, vector<1x64x64xf32>
    %56 = vector.shape_cast %55 : vector<1x64x64xf32> to vector<64x64xf32>
    %cst_49 = arith.constant dense<0.000000e+00> : vector<160x64xf32>
    %57 = tpu.matmul %49, %56, %cst_49 {dimension_numbers = #tpu.dot_dimension_numbers<[1], [0], [0], [1], [0, 0, 1, 1], [], []>} : vector<160x64xf32>, vector<64x64xf32>, vector<160x64xf32> -> vector<160x64xf32>
    %58 = arith.addf %54, %57 : vector<160x64xf32>
    %c5 = arith.constant 5 : index
    %c0_50 = arith.constant 0 : index
    %c0_51 = arith.constant 0 : index
    %59 = vector.load %arg5[%c5, %c0_50, %c0_51] : memref<12x64x64xf32, #tpu.memory_space<vmem>>, vector<1x64x64xf32>
    %60 = vector.shape_cast %59 : vector<1x64x64xf32> to vector<64x64xf32>
    %cst_52 = arith.constant dense<0.000000e+00> : vector<160x64xf32>
    %61 = tpu.matmul %51, %60, %cst_52 {dimension_numbers = #tpu.dot_dimension_numbers<[1], [0], [0], [1], [0, 0, 1, 1], [], []>} : vector<160x64xf32>, vector<64x64xf32>, vector<160x64xf32> -> vector<160x64xf32>
    %62 = arith.addf %58, %61 : vector<160x64xf32>
    %c1_53 = arith.constant 1 : index
    %c0_54 = arith.constant 0 : index
    %c0_55 = arith.constant 0 : index
    %63 = vector.load %arg6[%c1_53, %c0_54, %c0_55] : memref<4x1x64xf32, #tpu.memory_space<vmem>>, vector<1x1x64xf32>
    %64 = vector.shape_cast %63 : vector<1x1x64xf32> to vector<1x64xf32>
    %65 = vector.broadcast %64 : vector<1x64xf32> to vector<160x64xf32>
    %66 = arith.addf %62, %65 : vector<160x64xf32>
    %cst_56 = arith.constant 0.000000e+00 : f32
    %67 = vector.broadcast %cst_56 : f32 to vector<160x64xf32>
    %68 = arith.maximumf %66, %67 : vector<160x64xf32>
    %c1_57 = arith.constant 1 : index
    %c0_58 = arith.constant 0 : index
    %c0_59 = arith.constant 0 : index
    %69 = vector.load %arg7[%c1_57, %c0_58, %c0_59] : memref<4x64x64xf32, #tpu.memory_space<vmem>>, vector<1x64x64xf32>
    %70 = vector.shape_cast %69 : vector<1x64x64xf32> to vector<64x64xf32>
    %cst_60 = arith.constant dense<0.000000e+00> : vector<160x64xf32>
    %71 = tpu.matmul %68, %70, %cst_60 {dimension_numbers = #tpu.dot_dimension_numbers<[1], [0], [0], [1], [0, 0, 1, 1], [], []>} : vector<160x64xf32>, vector<64x64xf32>, vector<160x64xf32> -> vector<160x64xf32>
    %c1_61 = arith.constant 1 : index
    %c0_62 = arith.constant 0 : index
    %c0_63 = arith.constant 0 : index
    %72 = vector.load %arg8[%c1_61, %c0_62, %c0_63] : memref<4x1x64xf32, #tpu.memory_space<vmem>>, vector<1x1x64xf32>
    %73 = vector.shape_cast %72 : vector<1x1x64xf32> to vector<1x64xf32>
    %74 = vector.broadcast %73 : vector<1x64xf32> to vector<160x64xf32>
    %75 = arith.addf %71, %74 : vector<160x64xf32>
    %76 = arith.addf %75, %49 : vector<160x64xf32>
    %77 = arith.mulf %76, %3 : vector<160x64xf32>
    %c8_64 = arith.constant 8 : index
    %c0_65 = arith.constant 0 : index
    %78 = vector.load %arg14[%c8_64, %c0_65] : memref<176x64xf32, #tpu.memory_space<vmem>>, vector<160x64xf32>
    tpu.vector_store %arg14[%c8_64, %c0_65], %77 {strides = array<i32>} : memref<176x64xf32, #tpu.memory_space<vmem>>, vector<160x64xf32>,
    %c8_66 = arith.constant 8 : index
    %c0_67 = arith.constant 0 : index
    %79 = vector.load %arg14[%c8_66, %c0_67] : memref<176x64xf32, #tpu.memory_space<vmem>>, vector<160x64xf32>
    %c5_68 = arith.constant 5 : index
    %c0_69 = arith.constant 0 : index
    %80 = vector.load %arg14[%c5_68, %c0_69] : memref<176x64xf32, #tpu.memory_space<vmem>>, vector<160x64xf32>
    %c11 = arith.constant 11 : index
    %c0_70 = arith.constant 0 : index
    %81 = vector.load %arg14[%c11, %c0_70] : memref<176x64xf32, #tpu.memory_space<vmem>>, vector<160x64xf32>
    %c6_71 = arith.constant 6 : index
    %c0_72 = arith.constant 0 : index
    %c0_73 = arith.constant 0 : index
    %82 = vector.load %arg5[%c6_71, %c0_72, %c0_73] : memref<12x64x64xf32, #tpu.memory_space<vmem>>, vector<1x64x64xf32>
    %83 = vector.shape_cast %82 : vector<1x64x64xf32> to vector<64x64xf32>
    %cst_74 = arith.constant dense<0.000000e+00> : vector<160x64xf32>
    %84 = tpu.matmul %80, %83, %cst_74 {dimension_numbers = #tpu.dot_dimension_numbers<[1], [0], [0], [1], [0, 0, 1, 1], [], []>} : vector<160x64xf32>, vector<64x64xf32>, vector<160x64xf32> -> vector<160x64xf32>
    %c7_75 = arith.constant 7 : index
    %c0_76 = arith.constant 0 : index
    %c0_77 = arith.constant 0 : index
    %85 = vector.load %arg5[%c7_75, %c0_76, %c0_77] : memref<12x64x64xf32, #tpu.memory_space<vmem>>, vector<1x64x64xf32>
    %86 = vector.shape_cast %85 : vector<1x64x64xf32> to vector<64x64xf32>
    %cst_78 = arith.constant dense<0.000000e+00> : vector<160x64xf32>
    %87 = tpu.matmul %79, %86, %cst_78 {dimension_numbers = #tpu.dot_dimension_numbers<[1], [0], [0], [1], [0, 0, 1, 1], [], []>} : vector<160x64xf32>, vector<64x64xf32>, vector<160x64xf32> -> vector<160x64xf32>
    %88 = arith.addf %84, %87 : vector<160x64xf32>
    %c8_79 = arith.constant 8 : index
    %c0_80 = arith.constant 0 : index
    %c0_81 = arith.constant 0 : index
    %89 = vector.load %arg5[%c8_79, %c0_80, %c0_81] : memref<12x64x64xf32, #tpu.memory_space<vmem>>, vector<1x64x64xf32>
    %90 = vector.shape_cast %89 : vector<1x64x64xf32> to vector<64x64xf32>
    %cst_82 = arith.constant dense<0.000000e+00> : vector<160x64xf32>
    %91 = tpu.matmul %81, %90, %cst_82 {dimension_numbers = #tpu.dot_dimension_numbers<[1], [0], [0], [1], [0, 0, 1, 1], [], []>} : vector<160x64xf32>, vector<64x64xf32>, vector<160x64xf32> -> vector<160x64xf32>
    %92 = arith.addf %88, %91 : vector<160x64xf32>
    %c2_83 = arith.constant 2 : index
    %c0_84 = arith.constant 0 : index
    %c0_85 = arith.constant 0 : index
    %93 = vector.load %arg6[%c2_83, %c0_84, %c0_85] : memref<4x1x64xf32, #tpu.memory_space<vmem>>, vector<1x1x64xf32>
    %94 = vector.shape_cast %93 : vector<1x1x64xf32> to vector<1x64xf32>
    %95 = vector.broadcast %94 : vector<1x64xf32> to vector<160x64xf32>
    %96 = arith.addf %92, %95 : vector<160x64xf32>
    %cst_86 = arith.constant 0.000000e+00 : f32
    %97 = vector.broadcast %cst_86 : f32 to vector<160x64xf32>
    %98 = arith.maximumf %96, %97 : vector<160x64xf32>
    %c2_87 = arith.constant 2 : index
    %c0_88 = arith.constant 0 : index
    %c0_89 = arith.constant 0 : index
    %99 = vector.load %arg7[%c2_87, %c0_88, %c0_89] : memref<4x64x64xf32, #tpu.memory_space<vmem>>, vector<1x64x64xf32>
    %100 = vector.shape_cast %99 : vector<1x64x64xf32> to vector<64x64xf32>
    %cst_90 = arith.constant dense<0.000000e+00> : vector<160x64xf32>
    %101 = tpu.matmul %98, %100, %cst_90 {dimension_numbers = #tpu.dot_dimension_numbers<[1], [0], [0], [1], [0, 0, 1, 1], [], []>} : vector<160x64xf32>, vector<64x64xf32>, vector<160x64xf32> -> vector<160x64xf32>
    %c2_91 = arith.constant 2 : index
    %c0_92 = arith.constant 0 : index
    %c0_93 = arith.constant 0 : index
    %102 = vector.load %arg8[%c2_91, %c0_92, %c0_93] : memref<4x1x64xf32, #tpu.memory_space<vmem>>, vector<1x1x64xf32>
    %103 = vector.shape_cast %102 : vector<1x1x64xf32> to vector<1x64xf32>
    %104 = vector.broadcast %103 : vector<1x64xf32> to vector<160x64xf32>
    %105 = arith.addf %101, %104 : vector<160x64xf32>
    %106 = arith.addf %105, %79 : vector<160x64xf32>
    %107 = arith.mulf %106, %3 : vector<160x64xf32>
    %c8_94 = arith.constant 8 : index
    %c0_95 = arith.constant 0 : index
    %108 = vector.load %arg14[%c8_94, %c0_95] : memref<176x64xf32, #tpu.memory_space<vmem>>, vector<160x64xf32>
    tpu.vector_store %arg14[%c8_94, %c0_95], %107 {strides = array<i32>} : memref<176x64xf32, #tpu.memory_space<vmem>>, vector<160x64xf32>,
    %c8_96 = arith.constant 8 : index
    %c0_97 = arith.constant 0 : index
    %109 = vector.load %arg14[%c8_96, %c0_97] : memref<176x64xf32, #tpu.memory_space<vmem>>, vector<160x64xf32>
    %c4_98 = arith.constant 4 : index
    %c0_99 = arith.constant 0 : index
    %110 = vector.load %arg14[%c4_98, %c0_99] : memref<176x64xf32, #tpu.memory_space<vmem>>, vector<160x64xf32>
    %c12 = arith.constant 12 : index
    %c0_100 = arith.constant 0 : index
    %111 = vector.load %arg14[%c12, %c0_100] : memref<176x64xf32, #tpu.memory_space<vmem>>, vector<160x64xf32>
    %c9_101 = arith.constant 9 : index
    %c0_102 = arith.constant 0 : index
    %c0_103 = arith.constant 0 : index
    %112 = vector.load %arg5[%c9_101, %c0_102, %c0_103] : memref<12x64x64xf32, #tpu.memory_space<vmem>>, vector<1x64x64xf32>
    %113 = vector.shape_cast %112 : vector<1x64x64xf32> to vector<64x64xf32>
    %cst_104 = arith.constant dense<0.000000e+00> : vector<160x64xf32>
    %114 = tpu.matmul %110, %113, %cst_104 {dimension_numbers = #tpu.dot_dimension_numbers<[1], [0], [0], [1], [0, 0, 1, 1], [], []>} : vector<160x64xf32>, vector<64x64xf32>, vector<160x64xf32> -> vector<160x64xf32>
    %c10_105 = arith.constant 10 : index
    %c0_106 = arith.constant 0 : index
    %c0_107 = arith.constant 0 : index
    %115 = vector.load %arg5[%c10_105, %c0_106, %c0_107] : memref<12x64x64xf32, #tpu.memory_space<vmem>>, vector<1x64x64xf32>
    %116 = vector.shape_cast %115 : vector<1x64x64xf32> to vector<64x64xf32>
    %cst_108 = arith.constant dense<0.000000e+00> : vector<160x64xf32>
    %117 = tpu.matmul %109, %116, %cst_108 {dimension_numbers = #tpu.dot_dimension_numbers<[1], [0], [0], [1], [0, 0, 1, 1], [], []>} : vector<160x64xf32>, vector<64x64xf32>, vector<160x64xf32> -> vector<160x64xf32>
    %118 = arith.addf %114, %117 : vector<160x64xf32>
    %c11_109 = arith.constant 11 : index
    %c0_110 = arith.constant 0 : index
    %c0_111 = arith.constant 0 : index
    %119 = vector.load %arg5[%c11_109, %c0_110, %c0_111] : memref<12x64x64xf32, #tpu.memory_space<vmem>>, vector<1x64x64xf32>
    %120 = vector.shape_cast %119 : vector<1x64x64xf32> to vector<64x64xf32>
    %cst_112 = arith.constant dense<0.000000e+00> : vector<160x64xf32>
    %121 = tpu.matmul %111, %120, %cst_112 {dimension_numbers = #tpu.dot_dimension_numbers<[1], [0], [0], [1], [0, 0, 1, 1], [], []>} : vector<160x64xf32>, vector<64x64xf32>, vector<160x64xf32> -> vector<160x64xf32>
    %122 = arith.addf %118, %121 : vector<160x64xf32>
    %c3_113 = arith.constant 3 : index
    %c0_114 = arith.constant 0 : index
    %c0_115 = arith.constant 0 : index
    %123 = vector.load %arg6[%c3_113, %c0_114, %c0_115] : memref<4x1x64xf32, #tpu.memory_space<vmem>>, vector<1x1x64xf32>
    %124 = vector.shape_cast %123 : vector<1x1x64xf32> to vector<1x64xf32>
    %125 = vector.broadcast %124 : vector<1x64xf32> to vector<160x64xf32>
    %126 = arith.addf %122, %125 : vector<160x64xf32>
    %cst_116 = arith.constant 0.000000e+00 : f32
    %127 = vector.broadcast %cst_116 : f32 to vector<160x64xf32>
    %128 = arith.maximumf %126, %127 : vector<160x64xf32>
    %c3_117 = arith.constant 3 : index
    %c0_118 = arith.constant 0 : index
    %c0_119 = arith.constant 0 : index
    %129 = vector.load %arg7[%c3_117, %c0_118, %c0_119] : memref<4x64x64xf32, #tpu.memory_space<vmem>>, vector<1x64x64xf32>
    %130 = vector.shape_cast %129 : vector<1x64x64xf32> to vector<64x64xf32>
    %cst_120 = arith.constant dense<0.000000e+00> : vector<160x64xf32>
    %131 = tpu.matmul %128, %130, %cst_120 {dimension_numbers = #tpu.dot_dimension_numbers<[1], [0], [0], [1], [0, 0, 1, 1], [], []>} : vector<160x64xf32>, vector<64x64xf32>, vector<160x64xf32> -> vector<160x64xf32>
    %c3_121 = arith.constant 3 : index
    %c0_122 = arith.constant 0 : index
    %c0_123 = arith.constant 0 : index
    %132 = vector.load %arg8[%c3_121, %c0_122, %c0_123] : memref<4x1x64xf32, #tpu.memory_space<vmem>>, vector<1x1x64xf32>
    %133 = vector.shape_cast %132 : vector<1x1x64xf32> to vector<1x64xf32>
    %134 = vector.broadcast %133 : vector<1x64xf32> to vector<160x64xf32>
    %135 = arith.addf %131, %134 : vector<160x64xf32>
    %136 = arith.addf %135, %109 : vector<160x64xf32>
    %137 = arith.mulf %136, %3 : vector<160x64xf32>
    %c8_124 = arith.constant 8 : index
    %c0_125 = arith.constant 0 : index
    %138 = vector.load %arg14[%c8_124, %c0_125] : memref<176x64xf32, #tpu.memory_space<vmem>>, vector<160x64xf32>
    tpu.vector_store %arg14[%c8_124, %c0_125], %137 {strides = array<i32>} : memref<176x64xf32, #tpu.memory_space<vmem>>, vector<160x64xf32>,
    %c8_126 = arith.constant 8 : index
    %c0_127 = arith.constant 0 : index
    %139 = vector.load %arg14[%c8_126, %c0_127] : memref<176x64xf32, #tpu.memory_space<vmem>>, vector<160x64xf32>
    %c0_128 = arith.constant 0 : index
    %c0_129 = arith.constant 0 : index
    %140 = vector.load %arg9[%c0_128, %c0_129] : memref<64x128xf32, #tpu.memory_space<vmem>>, vector<64x128xf32>
    %cst_130 = arith.constant dense<0.000000e+00> : vector<160x128xf32>
    %141 = tpu.matmul %139, %140, %cst_130 {dimension_numbers = #tpu.dot_dimension_numbers<[1], [0], [0], [1], [0, 0, 1, 1], [], []>} : vector<160x64xf32>, vector<64x128xf32>, vector<160x128xf32> -> vector<160x128xf32>
    %c0_131 = arith.constant 0 : index
    %c0_132 = arith.constant 0 : index
    %142 = vector.load %arg10[%c0_131, %c0_132] : memref<1x128xf32, #tpu.memory_space<vmem>>, vector<1x128xf32>
    %143 = vector.broadcast %142 : vector<1x128xf32> to vector<160x128xf32>
    %144 = arith.addf %141, %143 : vector<160x128xf32>
    %145 = arith.mulf %144, %5 : vector<160x128xf32>
    %c0_133 = arith.constant 0 : index
    %c0_134 = arith.constant 0 : index
    %146 = vector.load %arg11[%c0_133, %c0_134] : memref<128x128xf32, #tpu.memory_space<vmem>>, vector<128x128xf32>
    %cst_135 = arith.constant dense<0.000000e+00> : vector<160x128xf32>
    %147 = tpu.matmul %145, %146, %cst_135 {dimension_numbers = #tpu.dot_dimension_numbers<[1], [0], [0], [1], [0, 0, 1, 1], [], []>} : vector<160x128xf32>, vector<128x128xf32>, vector<160x128xf32> -> vector<160x128xf32>
    %c0_136 = arith.constant 0 : index
    %c0_137 = arith.constant 0 : index
    %148 = vector.load %arg12[%c0_136, %c0_137] : memref<1x128xf32, #tpu.memory_space<vmem>>, vector<1x128xf32>
    %149 = vector.broadcast %148 : vector<1x128xf32> to vector<160x128xf32>
    %150 = arith.addf %147, %149 : vector<160x128xf32>
    %151 = arith.mulf %150, %5 : vector<160x128xf32>
    %152 = vector.extract_strided_slice %151 {offsets = [8, 0], sizes = [64, 128], strides = [1, 1]} : vector<160x128xf32> to vector<64x128xf32>
    %153 = vector.extract_strided_slice %151 {offsets = [88, 0], sizes = [64, 128], strides = [1, 1]} : vector<160x128xf32> to vector<64x128xf32>
    %154 = tpu.concatenate %152, %153 in 0 : vector<64x128xf32>, vector<64x128xf32> -> vector<128x128xf32>
    %c0_138 = arith.constant 0 : index
    %c0_139 = arith.constant 0 : index
    %c0_140 = arith.constant 0 : index
    %155 = vector.load %arg13[%c0_138, %c0_139, %c0_140] : memref<1x128x128xf32, #tpu.memory_space<vmem>>, vector<1x128x128xf32>
    %156 = vector.shape_cast %155 : vector<1x128x128xf32> to vector<128x128xf32>
    %157 = vector.shape_cast %154 : vector<128x128xf32> to vector<1x128x128xf32>
    tpu.vector_store %arg13[%c0_138, %c0_139, %c0_140], %157 {strides = array<i32>} : memref<1x128x128xf32, #tpu.memory_space<vmem>>, vector<1x128x128xf32>,
    return
  }
  func.func @transform_0(%arg0: i32) -> (i32, i32, i32) {
    %c0_i32 = arith.constant 0 : i32
    %c0_i32_0 = arith.constant 0 : i32
    %c0_i32_1 = arith.constant 0 : i32
    return %arg0, %c0_i32, %c0_i32_0 : i32, i32, i32
  }
  func.func @transform_1(%arg0: i32) -> (i32, i32, i32) {
    %c0_i32 = arith.constant 0 : i32
    %c0_i32_0 = arith.constant 0 : i32
    %c0_i32_1 = arith.constant 0 : i32
    return %arg0, %c0_i32, %c0_i32_0 : i32, i32, i32
  }
  func.func @transform_2(%arg0: i32) -> (i32, i32) {
    %c0_i32 = arith.constant 0 : i32
    %c0_i32_0 = arith.constant 0 : i32
    %c0_i32_1 = arith.constant 0 : i32
    return %c0_i32, %c0_i32_0 : i32, i32
  }
  func.func @transform_3(%arg0: i32) -> (i32, i32) {
    %c0_i32 = arith.constant 0 : i32
    %c0_i32_0 = arith.constant 0 : i32
    %c0_i32_1 = arith.constant 0 : i32
    return %c0_i32, %c0_i32_0 : i32, i32
  }
  func.func @transform_4(%arg0: i32) -> (i32, i32, i32) {
    %c0_i32 = arith.constant 0 : i32
    %c0_i32_0 = arith.constant 0 : i32
    %c0_i32_1 = arith.constant 0 : i32
    %c0_i32_2 = arith.constant 0 : i32
    return %c0_i32, %c0_i32_0, %c0_i32_1 : i32, i32, i32
  }
  func.func @transform_5(%arg0: i32) -> (i32, i32, i32) {
    %c0_i32 = arith.constant 0 : i32
    %c0_i32_0 = arith.constant 0 : i32
    %c0_i32_1 = arith.constant 0 : i32
    %c0_i32_2 = arith.constant 0 : i32
    return %c0_i32, %c0_i32_0, %c0_i32_1 : i32, i32, i32
  }
  func.func @transform_6(%arg0: i32) -> (i32, i32, i32) {
    %c0_i32 = arith.constant 0 : i32
    %c0_i32_0 = arith.constant 0 : i32
    %c0_i32_1 = arith.constant 0 : i32
    %c0_i32_2 = arith.constant 0 : i32
    return %c0_i32, %c0_i32_0, %c0_i32_1 : i32, i32, i32
  }
  func.func @transform_7(%arg0: i32) -> (i32, i32, i32) {
    %c0_i32 = arith.constant 0 : i32
    %c0_i32_0 = arith.constant 0 : i32
    %c0_i32_1 = arith.constant 0 : i32
    %c0_i32_2 = arith.constant 0 : i32
    return %c0_i32, %c0_i32_0, %c0_i32_1 : i32, i32, i32
  }
  func.func @transform_8(%arg0: i32) -> (i32, i32) {
    %c0_i32 = arith.constant 0 : i32
    %c0_i32_0 = arith.constant 0 : i32
    %c0_i32_1 = arith.constant 0 : i32
    return %c0_i32, %c0_i32_0 : i32, i32
  }
  func.func @transform_9(%arg0: i32) -> (i32, i32) {
    %c0_i32 = arith.constant 0 : i32
    %c0_i32_0 = arith.constant 0 : i32
    %c0_i32_1 = arith.constant 0 : i32
    return %c0_i32, %c0_i32_0 : i32, i32
  }
  func.func @transform_10(%arg0: i32) -> (i32, i32) {
    %c0_i32 = arith.constant 0 : i32
    %c0_i32_0 = arith.constant 0 : i32
    %c0_i32_1 = arith.constant 0 : i32
    return %c0_i32, %c0_i32_0 : i32, i32
  }
  func.func @transform_11(%arg0: i32) -> (i32, i32) {
    %c0_i32 = arith.constant 0 : i32
    %c0_i32_0 = arith.constant 0 : i32
    %c0_i32_1 = arith.constant 0 : i32
    return %c0_i32, %c0_i32_0 : i32, i32
  }
  func.func @transform_12(%arg0: i32) -> (i32, i32, i32) {
    %c0_i32 = arith.constant 0 : i32
    %c0_i32_0 = arith.constant 0 : i32
    %c0_i32_1 = arith.constant 0 : i32
    return %arg0, %c0_i32, %c0_i32_0 : i32, i32, i32
  }
}

</mosaic_0001>

<bundles_post_ra>
// kernel: tpu_custom_call.1
= control target key start
LH: loop header
LB: loop body
LE: loop exit
PB: predicated region body
PF: predicated region fallthrough
CT: control target
= control target key end

     0   :  { %17 = vsyncpa [#allocation4], 0  ;;  %s9079_s0 = inlined_call_operand.vmem [shape: f32[1,128,64], index: 0, kind: input, shape index: {}]   ;;  %s9080_s1 = inlined_call_operand.vmem [shape: f32[1,160,1], index: 1, kind: input, shape index: {}]   ;;  %s9081_s2 = inlined_call_operand.vmem [shape: f32[64,64], index: 2, kind: input, shape index: {}]   ;;  %s9082_s3 = inlined_call_operand.vmem [shape: f32[1,64], index: 3, kind: input, shape index: {}]   ;;  %s9083_s4 = inlined_call_operand.hbm [shape: f32[12,64,64], index: 4, kind: input, shape index: {}]   ;;  %s9084_s5 = inlined_call_operand.vmem [shape: f32[4,1,64], index: 5, kind: input, shape index: {}]   ;;  %s9085_s6 = inlined_call_operand.vmem [shape: f32[4,64,64], index: 6, kind: input, shape index: {}]   ;;  %s9086_s7 = inlined_call_operand.vmem [shape: f32[4,1,64], index: 7, kind: input, shape index: {}]   ;;  %s9087_s8 = inlined_call_operand.hbm [shape: f32[64,128], index: 8, kind: input, shape index: {}]   ;;  %s9088_s9 = inlined_call_operand.vmem [shape: f32[1,128], index: 9, kind: input, shape index: {}]   ;;  %s9089_s10 = inlined_call_operand.hbm [shape: f32[128,128], index: 10, kind: input, shape index: {}]   ;;  %s9090_s11 = inlined_call_operand.vmem [shape: f32[1,128], index: 11, kind: input, shape index: {}]   ;;  %s9091_s12 = inlined_call_operand.hbm [shape: f32[1,128,128], index: 12, kind: output, shape index: {}]  }
   0x1   :  { %18 = vsyncpa [#allocation7], 0 }
   0x2   :  { %19 = vsyncpa [#allocation5], 0  ;;  %s7357_s21 = smov [#allocation6]   ;;  %s7358_s23 = smov [#allocation3]  }
   0x3   :  { %s51_s22 = sshll.u32 %s7357_s21, 4  ;;  %s33_s24 = sshll.u32 %s7358_s23, 4  ;;  %s52_s22 = int_to_ptr.vmem [resolvable:$true] %s51_s22  ;;  %s34_s24 = int_to_ptr.vmem [resolvable:$true] %s33_s24 }
   0x4   :  { %s7279_s25 = scalar_lea.vmem %s52_s22, 1024  ;;  %p7284_p1 = scmp.lt.s32.totalorder %s52_s22, %s52_s22 }
   0x5   :  { %p7280_p0 = scmp.ne.s32.totalorder %s52_s22, %s7279_s25  ;;  %p7285_p2 = scmp.lt.s32.totalorder %s7279_s25, %s7279_s25 }
   0x7   :  { %p7286_p3 = por %p7285_p2, %p7284_p1 }
   0x9   :  { %p7287_p4 = pnand %p7286_p3, %p7280_p0 }
   0xb   :  { %7290 = shalt.err (!%p7287_p4)
}
   0xc   :  { %s7359_s26 = smov 128   ;;  %s7360_s27 = smov 8  }
   0xd   :  { %57 = dma.hbm_to_vmem [thread:$0]  %s9087_s8, 1024, %s52_s22, [#allocation7], %s7359_s26, %s7359_s26, %s7360_s27  }
   0xe   :  { %s7299_s30 = scalar_lea.vmem %s34_s24, 12288  ;;  %p7304_p6 = scmp.lt.s32.totalorder %s34_s24, %s34_s24 }
   0xf   :  { %p7300_p5 = scmp.ne.s32.totalorder %s34_s24, %s7299_s30  ;;  %p7305_p7 = scmp.lt.s32.totalorder %s7299_s30, %s7299_s30 }
  0x11   :  { %p7306_p8 = por %p7305_p7, %p7304_p6 }
  0x13   :  { %p7307_p9 = pnand %p7306_p8, %p7300_p5 }
  0x15   :  { %7310 = shalt.err (!%p7307_p9)
}
  0x16   :  { %39 = dma.hbm_to_vmem [thread:$0]  %s9083_s4, 12288, %s34_s24, [#allocation4], %s7359_s26, %s7359_s26, %s7360_s27  }
  0x17   :  { %s7361_s15 = smov [#allocation8]  }
  0x18   :  { %s65_s16 = sshll.u32 %s7361_s15, 4  ;;  %s66_s16 = int_to_ptr.vmem [resolvable:$true] %s65_s16 }
  0x19   :  { %s7319_s17 = scalar_lea.vmem %s66_s16, 2048  ;;  %p7324_p11 = scmp.lt.s32.totalorder %s66_s16, %s66_s16 }
  0x1a   :  { %p7320_p10 = scmp.ne.s32.totalorder %s66_s16, %s7319_s17  ;;  %p7325_p12 = scmp.lt.s32.totalorder %s7319_s17, %s7319_s17 }
  0x1c   :  { %p7326_p13 = por %p7325_p12, %p7324_p11 }
  0x1e   :  { %p7327_p0 = pnand %p7326_p13, %p7320_p10 }
  0x20   :  { %7330 = shalt.err (!%p7327_p0)
}
  0x21   :  { %71 = dma.hbm_to_vmem [thread:$0]  %s9089_s10, 2048, %s66_s16, [#allocation7], %s7359_s26, %s7359_s26, %s7360_s27  }
  0x22   :  { %7351 = dma.done.wait [#allocation4], 12288  }
  0x23   :  { %7352 = vsyncadd [#allocation4], 4294955008 }
  0x24   :  { %7353 = dma.done.wait [#allocation7], 3072  }
  0x25   :  { %7354 = vsyncadd [#allocation7], 4294964224  ;;  %vm203_vm0 = vcmask 523264   ;;  %v7362_v0 = vmov 0.0   ;;  %v249_v1 = vld [vmem:[%s9081_s2 + $0x38] sm:$0xff]  ;;  %v248_v2 = vld [vmem:[%s9081_s2 + $0x30] sm:$0xff] }
  0x26   :  { %207 = vst.msk [vmem:[#allocation2 + $0x18] sm:$0xff] %vm203_vm0, %v7362_v0  ;;  %204 = vst.msk [vmem:[#allocation2] sm:$0xff] %vm203_vm0, %v7362_v0  ;;  %6361 = vmatprep.subr.mxu0 %v249_v1  ;;  %7245 = vmatprep.subr.mxu1 %v249_v1  ;;  %v247_v3 = vld [vmem:[%s9081_s2 + $0x28] sm:$0xff]  ;;  %v226_v4 = vld [vmem:[%s9079_s0] sm:$0xff] }
  0x27   :  { %205 = vst.msk [vmem:[#allocation2 + $0x8] sm:$0xff] %vm203_vm0, %v7362_v0  ;;  %206 = vst.msk [vmem:[#allocation2 + $0x10] sm:$0xff] %vm203_vm0, %v7362_v0  ;;  %6362 = vmatpush3.msra.mxu0 %v249_v1  ;;  %7253 = vmatpush3.msra.mxu1 %v249_v1  ;;  %v246_v5 = vld [vmem:[%s9081_s2 + $0x20] sm:$0xff]  ;;  %v245_v6 = vld [vmem:[%s9081_s2 + $0x18] sm:$0xff] }
  0x28   :  { %208 = vst.msk [vmem:[#allocation2 + $0x20] sm:$0xff] %vm203_vm0, %v7362_v0  ;;  %209 = vst.msk [vmem:[#allocation2 + $0x28] sm:$0xff] %vm203_vm0, %v7362_v0  ;;  %6363 = vmatprep.subr.mxu0 %v248_v2  ;;  %6377 = vmatprep.mubr.msk.f32.mxu0 %vm203_vm0, %v226_v4  ;;  %v244_v7 = vld [vmem:[%s9081_s2 + $0x10] sm:$0xff]  ;;  %v243_v8 = vld [vmem:[%s9081_s2 + $0x8] sm:$0xff] }
  0x29   :  { %210 = vst.msk [vmem:[#allocation2 + $0x30] sm:$0xff] %vm203_vm0, %v7362_v0  ;;  %211 = vst.msk [vmem:[#allocation2 + $0x38] sm:$0xff] %vm203_vm0, %v7362_v0  ;;  %6364 = vmatpush3.msra.mxu0 %v248_v2  ;;  %7246 = vmatprep.subr.mxu1 %v248_v2  ;;  %v242_v9 = vld [vmem:[%s9081_s2] sm:$0xff]  ;;  %v227_v10 = vld [vmem:[%s9079_s0 + $0x8] sm:$0xff] }
  0x2a   :  { %212 = vst.msk [vmem:[#allocation2 + $0x40] sm:$0xff] %vm203_vm0, %v7362_v0  ;;  %213 = vst.msk [vmem:[#allocation2 + $0x48] sm:$0xff] %vm203_vm0, %v7362_v0  ;;  %6365 = vmatprep.subr.mxu0 %v247_v3  ;;  %7254 = vmatpush3.msra.mxu1 %v248_v2  ;;  %v228_v11 = vld [vmem:[%s9079_s0 + $0x10] sm:$0xff]  ;;  %v234_v12 = vld [vmem:[%s9079_s0 + $0x40] sm:$0xff] }
  0x2b   :  { %214 = vst.msk [vmem:[#allocation2 + $0x50] sm:$0xff] %vm203_vm0, %v7362_v0  ;;  %215 = vst.msk [vmem:[#allocation2 + $0x58] sm:$0xff] %vm203_vm0, %v7362_v0  ;;  %6366 = vmatpush3.msra.mxu0 %v247_v3  ;;  %7247 = vmatprep.subr.mxu1 %v247_v3  ;;  %v235_v13 = vld [vmem:[%s9079_s0 + $0x48] sm:$0xff]  ;;  %v236_v15 = vld [vmem:[%s9079_s0 + $0x50] sm:$0xff] }
  0x2c   :  { %216 = vst.msk [vmem:[#allocation2 + $0x60] sm:$0xff] %vm203_vm0, %v7362_v0  ;;  %217 = vst.msk [vmem:[#allocation2 + $0x68] sm:$0xff] %vm203_vm0, %v7362_v0  ;;  %6367 = vmatprep.subr.mxu0 %v246_v5  ;;  %7255 = vmatpush3.msra.mxu1 %v247_v3  ;;  %v542_v14 = vld [vmem:[#allocation3 + $0x78] sm:$0xff]  ;;  %v229_v16 = vld [vmem:[%s9079_s0 + $0x18] sm:$0xff] }
  0x2d   :  { %218 = vst.msk [vmem:[#allocation2 + $0x70] sm:$0xff] %vm203_vm0, %v7362_v0  ;;  %219 = vst.msk [vmem:[#allocation2 + $0x78] sm:$0xff] %vm203_vm0, %v7362_v0  ;;  %6368 = vmatpush3.msra.mxu0 %v246_v5  ;;  %7248 = vmatprep.subr.mxu1 %v246_v5  ;;  %v533_v17 = vld [vmem:[#allocation3 + $0x38] sm:$0xff]  ;;  %v230_v18 = vld [vmem:[%s9079_s0 + $0x20] sm:$0xff] }
  0x2e   :  { %220 = vst.msk [vmem:[#allocation2 + $0x80] sm:$0xff] %vm203_vm0, %v7362_v0  ;;  %221 = vst.msk [vmem:[#allocation2 + $0x88] sm:$0xff] %vm203_vm0, %v7362_v0  ;;  %6369 = vmatprep.subr.mxu0 %v245_v6  ;;  %7256 = vmatpush3.msra.mxu1 %v246_v5  ;;  %v541_v19 = vld [vmem:[#allocation3 + $0x70] sm:$0xff]  ;;  %v237_v20 = vld [vmem:[%s9079_s0 + $0x58] sm:$0xff] }
  0x2f   :  { %222 = vst.msk [vmem:[#allocation2 + $0x90] sm:$0xff] %vm203_vm0, %v7362_v0  ;;  %223 = vst.msk [vmem:[#allocation2 + $0x98] sm:$0xff] %vm203_vm0, %v7362_v0  ;;  %6370 = vmatpush3.msra.mxu0 %v245_v6  ;;  %7249 = vmatprep.subr.mxu1 %v245_v6  ;;  %v238_v21 = vld [vmem:[%s9079_s0 + $0x60] sm:$0xff]  ;;  %v231_v22 = vld [vmem:[%s9079_s0 + $0x28] sm:$0xff] }
  0x30   :  { %224 = vst.msk [vmem:[#allocation2 + $0xa0] sm:$0xff] %vm203_vm0, %v7362_v0  ;;  %225 = vst.msk [vmem:[#allocation2 + $0xa8] sm:$0xff] %vm203_vm0, %v7362_v0  ;;  %6371 = vmatprep.subr.mxu0 %v244_v7  ;;  %7257 = vmatpush3.msra.mxu1 %v245_v6  ;;  %v532_v23 = vld [vmem:[#allocation3 + $0x30] sm:$0xff]  ;;  %v232_v24 = vld [vmem:[%s9079_s0 + $0x30] sm:$0xff] }
  0x31   :  { %6372 = vmatpush3.msra.mxu0 %v244_v7  ;;  %7250 = vmatprep.subr.mxu1 %v244_v7  ;;  %v239_v25 = vld [vmem:[%s9079_s0 + $0x68] sm:$0xff]  ;;  %v240_v26 = vld [vmem:[%s9079_s0 + $0x70] sm:$0xff]  ;;  %v233_v27 = vld [vmem:[%s9079_s0 + $0x38] sm:$0xff] }
  0x32   :  { %6373 = vmatprep.subr.mxu0 %v243_v8  ;;  %7258 = vmatpush3.msra.mxu1 %v244_v7  ;;  %v241_v28 = vld [vmem:[%s9079_s0 + $0x78] sm:$0xff]  ;;  %v539_v31 = vld [vmem:[#allocation3 + $0x60] sm:$0xff]  ;;  %v538_v33 = vld [vmem:[#allocation3 + $0x58] sm:$0xff] }
  0x33   :  { %6374 = vmatpush3.msra.mxu0 %v243_v8  ;;  %7251 = vmatprep.subr.mxu1 %v243_v8  ;;  %v540_v29 = vld [vmem:[#allocation3 + $0x68] sm:$0xff]  ;;  %v530_v32 = vld [vmem:[#allocation3 + $0x20] sm:$0xff]  ;;  %v529_v34 = vld [vmem:[#allocation3 + $0x18] sm:$0xff] }
  0x34   :  { %6375 = vmatprep.subr.mxu0 %v242_v9  ;;  %7259 = vmatpush3.msra.mxu1 %v243_v8  ;;  %v531_v30 = vld [vmem:[#allocation3 + $0x28] sm:$0xff]  ;;  %v537_v35 = vld [vmem:[#allocation3 + $0x50] sm:$0xff]  ;;  %v535_v39 = vld [vmem:[#allocation3 + $0x40] sm:$0xff] }
  0x35   :  { %6376 = vmatpush3.msra.mxu0 %v242_v9  ;;  %7252 = vmatprep.subr.mxu1 %v242_v9  ;;  %v528_v36 = vld [vmem:[#allocation3 + $0x10] sm:$0xff]  ;;  %v536_v37 = vld [vmem:[#allocation3 + $0x48] sm:$0xff]  ;;  %v526_v40 = vld [vmem:[#allocation3] sm:$0xff] }
  0x36   :  { %6378 = vmatmul.mubr.msk.f32.vlgmr.msra.gmra.mxu0 %vm203_vm0, %v227_v10  ;;  %7260 = vmatpush3.msra.mxu1 %v242_v9  ;;  %v527_v38 = vld [vmem:[#allocation3 + $0x8] sm:$0xff]  ;;  %v7558_v41 = vld [vmem:[#allocation2 + $0x8] sm:$0xff]  ;;  %v7566_v44 = vld [vmem:[%s9082_s3] ss:$0 sm:$0xff] }
  0x37   :  { %6380 = vmatprep.mubr.msk.f32.mxu0 %vm203_vm0, %v228_v11  ;;  %6389 = vmatprep.mubr.msk.f32.mxu1 %vm203_vm0, %v234_v12  ;;  %v486_v42 = vld [vmem:[#allocation2 + $0x7] sm:$0xff] }
  0x38   :  { %6390 = vmatmul.mubr.msk.f32.vlgmr.msra.gmra.mxu1 %vm203_vm0, %v235_v13  ;;  %6401 = vmatprep.subr.mxu1 %v542_v14  ;;  %v1001_v43 = vld [vmem:[#allocation3 + $0xb8] sm:$0xff]  ;;  %v1000_v2 = vld [vmem:[#allocation3 + $0xb0] sm:$0xff] }
  0x39   :  { %6392 = vmatprep.mubr.msk.f32.mxu1 %vm203_vm0, %v236_v15  ;;  %6402 = vmatpush3.msra.mxu1 %v542_v14  ;;  %v999_v15 = vld [vmem:[#allocation3 + $0xa8] sm:$0xff] }
  0x3a   :  { %6381 = vmatmul.mubr.msk.f32.gmra.mxu0 %vm203_vm0, %v229_v16  ;;  %6447 = vmatprep.subr.mxu0 %v533_v17 }
  0x3b   :  { %6383 = vmatprep.mubr.msk.f32.mxu0 %vm203_vm0, %v230_v18  ;;  %6403 = vmatprep.subr.mxu1 %v541_v19 }
  0x3c   :  { %6393 = vmatmul.mubr.msk.f32.gmra.mxu1 %vm203_vm0, %v237_v20  ;;  %6448 = vmatpush3.msra.mxu0 %v533_v17 }
  0x3d   :  { %6395 = vmatprep.mubr.msk.f32.mxu1 %vm203_vm0, %v238_v21  ;;  %6404 = vmatpush3.msra.mxu1 %v541_v19 }
  0x3e   :  { %6384 = vmatmul.mubr.msk.f32.gmra.mxu0 %vm203_vm0, %v231_v22  ;;  %6449 = vmatprep.subr.mxu0 %v532_v23 }
  0x3f   :  { %6386 = vmatprep.mubr.msk.f32.mxu0 %vm203_vm0, %v232_v24  ;;  %6450 = vmatpush3.msra.mxu0 %v532_v23  ;;  %v998_v23 = vld [vmem:[#allocation3 + $0xa0] sm:$0xff] }
  0x40   :  { %6396 = vmatmul.mubr.msk.f32.gmra.mxu1 %vm203_vm0, %v239_v25  ;;  %6405 = vmatprep.subr.mxu1 %v540_v29 }
  0x41   :  { %6398 = vmatprep.mubr.msk.f32.mxu1 %vm203_vm0, %v240_v26  ;;  %6451 = vmatprep.subr.mxu0 %v531_v30 }
  0x42   :  { %6387 = vmatmul.mubr.msk.f32.gmra.mxu0 %vm203_vm0, %v233_v27  ;;  %6406 = vmatpush3.msra.mxu1 %v540_v29 }
  0x43   :  { %6452 = vmatpush3.msra.mxu0 %v531_v30  ;;  %6407 = vmatprep.subr.mxu1 %v539_v31 }
  0x44   :  { %6399 = vmatmul.mubr.msk.f32.gmra.mxu1 %vm203_vm0, %v241_v28  ;;  %6453 = vmatprep.subr.mxu0 %v530_v32  ;;  %v997_v28 = vld [vmem:[#allocation3 + $0x98] sm:$0xff] }
  0x45   :  { %6408 = vmatpush3.msra.mxu1 %v539_v31  ;;  %6454 = vmatpush3.msra.mxu0 %v530_v32 }
  0x46   :  { %6409 = vmatprep.subr.mxu1 %v538_v33  ;;  %6455 = vmatprep.subr.mxu0 %v529_v34 }
  0x47   :  { %6410 = vmatpush3.msra.mxu1 %v538_v33  ;;  %6456 = vmatpush3.msra.mxu0 %v529_v34  ;;  %v7640_v33 = vld [vmem:[#allocation2 + $0x50] sm:$0xff]  ;;  %v7642_v34 = vld [vmem:[#allocation2 + $0x58] sm:$0xff] }
  0x48   :  { %6411 = vmatprep.subr.mxu1 %v537_v35  ;;  %6457 = vmatprep.subr.mxu0 %v528_v36 }
  0x49   :  { %6412 = vmatpush3.msra.mxu1 %v537_v35  ;;  %6458 = vmatpush3.msra.mxu0 %v528_v36  ;;  %v496_v35 = vld [vmem:[#allocation2 + $0x57] sm:$0xff] }
  0x4a   :  { %6413 = vmatprep.subr.mxu1 %v536_v37  ;;  %6459 = vmatprep.subr.mxu0 %v527_v38 }
  0x4b   :  { %6414 = vmatpush3.msra.mxu1 %v536_v37  ;;  %6460 = vmatpush3.msra.mxu0 %v527_v38  ;;  %v996_v37 = vld [vmem:[#allocation3 + $0x90] sm:$0xff] }
  0x4c   :  { %6415 = vmatprep.subr.mxu1 %v535_v39  ;;  %6461 = vmatprep.subr.mxu0 %v526_v40 }
  0x4d   :  { %6416 = vmatpush3.msra.mxu1 %v535_v39  ;;  %6417 = vmatprep.mubr.msk.f32.mxu1 %vm203_vm0, %v7558_v41 }
  0x4e   :  { %6462 = vmatpush3.msra.mxu0 %v526_v40  ;;  %6463 = vmatprep.mubr.msk.f32.mxu0 %vm203_vm0, %v486_v42  ;;  %v995_v40 = vld [vmem:[#allocation3 + $0x88] sm:$0xff] }
  0x4f   :  { %6493 = vmatprep.subr.mxu1 %v1001_v43 }
  0xf6   :  { %v6379_v45 = vpop.f32.mrf.mxu0 }
  0xf7   :  { %v377_v46 = vadd.f32 %v6379_v45, %v7566_v44 }
  0xf8   :  { %v371_v47 = vpop.f32.mrf.mxu0  ;;  %v6391_v48 = vpop.f32.mrf.mxu1 }
  0xf9   :  { %451 = vst.msk [vmem:[#allocation2 + $0x18] sm:$0xff] %vm203_vm0, %v377_v46  ;;  %v372_v49 = vadd.f32 %v7566_v44, %v371_v47  ;;  %v417_v50 = vadd.f32 %v6391_v48, %v7566_v44  ;;  %v994_v46 = vld [vmem:[#allocation3 + $0x80] sm:$0xff] }
  0xfa   :  { %v6382_v51 = vpop.f32.mrf.mxu0  ;;  %v411_v52 = vpop.f32.mrf.mxu1 }
  0xfb   :  { %450 = vst.msk [vmem:[#allocation2 + $0x10] sm:$0xff] %vm203_vm0, %v372_v49  ;;  %v387_v53 = vadd.f32 %v6382_v51, %v7566_v44  ;;  %459 = vst.msk [vmem:[#allocation2 + $0x68] sm:$0xff] %vm203_vm0, %v417_v50  ;;  %v412_v54 = vadd.f32 %v7566_v44, %v411_v52 }
  0xfc   :  { %v381_v55 = vpop.f32.mrf.mxu0  ;;  %v6394_v56 = vpop.f32.mrf.mxu1 }
  0xfd   :  { %453 = vst.msk [vmem:[#allocation2 + $0x28] sm:$0xff] %vm203_vm0, %v387_v53  ;;  %v382_v57 = vadd.f32 %v7566_v44, %v381_v55  ;;  %458 = vst.msk [vmem:[#allocation2 + $0x60] sm:$0xff] %vm203_vm0, %v412_v54  ;;  %v427_v58 = vadd.f32 %v6394_v56, %v7566_v44 }
  0xfe   :  { %v6385_v59 = vpop.f32.mrf.mxu0  ;;  %v421_v60 = vpop.f32.mrf.mxu1 }
  0xff   :  { %452 = vst.msk [vmem:[#allocation2 + $0x20] sm:$0xff] %vm203_vm0, %v382_v57  ;;  %v397_v61 = vadd.f32 %v6385_v59, %v7566_v44  ;;  %461 = vst.msk [vmem:[#allocation2 + $0x78] sm:$0xff] %vm203_vm0, %v427_v58  ;;  %v422_v62 = vadd.f32 %v7566_v44, %v421_v60  ;;  %v7690_v57 = vld [vmem:[#allocation2 + $0xa0] sm:$0xff] }
 0x100   :  { %v391_v63 = vpop.f32.mrf.mxu0  ;;  %v6397_v0 = vpop.f32.mrf.mxu1  ;;  %v7595_v10 = vld [vmem:[#allocation2 + $0x18] sm:$0xff]  ;;  %9159 = vst [vmem:[#allocation16_spill] sm:$0xff] %v7690_v57 }
 0x101   :  { %455 = vst.msk [vmem:[#allocation2 + $0x38] sm:$0xff] %vm203_vm0, %v397_v61  ;;  %v392_v1 = vadd.f32 %v7566_v44, %v391_v63  ;;  %460 = vst.msk [vmem:[#allocation2 + $0x70] sm:$0xff] %vm203_vm0, %v422_v62  ;;  %v437_v3 = vadd.f32 %v6397_v0, %v7566_v44 }
 0x102   :  { %v6388_v4 = vpop.f32.mrf.mxu0  ;;  %v7588_v5 = vld [vmem:[#allocation2 + $0x10] sm:$0xff]  ;;  %v431_v8 = vpop.f32.mrf.mxu1  ;;  %v7655_v42 = vld [vmem:[#allocation2 + $0x68] sm:$0xff] }
 0x103   :  { %v487_v6 = vld [vmem:[#allocation2 + $0xf] sm:$0xff]  ;;  %v488_v7 = vld [vmem:[#allocation2 + $0x17] sm:$0xff]  ;;  %454 = vst.msk [vmem:[#allocation2 + $0x30] sm:$0xff] %vm203_vm0, %v392_v1  ;;  %v407_v9 = vadd.f32 %v6388_v4, %v7566_v44  ;;  %6418 = vmatmul.mubr.msk.f32.vlgmr.msra.gmra.mxu1 %vm203_vm0, %v7588_v5  ;;  %463 = vst.msk [vmem:[#allocation2 + $0x88] sm:$0xff] %vm203_vm0, %v437_v3  ;;  %v432_v11 = vadd.f32 %v7566_v44, %v431_v8 }
 0x104   :  { %6464 = vmatmul.mubr.msk.f32.vlgmr.msra.gmra.mxu0 %vm203_vm0, %v487_v6  ;;  %6494 = vmatpush3.msra.mxu1 %v1001_v43  ;;  %v401_v12 = vpop.f32.mrf.mxu0  ;;  %v6400_v13 = vpop.f32.mrf.mxu1  ;;  %v7612_v21 = vld [vmem:[#allocation2 + $0x28] sm:$0xff]  ;;  %v7650_v38 = vld [vmem:[#allocation2 + $0x60] sm:$0xff]  ;;  %v507_v60 = vld [vmem:[#allocation2 + $0x11] sm:$0xff] }
 0x105   :  { %6420 = vmatprep.mubr.msk.f32.mxu1 %vm203_vm0, %v7595_v10  ;;  %457 = vst.msk [vmem:[#allocation2 + $0x48] sm:$0xff] %vm203_vm0, %v407_v9  ;;  %v402_v14 = vadd.f32 %v7566_v44, %v401_v12  ;;  %6466 = vmatprep.mubr.msk.f32.mxu0 %vm203_vm0, %v488_v7  ;;  %462 = vst.msk [vmem:[#allocation2 + $0x80] sm:$0xff] %vm203_vm0, %v432_v11  ;;  %v447_v16 = vadd.f32 %v6400_v13, %v7566_v44  ;;  %v497_v39 = vld [vmem:[#allocation2 + $0x5f] sm:$0xff]  ;;  %v498_v43 = vld [vmem:[#allocation2 + $0x67] sm:$0xff] }
 0x106   :  { %6495 = vmatprep.subr.mxu1 %v1000_v2  ;;  %v7606_v17 = vld [vmem:[#allocation2 + $0x20] sm:$0xff]  ;;  %v441_v20 = vpop.f32.mrf.mxu1  ;;  %v7665_v47 = vld [vmem:[#allocation2 + $0x78] sm:$0xff]  ;;  %v506_v59 = vld [vmem:[#allocation2 + $0x9] sm:$0xff] }
 0x107   :  { %v489_v18 = vld [vmem:[#allocation2 + $0x1f] sm:$0xff]  ;;  %v490_v19 = vld [vmem:[#allocation2 + $0x27] sm:$0xff]  ;;  %6496 = vmatpush3.msra.mxu1 %v1000_v2  ;;  %456 = vst.msk [vmem:[#allocation2 + $0x40] sm:$0xff] %vm203_vm0, %v402_v14  ;;  %465 = vst.msk [vmem:[#allocation2 + $0x98] sm:$0xff] %vm203_vm0, %v447_v16  ;;  %v442_v22 = vadd.f32 %v7566_v44, %v441_v20 }
 0x108   :  { %6421 = vmatmul.mubr.msk.f32.gmra.mxu1 %vm203_vm0, %v7606_v17  ;;  %6467 = vmatmul.mubr.msk.f32.gmra.mxu0 %vm203_vm0, %v489_v18  ;;  %v7625_v27 = vld [vmem:[#allocation2 + $0x38] sm:$0xff]  ;;  %v7660_v44 = vld [vmem:[#allocation2 + $0x70] sm:$0xff]  ;;  %v509_v62 = vld [vmem:[#allocation2 + $0x21] sm:$0xff] }
 0x109   :  { %6423 = vmatprep.mubr.msk.f32.mxu1 %vm203_vm0, %v7612_v21  ;;  %6469 = vmatprep.mubr.msk.f32.mxu0 %vm203_vm0, %v490_v19  ;;  %464 = vst.msk [vmem:[#allocation2 + $0x90] sm:$0xff] %vm203_vm0, %v442_v22  ;;  %v499_v45 = vld [vmem:[#allocation2 + $0x6f] sm:$0xff]  ;;  %v500_v48 = vld [vmem:[#allocation2 + $0x77] sm:$0xff]  ;;  %v517_v7 = vld [vmem:[#allocation2 + $0x61] sm:$0xff] }
 0x10a   :  { %6497 = vmatprep.subr.mxu1 %v999_v15  ;;  %v7620_v24 = vld [vmem:[#allocation2 + $0x30] sm:$0xff]  ;;  %v7675_v51 = vld [vmem:[#allocation2 + $0x88] sm:$0xff]  ;;  %v508_v61 = vld [vmem:[#allocation2 + $0x19] sm:$0xff] }
 0x10b   :  { %v491_v25 = vld [vmem:[#allocation2 + $0x2f] sm:$0xff]  ;;  %v492_v26 = vld [vmem:[#allocation2 + $0x37] sm:$0xff]  ;;  %6498 = vmatpush3.msra.mxu1 %v999_v15  ;;  %9156 = vst [vmem:[#allocation13_spill] sm:$0xff] %v7675_v51  ;;  %v525_v16 = vld [vmem:[#allocation2 + $0xa1] sm:$0xff] }
 0x10c   :  { %6424 = vmatmul.mubr.msk.f32.gmra.mxu1 %vm203_vm0, %v7620_v24  ;;  %6470 = vmatmul.mubr.msk.f32.gmra.mxu0 %vm203_vm0, %v491_v25  ;;  %v7635_v32 = vld [vmem:[#allocation2 + $0x48] sm:$0xff]  ;;  %v7670_v49 = vld [vmem:[#allocation2 + $0x80] sm:$0xff]  ;;  %v511_v0 = vld [vmem:[#allocation2 + $0x31] sm:$0xff] }
 0x10d   :  { %6426 = vmatprep.mubr.msk.f32.mxu1 %vm203_vm0, %v7625_v27  ;;  %6472 = vmatprep.mubr.msk.f32.mxu0 %vm203_vm0, %v492_v26  ;;  %v495_v36 = vld [vmem:[#allocation2 + $0x4f] sm:$0xff]  ;;  %v501_v50 = vld [vmem:[#allocation2 + $0x7f] sm:$0xff]  ;;  %v502_v52 = vld [vmem:[#allocation2 + $0x87] sm:$0xff] }
 0x10e   :  { %6499 = vmatprep.subr.mxu1 %v998_v23  ;;  %v7630_v29 = vld [vmem:[#allocation2 + $0x40] sm:$0xff]  ;;  %v7685_v55 = vld [vmem:[#allocation2 + $0x98] sm:$0xff]  ;;  %v510_v63 = vld [vmem:[#allocation2 + $0x29] sm:$0xff] }
 0x10f   :  { %v493_v30 = vld [vmem:[#allocation2 + $0x3f] sm:$0xff]  ;;  %v494_v31 = vld [vmem:[#allocation2 + $0x47] sm:$0xff]  ;;  %6500 = vmatpush3.msra.mxu1 %v998_v23  ;;  %9158 = vst [vmem:[#allocation15_spill] sm:$0xff] %v7685_v55  ;;  %v515_v4 = vld [vmem:[#allocation2 + $0x51] sm:$0xff] }
 0x110   :  { %6427 = vmatmul.mubr.msk.f32.gmra.mxu1 %vm203_vm0, %v7630_v29  ;;  %6473 = vmatmul.mubr.msk.f32.gmra.mxu0 %vm203_vm0, %v493_v30  ;;  %v7680_v53 = vld [vmem:[#allocation2 + $0x90] sm:$0xff]  ;;  %v505_v58 = vld [vmem:[#allocation2 + $0x9f] sm:$0xff]  ;;  %v1299_v20 = vld [vmem:[%s9085_s6 + $0x28] sm:$0xff]  ;;  %v7363_v30 = vmov 0  }
 0x111   :  { %6429 = vmatprep.mubr.msk.f32.mxu1 %vm203_vm0, %v7635_v32  ;;  %6475 = vmatprep.mubr.msk.f32.mxu0 %vm203_vm0, %v494_v31  ;;  %9157 = vst [vmem:[#allocation14_spill] sm:$0xff] %v7680_v53  ;;  %v503_v54 = vld [vmem:[#allocation2 + $0x8f] sm:$0xff]  ;;  %v504_v56 = vld [vmem:[#allocation2 + $0x97] sm:$0xff]  ;;  %v513_v2 = vld [vmem:[#allocation2 + $0x41] sm:$0xff] }
 0x112   :  { %6501 = vmatprep.subr.mxu1 %v997_v28  ;;  %v512_v1 = vld [vmem:[#allocation2 + $0x39] sm:$0xff]  ;;  %v514_v3 = vld [vmem:[#allocation2 + $0x49] sm:$0xff]  ;;  %v519_v9 = vld [vmem:[#allocation2 + $0x71] sm:$0xff]  ;;  %7269 = vset.pattern.permute.xlu0 %v7363_v30 }
 0x113   :  { %6502 = vmatpush3.msra.mxu1 %v997_v28  ;;  %v516_v6 = vld [vmem:[#allocation2 + $0x59] sm:$0xff]  ;;  %v518_v8 = vld [vmem:[#allocation2 + $0x69] sm:$0xff]  ;;  %v521_v12 = vld [vmem:[#allocation2 + $0x81] sm:$0xff]  ;;  %7270 = vset.pattern.permute.xlu1 %v7363_v30 }
 0x114   :  { %6430 = vmatmul.mubr.msk.f32.gmra.mxu1 %vm203_vm0, %v7640_v33  ;;  %6476 = vmatmul.mubr.msk.f32.gmra.mxu0 %vm203_vm0, %v495_v36  ;;  %v520_v11 = vld [vmem:[#allocation2 + $0x79] sm:$0xff]  ;;  %v522_v13 = vld [vmem:[#allocation2 + $0x89] sm:$0xff]  ;;  %v523_v14 = vld [vmem:[#allocation2 + $0x91] sm:$0xff] }
 0x115   :  { %6432 = vmatprep.mubr.msk.f32.mxu1 %vm203_vm0, %v7642_v34  ;;  %6478 = vmatprep.mubr.msk.f32.mxu0 %vm203_vm0, %v496_v35  ;;  %v524_v15 = vld [vmem:[#allocation2 + $0x99] sm:$0xff]  ;;  %v1300_v19 = vld [vmem:[%s9085_s6 + $0x30] sm:$0xff]  ;;  %v1295_v26 = vld [vmem:[%s9085_s6 + $0x8] sm:$0xff] }
 0x116   :  { %6503 = vmatprep.subr.mxu1 %v996_v37  ;;  %v1301_v18 = vld [vmem:[%s9085_s6 + $0x38] sm:$0xff]  ;;  %v1298_v22 = vld [vmem:[%s9085_s6 + $0x20] sm:$0xff]  ;;  %v1296_v25 = vld [vmem:[%s9085_s6 + $0x10] sm:$0xff] }
 0x117   :  { %6504 = vmatpush3.msra.mxu1 %v996_v37  ;;  %6539 = vmatprep.subr.mxu0 %v1301_v18  ;;  %v1297_v23 = vld [vmem:[%s9085_s6 + $0x18] sm:$0xff]  ;;  %v1294_v28 = vld [vmem:[%s9085_s6] sm:$0xff]  ;;  %v85_v35 = vld [vmem:[%s9080_s1 + $0x10] sm:$0xff] }
 0x118   :  { %6433 = vmatmul.mubr.msk.f32.gmra.mxu1 %vm203_vm0, %v7650_v38  ;;  %6479 = vmatmul.mubr.msk.f32.gmra.mxu0 %vm203_vm0, %v497_v39  ;;  %v83_v31 = vld [vmem:[%s9080_s1] sm:$0xff]  ;;  %v84_v36 = vld [vmem:[%s9080_s1 + $0x8] sm:$0xff]  ;;  %v86_v37 = vld [vmem:[%s9080_s1 + $0x18] sm:$0xff] }
 0x119   :  { %6435 = vmatprep.mubr.msk.f32.mxu1 %vm203_vm0, %v7655_v42  ;;  %6481 = vmatprep.mubr.msk.f32.mxu0 %vm203_vm0, %v498_v43  ;;  %v87_v39 = vld [vmem:[%s9080_s1 + $0x20] sm:$0xff]  ;;  %v1671_v43 = vld [vmem:[#allocation3 + $0x138] sm:$0xff] }
 0x11a   :  { %6505 = vmatprep.subr.mxu1 %v995_v40  ;;  %6540 = vmatpush3.msra.mxu0 %v1301_v18 }
 0x11b   :  { %6506 = vmatpush3.msra.mxu1 %v995_v40  ;;  %6541 = vmatprep.subr.mxu0 %v1300_v19  ;;  %v88_v40 = vld [vmem:[%s9080_s1 + $0x28] sm:$0xff] }
 0x11c   :  { %6436 = vmatmul.mubr.msk.f32.gmra.mxu1 %vm203_vm0, %v7660_v44  ;;  %6482 = vmatmul.mubr.msk.f32.gmra.mxu0 %vm203_vm0, %v499_v45  ;;  %v1670_v45 = vld [vmem:[#allocation3 + $0x130] sm:$0xff] }
 0x11d   :  { %6438 = vmatprep.mubr.msk.f32.mxu1 %vm203_vm0, %v7665_v47  ;;  %6484 = vmatprep.mubr.msk.f32.mxu0 %vm203_vm0, %v500_v48  ;;  %v90_v48 = vld [vmem:[%s9080_s1 + $0x38] sm:$0xff] }
 0x11e   :  { %6507 = vmatprep.subr.mxu1 %v994_v46  ;;  %6542 = vmatpush3.msra.mxu0 %v1300_v19 }
 0x11f   :  { %6508 = vmatpush3.msra.mxu1 %v994_v46  ;;  %6543 = vmatprep.subr.mxu0 %v1299_v20  ;;  %v89_v46 = vld [vmem:[%s9080_s1 + $0x30] sm:$0xff] }
 0x120   :  { %6439 = vmatmul.mubr.msk.f32.gmra.mxu1 %vm203_vm0, %v7670_v49  ;;  %6485 = vmatmul.mubr.msk.f32.gmra.mxu0 %vm203_vm0, %v501_v50  ;;  %v1669_v50 = vld [vmem:[#allocation3 + $0x128] sm:$0xff] }
 0x121   :  { %6441 = vmatprep.mubr.msk.f32.mxu1 %vm203_vm0, %v7675_v51  ;;  %6487 = vmatprep.mubr.msk.f32.mxu0 %vm203_vm0, %v502_v52  ;;  %v91_v52 = vld [vmem:[%s9080_s1 + $0x40] sm:$0xff] }
 0x122   :  { %6544 = vmatpush3.msra.mxu0 %v1299_v20  ;;  %105 = vperm.xlu0 %7269, %v83_v31  }
 0x123   :  { %6545 = vmatprep.subr.mxu0 %v1298_v22  ;;  %115 = vperm.xlu1 %7270, %v85_v35  }
 0x124   :  { %6442 = vmatmul.mubr.msk.f32.gmra.mxu1 %vm203_vm0, %v7680_v53  ;;  %6488 = vmatmul.mubr.msk.f32.gmra.mxu0 %vm203_vm0, %v503_v54  ;;  %v92_v54 = vld [vmem:[%s9080_s1 + $0x48] sm:$0xff] }
 0x125   :  { %6444 = vmatprep.mubr.msk.f32.mxu1 %vm203_vm0, %v7685_v55  ;;  %6490 = vmatprep.mubr.msk.f32.mxu0 %vm203_vm0, %v504_v56  ;;  %v93_v56 = vld [vmem:[%s9080_s1 + $0x50] sm:$0xff] }
 0x126   :  { %6546 = vmatpush3.msra.mxu0 %v1298_v22  ;;  %110 = vperm.xlu0 %7269, %v84_v36  }
 0x127   :  { %6547 = vmatprep.subr.mxu0 %v1297_v23  ;;  %120 = vperm.xlu1 %7270, %v86_v37  }
 0x128   :  { %6445 = vmatmul.mubr.msk.f32.gmra.mxu1 %vm203_vm0, %v7690_v57  ;;  %6491 = vmatmul.mubr.msk.f32.gmra.mxu0 %vm203_vm0, %v505_v58  ;;  %v94_v58 = vld [vmem:[%s9080_s1 + $0x58] sm:$0xff] }
 0x129   :  { %6509 = vmatprep.mubr.msk.f32.mxu1 %vm203_vm0, %v506_v59  ;;  %6548 = vmatpush3.msra.mxu0 %v1297_v23  ;;  %v1668_v59 = vld [vmem:[#allocation3 + $0x120] sm:$0xff] }
 0x12a   :  { %6549 = vmatprep.subr.mxu0 %v1296_v25  ;;  %6585 = vmatprep.subr.mxu1 %v1671_v43 }
 0x12b   :  { %6550 = vmatpush3.msra.mxu0 %v1296_v25  ;;  %125 = vperm.xlu0 %7269, %v87_v39  }
 0x12c   :  { %6510 = vmatmul.mubr.msk.f32.vlgmr.msra.gmra.mxu1 %vm203_vm0, %v507_v60  ;;  %6551 = vmatprep.subr.mxu0 %v1295_v26  ;;  %v95_v60 = vld [vmem:[%s9080_s1 + $0x60] sm:$0xff] }
 0x12d   :  { %6512 = vmatprep.mubr.msk.f32.mxu1 %vm203_vm0, %v508_v61  ;;  %6552 = vmatpush3.msra.mxu0 %v1295_v26  ;;  %v96_v61 = vld [vmem:[%s9080_s1 + $0x68] sm:$0xff] }
 0x12e   :  { %6553 = vmatprep.subr.mxu0 %v1294_v28  ;;  %6586 = vmatpush3.msra.mxu1 %v1671_v43 }
 0x12f   :  { %6554 = vmatpush3.msra.mxu0 %v1294_v28  ;;  %130 = vperm.xlu1 %7270, %v88_v40  }
 0x130   :  { %6513 = vmatmul.mubr.msk.f32.gmra.mxu1 %vm203_vm0, %v509_v62  ;;  %6587 = vmatprep.subr.mxu1 %v1670_v45  ;;  %v1667_v62 = vld [vmem:[#allocation3 + $0x118] sm:$0xff] }
 0x131   :  { %6515 = vmatprep.mubr.msk.f32.mxu1 %vm203_vm0, %v510_v63  ;;  %6588 = vmatpush3.msra.mxu1 %v1670_v45  ;;  %v97_v63 = vld [vmem:[%s9080_s1 + $0x70] sm:$0xff] }
 0x132   :  { %135 = vperm.xlu0 %7269, %v89_v46   ;;  %6589 = vmatprep.subr.mxu1 %v1669_v50 }
 0x133   :  { %140 = vperm.xlu1 %7270, %v90_v48   ;;  %6590 = vmatpush3.msra.mxu1 %v1669_v50 }
 0x134   :  { %6516 = vmatmul.mubr.msk.f32.gmra.mxu1 %vm203_vm0, %v511_v0  ;;  %6591 = vmatprep.subr.mxu1 %v1668_v59  ;;  %v98_v0 = vld [vmem:[%s9080_s1 + $0x78] sm:$0xff] }
 0x135   :  { %6518 = vmatprep.mubr.msk.f32.mxu1 %vm203_vm0, %v512_v1  ;;  %6592 = vmatpush3.msra.mxu1 %v1668_v59  ;;  %v99_v1 = vld [vmem:[%s9080_s1 + $0x80] sm:$0xff] }
 0x136   :  { %145 = vperm.xlu0 %7269, %v91_v52   ;;  %6593 = vmatprep.subr.mxu1 %v1667_v62 }
 0x137   :  { %150 = vperm.xlu1 %7270, %v92_v54   ;;  %6594 = vmatpush3.msra.mxu1 %v1667_v62 }
 0x138   :  { %6519 = vmatmul.mubr.msk.f32.gmra.mxu1 %vm203_vm0, %v513_v2  ;;  %v100_v2 = vld [vmem:[%s9080_s1 + $0x88] sm:$0xff] }
 0x139   :  { %6521 = vmatprep.mubr.msk.f32.mxu1 %vm203_vm0, %v514_v3  ;;  %v101_v3 = vld [vmem:[%s9080_s1 + $0x90] sm:$0xff] }
 0x13a   :  { %155 = vperm.xlu0 %7269, %v93_v56  }
 0x13b   :  { %160 = vperm.xlu1 %7270, %v94_v58  }
 0x13c   :  { %6522 = vmatmul.mubr.msk.f32.gmra.mxu1 %vm203_vm0, %v515_v4  ;;  %v102_v4 = vld [vmem:[%s9080_s1 + $0x98] sm:$0xff] }
 0x13d   :  { %6524 = vmatprep.mubr.msk.f32.mxu1 %vm203_vm0, %v516_v6 }
 0x13e   :  { %165 = vperm.xlu0 %7269, %v95_v60   ;;  %v7824_v60 = vld [vmem:[%s9084_s5] ss:$0 sm:$0xff] }
 0x13f   :  { %170 = vperm.xlu1 %7270, %v96_v61  }
 0x140   :  { %6525 = vmatmul.mubr.msk.f32.gmra.mxu1 %vm203_vm0, %v517_v7 }
 0x141   :  { %6527 = vmatprep.mubr.msk.f32.mxu1 %vm203_vm0, %v518_v8 }
 0x142   :  { %175 = vperm.xlu0 %7269, %v97_v63  }
 0x143   :  { %180 = vperm.xlu1 %7270, %v98_v0  }
 0x144   :  { %6528 = vmatmul.mubr.msk.f32.gmra.mxu1 %vm203_vm0, %v519_v9 }
 0x145   :  { %6530 = vmatprep.mubr.msk.f32.mxu1 %vm203_vm0, %v520_v11 }
 0x146   :  { %185 = vperm.xlu0 %7269, %v99_v1  }
 0x147   :  { %190 = vperm.xlu1 %7270, %v100_v2  }
 0x148   :  { %6531 = vmatmul.mubr.msk.f32.gmra.mxu1 %vm203_vm0, %v521_v12 }
 0x149   :  { %6533 = vmatprep.mubr.msk.f32.mxu1 %vm203_vm0, %v522_v13 }
 0x14a   :  { %195 = vperm.xlu0 %7269, %v101_v3  }
 0x14b   :  { %200 = vperm.xlu1 %7270, %v102_v4  }
 0x14c   :  { %6534 = vmatmul.mubr.msk.f32.gmra.mxu1 %vm203_vm0, %v523_v14 }
 0x14d   :  { %6536 = vmatprep.mubr.msk.f32.mxu1 %vm203_vm0, %v524_v15 }
 0x150   :  { %6537 = vmatmul.mubr.msk.f32.gmra.mxu1 %vm203_vm0, %v525_v16 }
 0x1c3   :  { %v6419_v6 = vpop.f32.mrf.mxu1 }
 0x1c4   :  { %v6465_v7 = vpop.f32.mrf.mxu0 }
 0x1c5   :  { %v669_v8 = vpop.f32.mrf.mxu1  ;;  %v900_v54 = vadd.f32 %v6465_v7, %v6419_v6 }
 0x1c6   :  { %v894_v9 = vpop.f32.mrf.mxu0 }
 0x1c7   :  { %v895_v58 = vadd.f32 %v894_v9, %v669_v8 }
 0x1c8   :  { %v6422_v11 = vpop.f32.mrf.mxu1  ;;  %v6468_v12 = vpop.f32.mrf.mxu0 }
 0x1c9   :  { %v910_v63 = vadd.f32 %v6468_v12, %v6422_v11 }
 0x1ca   :  { %v679_v13 = vpop.f32.mrf.mxu1  ;;  %v904_v15 = vpop.f32.mrf.mxu0 }
 0x1cb   :  { %v905_v3 = vadd.f32 %v904_v15, %v679_v13 }
 0x1cc   :  { %v6425_v14 = vpop.f32.mrf.mxu1  ;;  %v6471_v19 = vpop.f32.mrf.mxu0 }
 0x1cd   :  { %v920_v8 = vadd.f32 %v6471_v19, %v6425_v14 }
 0x1ce   :  { %v689_v16 = vpop.f32.mrf.mxu1  ;;  %v914_v23 = vpop.f32.mrf.mxu0 }
 0x1cf   :  { %v915_v53 = vadd.f32 %v914_v23, %v689_v16 }
 0x1d0   :  { %v6428_v18 = vpop.f32.mrf.mxu1  ;;  %v6474_v28 = vpop.f32.mrf.mxu0 }
 0x1d1   :  { %v930_v15 = vadd.f32 %v6474_v28, %v6428_v18 }
 0x1d2   :  { %v699_v20 = vpop.f32.mrf.mxu1  ;;  %v924_v35 = vpop.f32.mrf.mxu0 }
 0x1d4   :  { %v6431_v22 = vpop.f32.mrf.mxu1  ;;  %v6477_v39 = vpop.f32.mrf.mxu0 }
 0x1d6   :  { %v7799_v25 = vpop.f32.mrf.mxu1  ;;  %v934_v45 = vpop.f32.mrf.mxu0 }
 0x1d7   :  { %v935_v28 = vadd.f32 %v934_v45, %v7799_v25 }
 0x1d8   :  { %v7801_v26 = vpop.f32.mrf.mxu1  ;;  %v6480_v50 = vpop.f32.mrf.mxu0 }
 0x1da   :  { %v7803_v30 = vpop.f32.mrf.mxu1  ;;  %v944_v61 = vpop.f32.mrf.mxu0 }
 0x1dc   :  { %v7805_v31 = vpop.f32.mrf.mxu1  ;;  %v6483_v6 = vpop.f32.mrf.mxu0 }
 0x1de   :  { %v7807_v36 = vpop.f32.mrf.mxu1 }
 0x1e0   :  { %v7809_v37 = vpop.f32.mrf.mxu1 }
 0x1e2   :  { %v7811_v40 = vpop.f32.mrf.mxu1 }
 0x1e4   :  { %v7813_v43 = vpop.f32.mrf.mxu1 }
 0x1e6   :  { %v7815_v46 = vpop.f32.mrf.mxu1 }
 0x1e8   :  { %v7817_v48 = vpop.f32.mrf.mxu1 }
 0x1ea   :  { %v7819_v52 = vpop.f32.mrf.mxu1 }
 0x1ec   :  { %v6511_v56 = vpop.f32.mrf.mxu1 }
 0x1ed   :  { %v1228_v59 = vadd.f32 %v6511_v56, %v900_v54 }
 0x1ee   :  { %v1128_v62 = vpop.f32.mrf.mxu1 }
 0x1ef   :  { %v1227_v0 = vadd.f32 %v1128_v62, %v895_v58  ;;  %v1255_v1 = vadd.f32 %v7824_v60, %v1228_v59  ;;  %v954_v58 = vpop.f32.mrf.mxu0 }
 0x1f0   :  { %v6514_v2 = vpop.f32.mrf.mxu1 }
 0x1f1   :  { %v1254_v4 = vadd.f32 %v7824_v60, %v1227_v0  ;;  %v1230_v55 = vadd.f32 %v6514_v2, %v910_v63  ;;  %v1275_v56 = vmax.f32 %v1255_v1, 0.0  ;;  %v925_v0 = vadd.f32 %v924_v35, %v699_v20 }
 0x1f2   :  { %v1138_v7 = vpop.f32.mrf.mxu1  ;;  %v940_v1 = vadd.f32 %v6477_v39, %v6431_v22 }
 0x1f3   :  { %v1274_v9 = vmax.f32 %v1254_v4, 0.0  ;;  %v1229_v54 = vadd.f32 %v1138_v7, %v905_v3  ;;  %v1257_v57 = vadd.f32 %v7824_v60, %v1230_v55 }
 0x1f4   :  { %v6517_v51 = vpop.f32.mrf.mxu1 }
 0x1f5   :  { %v1256_v11 = vadd.f32 %v7824_v60, %v1229_v54  ;;  %v1232_v12 = vadd.f32 %v6517_v51, %v920_v8  ;;  %6555 = vmatprep.mubr.msk.f32.mxu0 %vm203_vm0, %v1274_v9  ;;  %v1277_v14 = vmax.f32 %v1257_v57, 0.0  ;;  %v6486_v51 = vpop.f32.mrf.mxu0  ;;  %v950_v8 = vadd.f32 %v6480_v50, %v7801_v26 }
 0x1f6   :  { %v1148_v13 = vpop.f32.mrf.mxu1  ;;  %6556 = vmatmul.mubr.msk.f32.vlgmr.msra.gmra.mxu0 %vm203_vm0, %v1275_v56 }
 0x1f7   :  { %v1276_v59 = vmax.f32 %v1256_v11, 0.0  ;;  %v1231_v62 = vadd.f32 %v1148_v13, %v915_v53  ;;  %v1259_v19 = vadd.f32 %v7824_v60, %v1232_v12  ;;  %v964_v4 = vpop.f32.mrf.mxu0  ;;  %v945_v11 = vadd.f32 %v944_v61, %v7803_v30 }
 0x1f8   :  { %v6520_v63 = vpop.f32.mrf.mxu1 }
 0x1f9   :  { %v1258_v55 = vadd.f32 %v7824_v60, %v1231_v62  ;;  %v1234_v16 = vadd.f32 %v6520_v63, %v930_v15  ;;  %6558 = vmatprep.mubr.msk.f32.mxu0 %vm203_vm0, %v1276_v59  ;;  %v1279_v18 = vmax.f32 %v1259_v19, 0.0  ;;  %v6489_v12 = vpop.f32.mrf.mxu0  ;;  %v960_v15 = vadd.f32 %v6483_v6, %v7805_v31 }
 0x1fa   :  { %v1158_v23 = vpop.f32.mrf.mxu1  ;;  %6559 = vmatmul.mubr.msk.f32.gmra.mxu0 %vm203_vm0, %v1277_v14  ;;  %v955_v19 = vadd.f32 %v954_v58, %v7807_v36 }
 0x1fb   :  { %v1278_v2 = vmax.f32 %v1258_v55, 0.0  ;;  %v1233_v3 = vadd.f32 %v1158_v23, %v925_v0  ;;  %v1261_v53 = vadd.f32 %v7824_v60, %v1234_v16  ;;  %v974_v63 = vpop.f32.mrf.mxu0  ;;  %v970_v55 = vadd.f32 %v6486_v51, %v7809_v37 }
 0x1fc   :  { %v6523_v57 = vpop.f32.mrf.mxu1 }
 0x1fd   :  { %v1260_v20 = vadd.f32 %v7824_v60, %v1233_v3  ;;  %v1236_v35 = vadd.f32 %v6523_v57, %v940_v1  ;;  %6561 = vmatprep.mubr.msk.f32.mxu0 %vm203_vm0, %v1278_v2  ;;  %v1281_v9 = vmax.f32 %v1261_v53, 0.0  ;;  %v965_v2 = vadd.f32 %v964_v4, %v7811_v40  ;;  %v6492_v3 = vpop.f32.mrf.mxu0 }
 0x1fe   :  { %v1168_v7 = vpop.f32.mrf.mxu1  ;;  %6562 = vmatmul.mubr.msk.f32.gmra.mxu0 %vm203_vm0, %v1279_v18  ;;  %v980_v53 = vadd.f32 %v6489_v12, %v7813_v43 }
 0x1ff   :  { %v1280_v22 = vmax.f32 %v1260_v20, 0.0  ;;  %v1235_v39 = vadd.f32 %v1168_v7, %v935_v28  ;;  %v1263_v54 = vadd.f32 %v7824_v60, %v1236_v35  ;;  %v975_v35 = vadd.f32 %v974_v63, %v7815_v46  ;;  %v984_v7 = vpop.f32.mrf.mxu0  ;;  %v1657_v63 = vld [vmem:[#allocation3 + $0xd0] sm:$0xff] }
 0x200   :  { %v6526_v56 = vpop.f32.mrf.mxu1 }
 0x201   :  { %v1262_v25 = vadd.f32 %v7824_v60, %v1235_v39  ;;  %v1238_v45 = vadd.f32 %v6526_v56, %v950_v8  ;;  %6564 = vmatprep.mubr.msk.f32.mxu0 %vm203_vm0, %v1280_v22  ;;  %v1283_v59 = vmax.f32 %v1263_v54, 0.0  ;;  %v990_v22 = vadd.f32 %v6492_v3, %v7817_v48 }
 0x202   :  { %v1178_v13 = vpop.f32.mrf.mxu1  ;;  %6565 = vmatmul.mubr.msk.f32.gmra.mxu0 %vm203_vm0, %v1281_v9 }
 0x203   :  { %v1282_v26 = vmax.f32 %v1262_v25, 0.0  ;;  %v1237_v50 = vadd.f32 %v1178_v13, %v945_v11  ;;  %v1265_v62 = vadd.f32 %v7824_v60, %v1238_v45  ;;  %v985_v11 = vadd.f32 %v984_v7, %v7819_v52 }
 0x204   :  { %v6529_v14 = vpop.f32.mrf.mxu1 }
 0x205   :  { %v1264_v30 = vadd.f32 %v7824_v60, %v1237_v50  ;;  %v1240_v61 = vadd.f32 %v6529_v14, %v960_v15  ;;  %6567 = vmatprep.mubr.msk.f32.mxu0 %vm203_vm0, %v1282_v26  ;;  %v1285_v16 = vmax.f32 %v1265_v62, 0.0  ;;  %v1661_v62 = vld [vmem:[#allocation3 + $0xf0] sm:$0xff]  ;;  %v1660_v14 = vld [vmem:[#allocation3 + $0xe8] sm:$0xff] }
 0x206   :  { %v1188_v0 = vpop.f32.mrf.mxu1  ;;  %6568 = vmatmul.mubr.msk.f32.gmra.mxu0 %vm203_vm0, %v1283_v59  ;;  %v1662_v59 = vld [vmem:[#allocation3 + $0xf8] sm:$0xff] }
 0x207   :  { %v1284_v31 = vmax.f32 %v1264_v30, 0.0  ;;  %v1239_v6 = vadd.f32 %v1188_v0, %v955_v19  ;;  %v1267_v23 = vadd.f32 %v7824_v60, %v1240_v61  ;;  %6631 = vmatprep.subr.mxu0 %v1662_v59  ;;  %v1666_v19 = vld [vmem:[#allocation3 + $0x110] sm:$0xff]  ;;  %v1658_v30 = vld [vmem:[#allocation3 + $0xd8] sm:$0xff]  ;;  %v1665_v61 = vld [vmem:[#allocation3 + $0x108] sm:$0xff] }
 0x208   :  { %v6532_v1 = vpop.f32.mrf.mxu1  ;;  %6632 = vmatpush3.msra.mxu0 %v1662_v59  ;;  %6595 = vmatprep.subr.mxu1 %v1666_v19  ;;  %v1656_v0 = vld [vmem:[#allocation3 + $0xc8] sm:$0xff] }
 0x209   :  { %v1266_v36 = vadd.f32 %v7824_v60, %v1239_v6  ;;  %v1242_v58 = vadd.f32 %v6532_v1, %v970_v55  ;;  %6570 = vmatprep.mubr.msk.f32.mxu0 %vm203_vm0, %v1284_v31  ;;  %v1287_v57 = vmax.f32 %v1267_v23, 0.0  ;;  %6633 = vmatprep.subr.mxu0 %v1661_v62  ;;  %v1664_v55 = vld [vmem:[#allocation3 + $0x100] sm:$0xff]  ;;  %v7877_v6 = vld [vmem:[#allocation3 + $0x178] sm:$0xff]  ;;  %v7882_v23 = vpop.permute.xlu0 %105 }
 0x20a   :  { %v1198_v18 = vpop.f32.mrf.mxu1  ;;  %6571 = vmatmul.mubr.msk.f32.gmra.mxu0 %vm203_vm0, %v1285_v16  ;;  %6596 = vmatpush3.msra.mxu1 %v1666_v19  ;;  %v1655_v31 = vld [vmem:[#allocation3 + $0xc0] sm:$0xff]  ;;  %v7880_v16 = vpop.permute.xlu1 %115 }
 0x20b   :  { %v1286_v37 = vmax.f32 %v1266_v36, 0.0  ;;  %v1241_v51 = vadd.f32 %v1198_v18, %v965_v2  ;;  %v1269_v28 = vadd.f32 %v7824_v60, %v1242_v58  ;;  %6634 = vmatpush3.msra.mxu0 %v1661_v62  ;;  %6597 = vmatprep.subr.mxu1 %v1665_v61  ;;  %v7893_v58 = vld [vmem:[%s9086_s7] ss:$0 sm:$0xff] }
 0x20c   :  { %v6535_v20 = vpop.f32.mrf.mxu1  ;;  %6635 = vmatprep.subr.mxu0 %v1660_v14  ;;  %6598 = vmatpush3.msra.mxu1 %v1665_v61  ;;  %v2129_v61 = vld [vmem:[#allocation3 + $0x170] sm:$0xff] }
 0x20d   :  { %v1268_v40 = vadd.f32 %v7824_v60, %v1241_v51  ;;  %v1244_v4 = vadd.f32 %v6535_v20, %v980_v53  ;;  %6573 = vmatprep.mubr.msk.f32.mxu0 %vm203_vm0, %v1286_v37  ;;  %v1289_v9 = vmax.f32 %v1269_v28, 0.0  ;;  %6636 = vmatpush3.msra.mxu0 %v1660_v14  ;;  %v7886_v2 = vpop.permute.xlu0 %110 }
 0x20e   :  { %v1208_v8 = vpop.f32.mrf.mxu1  ;;  %6574 = vmatmul.mubr.msk.f32.gmra.mxu0 %vm203_vm0, %v1287_v57  ;;  %6599 = vmatprep.subr.mxu1 %v1664_v55  ;;  %v7884_v1 = vpop.permute.xlu1 %120 }
 0x20f   :  { %v1288_v43 = vmax.f32 %v1268_v40, 0.0  ;;  %v1243_v39 = vadd.f32 %v1208_v8, %v975_v35  ;;  %v1271_v54 = vadd.f32 %v7824_v60, %v1244_v4  ;;  %6600 = vmatpush3.msra.mxu1 %v1664_v55 }
 0x210   :  { %v6538_v56 = vpop.f32.mrf.mxu1  ;;  %6677 = vmatprep.subr.mxu1 %v7877_v6 }
 0x211   :  { %v1270_v46 = vadd.f32 %v7824_v60, %v1243_v39  ;;  %v1246_v25 = vadd.f32 %v6538_v56, %v990_v22  ;;  %6576 = vmatprep.mubr.msk.f32.mxu0 %vm203_vm0, %v1288_v43  ;;  %v1291_v15 = vmax.f32 %v1271_v54, 0.0  ;;  %v7895_v3 = vpop.permute.xlu0 %125 }
 0x212   :  { %v1218_v45 = vpop.f32.mrf.mxu1  ;;  %6577 = vmatmul.mubr.msk.f32.gmra.mxu0 %vm203_vm0, %v1289_v9  ;;  %v7888_v36 = vpop.permute.xlu1 %130 }
 0x213   :  { %v1290_v12 = vmax.f32 %v1270_v46, 0.0  ;;  %v1245_v13 = vadd.f32 %v1218_v45, %v985_v11  ;;  %v1273_v48 = vadd.f32 %v7824_v60, %v1246_v25 }
 0x215   :  { %v1272_v26 = vadd.f32 %v7824_v60, %v1245_v13  ;;  %6579 = vmatprep.mubr.msk.f32.mxu0 %vm203_vm0, %v1290_v12  ;;  %v1293_v50 = vmax.f32 %v1273_v48, 0.0  ;;  %v1659_v60 = vld [vmem:[#allocation3 + $0xe0] sm:$0xff]  ;;  %v7905_v7 = vpop.permute.xlu0 %135 }
 0x216   :  { %6580 = vmatmul.mubr.msk.f32.gmra.mxu0 %vm203_vm0, %v1291_v15  ;;  %6637 = vmatprep.subr.mxu0 %v1659_v60  ;;  %v7900_v28 = vpop.permute.xlu1 %140 }
 0x217   :  { %v1292_v52 = vmax.f32 %v1272_v26, 0.0  ;;  %6638 = vmatpush3.msra.mxu0 %v1659_v60 }
 0x218   :  { %6639 = vmatprep.subr.mxu0 %v1658_v30 }
 0x219   :  { %6582 = vmatprep.mubr.msk.f32.mxu0 %vm203_vm0, %v1292_v52  ;;  %6640 = vmatpush3.msra.mxu0 %v1658_v30  ;;  %v7921_v45 = vpop.permute.xlu0 %145 }
 0x21a   :  { %6583 = vmatmul.mubr.msk.f32.gmra.mxu0 %vm203_vm0, %v1293_v50  ;;  %6641 = vmatprep.subr.mxu0 %v1657_v63  ;;  %v7915_v56 = vpop.permute.xlu1 %150  ;;  %9161 = vst [vmem:[#allocation18_spill] sm:$0xff] %v7921_v45 }
 0x21b   :  { %6642 = vmatpush3.msra.mxu0 %v1657_v63  ;;  %9160 = vst [vmem:[#allocation17_spill] sm:$0xff] %v7915_v56 }
 0x21c   :  { %6643 = vmatprep.subr.mxu0 %v1656_v0 }
 0x21d   :  { %6644 = vmatpush3.msra.mxu0 %v1656_v0  ;;  %v7944_v63 = vpop.permute.xlu0 %155 }
 0x21e   :  { %6645 = vmatprep.subr.mxu0 %v1655_v31  ;;  %v7931_v50 = vpop.permute.xlu1 %160  ;;  %9163 = vst [vmem:[#allocation20_spill] sm:$0xff] %v7944_v63 }
 0x21f   :  { %6646 = vmatpush3.msra.mxu0 %v1655_v31  ;;  %9162 = vst [vmem:[#allocation19_spill] sm:$0xff] %v7931_v50 }
 0x2b6   :  { %v6557_v18 = vpop.f32.mrf.mxu0 }
 0x2b7   :  { %v1441_v53 = vadd.f32 %v6557_v18, %v7893_v58 }
 0x2b8   :  { %v1435_v37 = vpop.f32.mrf.mxu0 }
 0x2b9   :  { %v1535_v51 = vadd.f32 %v1441_v53, %v7588_v5  ;;  %v1436_v57 = vadd.f32 %v7893_v58, %v1435_v37 }
 0x2ba   :  { %v6560_v20 = vpop.f32.mrf.mxu0 }
 0x2bb   :  { %v1555_v35 = vmul.f32 %v1535_v51, %v7886_v2  ;;  %v1534_v40 = vadd.f32 %v1436_v57, %v7558_v41  ;;  %v1451_v4 = vadd.f32 %v6560_v20, %v7893_v58 }
 0x2bc   :  { %v1445_v8 = vpop.f32.mrf.mxu0 }
 0x2bd   :  { %1575 = vst.msk [vmem:[#allocation2 + $0x10] sm:$0xff] %vm203_vm0, %v1555_v35  ;;  %v1554_v22 = vmul.f32 %v1534_v40, %v7882_v23  ;;  %v1537_v5 = vadd.f32 %v1451_v4, %v7606_v17  ;;  %v1446_v43 = vadd.f32 %v7893_v58, %v1445_v8  ;;  %v7965_v40 = vpop.permute.xlu1 %170 }
 0x2be   :  { %v6563_v39 = vpop.f32.mrf.mxu0  ;;  %9164 = vst [vmem:[#allocation21_spill] sm:$0xff] %v7965_v40 }
 0x2bf   :  { %1574 = vst.msk [vmem:[#allocation2 + $0x8] sm:$0xff] %vm203_vm0, %v1554_v22  ;;  %v1557_v9 = vmul.f32 %v1537_v5, %v7884_v1  ;;  %v1536_v41 = vadd.f32 %v1446_v43, %v7595_v10  ;;  %v1461_v54 = vadd.f32 %v6563_v39, %v7893_v58  ;;  %v7974_v5 = vpop.permute.xlu0 %165 }
 0x2c0   :  { %v1455_v11 = vpop.f32.mrf.mxu0  ;;  %9165 = vst [vmem:[#allocation22_spill] sm:$0xff] %v7974_v5 }
 0x2c1   :  { %1577 = vst.msk [vmem:[#allocation2 + $0x20] sm:$0xff] %vm203_vm0, %v1557_v9  ;;  %v1556_v46 = vmul.f32 %v1536_v41, %v7880_v16  ;;  %v1539_v17 = vadd.f32 %v1461_v54, %v7620_v24  ;;  %v1456_v25 = vadd.f32 %v7893_v58, %v1455_v11 }
 0x2c2   :  { %v6566_v12 = vpop.f32.mrf.mxu0 }
 0x2c3   :  { %1576 = vst.msk [vmem:[#allocation2 + $0x18] sm:$0xff] %vm203_vm0, %v1556_v46  ;;  %v1559_v10 = vmul.f32 %v1539_v17, %v7888_v36  ;;  %v1538_v13 = vadd.f32 %v1456_v25, %v7612_v21  ;;  %v1471_v15 = vadd.f32 %v6566_v12, %v7893_v58  ;;  %v2127_v17 = vld [vmem:[#allocation3 + $0x160] sm:$0xff] }
 0x2c4   :  { %v1465_v48 = vpop.f32.mrf.mxu0 }
 0x2c5   :  { %1579 = vst.msk [vmem:[#allocation2 + $0x30] sm:$0xff] %vm203_vm0, %v1559_v10  ;;  %v1558_v26 = vmul.f32 %v1538_v13, %v7895_v3  ;;  %v1541_v24 = vadd.f32 %v1471_v15, %v7630_v29  ;;  %v1466_v52 = vadd.f32 %v7893_v58, %v1465_v48  ;;  %v7942_v29 = vld [vmem:[#allocation2 + $0x10] sm:$0xff]  ;;  %v7994_v13 = vpop.permute.xlu1 %180 }
 0x2c6   :  { %v6569_v59 = vpop.f32.mrf.mxu0  ;;  %v7933_v62 = vld [vmem:[#allocation2 + $0x8] sm:$0xff]  ;;  %9166 = vst [vmem:[#allocation23_spill] sm:$0xff] %v7994_v13 }
 0x2c7   :  { %v1614_v14 = vld [vmem:[#allocation2 + $0x6] sm:$0xff]  ;;  %v1615_v19 = vld [vmem:[#allocation2 + $0xe] sm:$0xff]  ;;  %1578 = vst.msk [vmem:[#allocation2 + $0x28] sm:$0xff] %vm203_vm0, %v1558_v26  ;;  %v1561_v21 = vmul.f32 %v1541_v24, %v7900_v28  ;;  %v1540_v60 = vadd.f32 %v1466_v52, %v7625_v27  ;;  %v1481_v30 = vadd.f32 %v6569_v59, %v7893_v58  ;;  %6601 = vmatprep.mubr.msk.f32.mxu1 %vm203_vm0, %v7933_v62 }
 0x2c8   :  { %6647 = vmatprep.mubr.msk.f32.mxu0 %vm203_vm0, %v1614_v14  ;;  %v1475_v0 = vpop.f32.mrf.mxu0  ;;  %6602 = vmatmul.mubr.msk.f32.vlgmr.msra.gmra.mxu1 %vm203_vm0, %v7942_v29 }
 0x2c9   :  { %6648 = vmatmul.mubr.msk.f32.vlgmr.msra.gmra.mxu0 %vm203_vm0, %v1615_v19  ;;  %1581 = vst.msk [vmem:[#allocation2 + $0x40] sm:$0xff] %vm203_vm0, %v1561_v21  ;;  %v1560_v27 = vmul.f32 %v1540_v60, %v7905_v7  ;;  %v1543_v55 = vadd.f32 %v1481_v30, %v7640_v33  ;;  %v1476_v31 = vadd.f32 %v7893_v58, %v1475_v0  ;;  %v7963_v33 = vld [vmem:[#allocation2 + $0x20] sm:$0xff]  ;;  %v2126_v19 = vld [vmem:[#allocation3 + $0x158] sm:$0xff]  ;;  %v8007_v21 = vpop.permute.xlu0 %175 }
 0x2ca   :  { %6678 = vmatpush3.msra.mxu1 %v7877_v6  ;;  %v6572_v18 = vpop.f32.mrf.mxu0  ;;  %v7954_v53 = vld [vmem:[#allocation2 + $0x18] sm:$0xff]  ;;  %9167 = vst [vmem:[#allocation24_spill] sm:$0xff] %v8007_v21 }
 0x2cb   :  { %v1616_v37 = vld [vmem:[#allocation2 + $0x16] sm:$0xff]  ;;  %v1617_v51 = vld [vmem:[#allocation2 + $0x1e] sm:$0xff]  ;;  %6679 = vmatprep.subr.mxu1 %v2129_v61  ;;  %1580 = vst.msk [vmem:[#allocation2 + $0x38] sm:$0xff] %vm203_vm0, %v1560_v27  ;;  %v1563_v57 = vmul.f32 %v1543_v55, %v7915_v56  ;;  %v1542_v20 = vadd.f32 %v1476_v31, %v7635_v32  ;;  %v1491_v35 = vadd.f32 %v6572_v18, %v7893_v58 }
 0x2cc   :  { %6604 = vmatprep.mubr.msk.f32.mxu1 %vm203_vm0, %v7954_v53  ;;  %6650 = vmatprep.mubr.msk.f32.mxu0 %vm203_vm0, %v1616_v37  ;;  %v2128_v6 = vld [vmem:[#allocation3 + $0x168] sm:$0xff]  ;;  %v1485_v4 = vpop.f32.mrf.mxu0 }
 0x2cd   :  { %6605 = vmatmul.mubr.msk.f32.gmra.mxu1 %vm203_vm0, %v7963_v33  ;;  %6651 = vmatmul.mubr.msk.f32.gmra.mxu0 %vm203_vm0, %v1617_v51  ;;  %1583 = vst.msk [vmem:[#allocation2 + $0x50] sm:$0xff] %vm203_vm0, %v1563_v57  ;;  %v1562_v32 = vmul.f32 %v1542_v20, %v7921_v45  ;;  %v1545_v8 = vadd.f32 %v1491_v35, %v7650_v38  ;;  %v7985_v38 = vld [vmem:[#allocation2 + $0x30] sm:$0xff]  ;;  %v2125_v57 = vld [vmem:[#allocation3 + $0x150] sm:$0xff]  ;;  %v8027_v20 = vpop.permute.xlu1 %190 }
 0x2ce   :  { %v1486_v22 = vadd.f32 %v7893_v58, %v1485_v4  ;;  %6680 = vmatpush3.msra.mxu1 %v2129_v61  ;;  %v6575_v43 = vpop.f32.mrf.mxu0  ;;  %v7976_v39 = vld [vmem:[#allocation2 + $0x28] sm:$0xff]  ;;  %9170 = vst [vmem:[#allocation27_spill] sm:$0xff] %v8027_v20 }
 0x2cf   :  { %v1618_v9 = vld [vmem:[#allocation2 + $0x26] sm:$0xff]  ;;  %v1619_v41 = vld [vmem:[#allocation2 + $0x2e] sm:$0xff]  ;;  %6681 = vmatprep.subr.mxu1 %v2128_v6  ;;  %1582 = vst.msk [vmem:[#allocation2 + $0x48] sm:$0xff] %vm203_vm0, %v1562_v32  ;;  %v1565_v54 = vmul.f32 %v1545_v8, %v7931_v50  ;;  %v1501_v46 = vadd.f32 %v6575_v43, %v7893_v58  ;;  %6607 = vmatprep.mubr.msk.f32.mxu1 %vm203_vm0, %v7976_v39  ;;  %v8036_v8 = vpop.permute.xlu0 %185 }
 0x2d0   :  { %v1544_v11 = vadd.f32 %v1486_v22, %v7642_v34  ;;  %6653 = vmatprep.mubr.msk.f32.mxu0 %vm203_vm0, %v1618_v9  ;;  %v1495_v25 = vpop.f32.mrf.mxu0  ;;  %6682 = vmatpush3.msra.mxu1 %v2128_v6  ;;  %v9171_v6 = vld [vmem:[#allocation14_spill] sm:$0xff] }
 0x2d1   :  { %6608 = vmatmul.mubr.msk.f32.gmra.mxu1 %vm203_vm0, %v7985_v38  ;;  %6654 = vmatmul.mubr.msk.f32.gmra.mxu0 %vm203_vm0, %v1619_v41  ;;  %1585 = vst.msk [vmem:[#allocation2 + $0x60] sm:$0xff] %vm203_vm0, %v1565_v54  ;;  %v1547_v12 = vadd.f32 %v1501_v46, %v7660_v44  ;;  %v1496_v10 = vadd.f32 %v7893_v58, %v1495_v25  ;;  %v8005_v44 = vld [vmem:[#allocation2 + $0x40] sm:$0xff]  ;;  %9172 = vst [vmem:[#allocation14_spill] sm:$0xff] %v8036_v8 }
 0x2d2   :  { %v1564_v34 = vmul.f32 %v1544_v11, %v7944_v63  ;;  %v6578_v15 = vpop.f32.mrf.mxu0  ;;  %v7996_v48 = vld [vmem:[#allocation2 + $0x38] sm:$0xff]  ;;  %6683 = vmatprep.subr.mxu1 %v2127_v17  ;;  %v9174_v11 = vld [vmem:[#allocation13_spill] sm:$0xff] }
 0x2d3   :  { %v1620_v26 = vld [vmem:[#allocation2 + $0x36] sm:$0xff]  ;;  %v1621_v24 = vld [vmem:[#allocation2 + $0x3e] sm:$0xff]  ;;  %v1567_v52 = vmul.f32 %v1547_v12, %v7965_v40  ;;  %v1546_v59 = vadd.f32 %v1496_v10, %v7655_v42  ;;  %v1511_v14 = vadd.f32 %v6578_v15, %v7893_v58  ;;  %6610 = vmatprep.mubr.msk.f32.mxu1 %vm203_vm0, %v7996_v48  ;;  %6684 = vmatpush3.msra.mxu1 %v2127_v17  ;;  %v9176_v15 = vld [vmem:[#allocation16_spill] sm:$0xff] }
 0x2d4   :  { %1584 = vst.msk [vmem:[#allocation2 + $0x58] sm:$0xff] %vm203_vm0, %v1564_v34  ;;  %6656 = vmatprep.mubr.msk.f32.mxu0 %vm203_vm0, %v1620_v26  ;;  %v1505_v60 = vpop.f32.mrf.mxu0  ;;  %6685 = vmatprep.subr.mxu1 %v2126_v19  ;;  %v2124_v34 = vld [vmem:[#allocation3 + $0x148] sm:$0xff] }
 0x2d5   :  { %6611 = vmatmul.mubr.msk.f32.gmra.mxu1 %vm203_vm0, %v8005_v44  ;;  %6657 = vmatmul.mubr.msk.f32.gmra.mxu0 %vm203_vm0, %v1621_v24  ;;  %1587 = vst.msk [vmem:[#allocation2 + $0x70] sm:$0xff] %vm203_vm0, %v1567_v52  ;;  %v1566_v42 = vmul.f32 %v1546_v59, %v7974_v5  ;;  %v1549_v30 = vadd.f32 %v1511_v14, %v7670_v49  ;;  %v8025_v49 = vld [vmem:[#allocation2 + $0x50] sm:$0xff]  ;;  %v8056_v52 = vpop.permute.xlu1 %200 }
 0x2d6   :  { %v1506_v61 = vadd.f32 %v7893_v58, %v1505_v60  ;;  %v6581_v0 = vpop.f32.mrf.mxu0  ;;  %v8016_v27 = vld [vmem:[#allocation2 + $0x48] sm:$0xff]  ;;  %9169 = vst [vmem:[#allocation26_spill] sm:$0xff] %v8025_v49  ;;  %6686 = vmatpush3.msra.mxu1 %v2126_v19  ;;  %9177 = vst [vmem:[#allocation16_spill] sm:$0xff] %v8056_v52 }
 0x2d7   :  { %9168 = vst [vmem:[#allocation25_spill] sm:$0xff] %v8016_v27  ;;  %v1622_v55 = vld [vmem:[#allocation2 + $0x46] sm:$0xff]  ;;  %v1623_v31 = vld [vmem:[#allocation2 + $0x4e] sm:$0xff]  ;;  %1586 = vst.msk [vmem:[#allocation2 + $0x68] sm:$0xff] %vm203_vm0, %v1566_v42  ;;  %v1569_v18 = vmul.f32 %v1549_v30, %v7994_v13  ;;  %v1521_v51 = vadd.f32 %v6581_v0, %v7893_v58  ;;  %6613 = vmatprep.mubr.msk.f32.mxu1 %vm203_vm0, %v8016_v27  ;;  %6687 = vmatprep.subr.mxu1 %v2125_v57  ;;  %v8068_v0 = vpop.permute.xlu0 %195 }
 0x2d8   :  { %v1548_v37 = vadd.f32 %v1506_v61, %v7665_v47  ;;  %6659 = vmatprep.mubr.msk.f32.mxu0 %vm203_vm0, %v1622_v55  ;;  %v1515_v35 = vpop.f32.mrf.mxu0  ;;  %v8047_v25 = vld [vmem:[#allocation2 + $0x60] sm:$0xff]  ;;  %6688 = vmatpush3.msra.mxu1 %v2125_v57  ;;  %v2123_v61 = vld [vmem:[#allocation3 + $0x140] sm:$0xff]  ;;  %9181 = vst [vmem:[#allocation30_spill] sm:$0xff] %v8068_v0 }
 0x2d9   :  { %6614 = vmatmul.mubr.msk.f32.gmra.mxu1 %vm203_vm0, %v8025_v49  ;;  %6660 = vmatmul.mubr.msk.f32.gmra.mxu0 %vm203_vm0, %v1623_v31  ;;  %1589 = vst.msk [vmem:[#allocation2 + $0x80] sm:$0xff] %vm203_vm0, %v1569_v18  ;;  %v1551_v4 = vadd.f32 %v1521_v51, %v9171_v6  ;;  %v1516_v32 = vadd.f32 %v7893_v58, %v1515_v35  ;;  %9175 = vst [vmem:[#allocation13_spill] sm:$0xff] %v8047_v25  ;;  %v9179_v42 = vld [vmem:[#allocation15_spill] sm:$0xff] }
 0x2da   :  { %v1568_v47 = vmul.f32 %v1548_v37, %v8007_v21  ;;  %v6584_v22 = vpop.f32.mrf.mxu0  ;;  %6689 = vmatprep.subr.mxu1 %v2124_v34 }
 0x2db   :  { %v8038_v43 = vld [vmem:[#allocation2 + $0x58] sm:$0xff]  ;;  %v1571_v54 = vmul.f32 %v1551_v4, %v8027_v20  ;;  %v1550_v46 = vadd.f32 %v1516_v32, %v9174_v11  ;;  %v1531_v17 = vadd.f32 %v6584_v22, %v7893_v58  ;;  %6690 = vmatpush3.msra.mxu1 %v2124_v34 }
 0x2dc   :  { %9173 = vst [vmem:[#allocation28_spill] sm:$0xff] %v8038_v43  ;;  %v1624_v9 = vld [vmem:[#allocation2 + $0x56] sm:$0xff]  ;;  %v1625_v41 = vld [vmem:[#allocation2 + $0x5e] sm:$0xff]  ;;  %1588 = vst.msk [vmem:[#allocation2 + $0x78] sm:$0xff] %vm203_vm0, %v1568_v47  ;;  %6616 = vmatprep.mubr.msk.f32.mxu1 %vm203_vm0, %v8038_v43  ;;  %v1525_v12 = vpop.f32.mrf.mxu0  ;;  %6691 = vmatprep.subr.mxu1 %v2123_v61 }
 0x2dd   :  { %6662 = vmatprep.mubr.msk.f32.mxu0 %vm203_vm0, %v1624_v9  ;;  %6617 = vmatmul.mubr.msk.f32.gmra.mxu1 %vm203_vm0, %v8047_v25  ;;  %1591 = vst.msk [vmem:[#allocation2 + $0x90] sm:$0xff] %vm203_vm0, %v1571_v54  ;;  %v1570_v10 = vmul.f32 %v1550_v46, %v8036_v8  ;;  %v1553_v26 = vadd.f32 %v1531_v17, %v9176_v15  ;;  %v1635_v54 = vld [vmem:[#allocation2 + $0x12] sm:$0xff]  ;;  %v1636_v11 = vld [vmem:[#allocation2 + $0x1a] sm:$0xff]  ;;  %v1637_v46 = vld [vmem:[#allocation2 + $0x22] sm:$0xff] }
 0x2de   :  { %6663 = vmatmul.mubr.msk.f32.gmra.mxu0 %vm203_vm0, %v1625_v41  ;;  %v1526_v24 = vadd.f32 %v7893_v58, %v1525_v12  ;;  %v8058_v59 = vld [vmem:[#allocation2 + $0x68] sm:$0xff]  ;;  %v8066_v58 = vld [vmem:[#allocation2 + $0x70] sm:$0xff]  ;;  %6692 = vmatpush3.msra.mxu1 %v2123_v61  ;;  %v1640_v12 = vld [vmem:[#allocation2 + $0x3a] sm:$0xff] }
 0x2df   :  { %9178 = vst [vmem:[#allocation29_spill] sm:$0xff] %v8058_v59  ;;  %v1626_v14 = vld [vmem:[#allocation2 + $0x66] sm:$0xff]  ;;  %v1627_v19 = vld [vmem:[#allocation2 + $0x6e] sm:$0xff]  ;;  %1590 = vst.msk [vmem:[#allocation2 + $0x88] sm:$0xff] %vm203_vm0, %v1570_v10  ;;  %v1573_v60 = vmul.f32 %v1553_v26, %v8056_v52  ;;  %6619 = vmatprep.mubr.msk.f32.mxu1 %vm203_vm0, %v8058_v59 }
 0x2e0   :  { %v1552_v30 = vadd.f32 %v1526_v24, %v9179_v42  ;;  %6665 = vmatprep.mubr.msk.f32.mxu0 %vm203_vm0, %v1626_v14  ;;  %9180 = vst [vmem:[#allocation15_spill] sm:$0xff] %v8066_v58  ;;  %v8081_v51 = vld [vmem:[#allocation2 + $0x80] sm:$0xff]  ;;  %v1634_v41 = vld [vmem:[#allocation2 + $0xa] sm:$0xff]  ;;  %v1639_v34 = vld [vmem:[#allocation2 + $0x32] sm:$0xff] }
 0x2e1   :  { %6620 = vmatmul.mubr.msk.f32.gmra.mxu1 %vm203_vm0, %v8066_v58  ;;  %1593 = vst.msk [vmem:[#allocation2 + $0xa0] sm:$0xff] %vm203_vm0, %v1573_v60  ;;  %9183 = vst [vmem:[#allocation32_spill] sm:$0xff] %v8081_v51  ;;  %v1638_v17 = vld [vmem:[#allocation2 + $0x2a] sm:$0xff]  ;;  %v1641_v10 = vld [vmem:[#allocation2 + $0x42] sm:$0xff] }
 0x2e2   :  { %6666 = vmatmul.mubr.msk.f32.gmra.mxu0 %vm203_vm0, %v1627_v19  ;;  %v1572_v55 = vmul.f32 %v1552_v30, %v8068_v0  ;;  %v1642_v15 = vld [vmem:[#allocation2 + $0x4a] sm:$0xff]  ;;  %v1643_v26 = vld [vmem:[#allocation2 + $0x52] sm:$0xff]  ;;  %v1644_v24 = vld [vmem:[#allocation2 + $0x5a] sm:$0xff] }
 0x2e3   :  { %v8075_v31 = vld [vmem:[#allocation2 + $0x78] sm:$0xff]  ;;  %v1645_v14 = vld [vmem:[#allocation2 + $0x62] sm:$0xff]  ;;  %v1646_v19 = vld [vmem:[#allocation2 + $0x6a] sm:$0xff] }
 0x2e4   :  { %9182 = vst [vmem:[#allocation31_spill] sm:$0xff] %v8075_v31  ;;  %v1628_v18 = vld [vmem:[#allocation2 + $0x76] sm:$0xff]  ;;  %v1629_v37 = vld [vmem:[#allocation2 + $0x7e] sm:$0xff]  ;;  %1592 = vst.msk [vmem:[#allocation2 + $0x98] sm:$0xff] %vm203_vm0, %v1572_v55  ;;  %6622 = vmatprep.mubr.msk.f32.mxu1 %vm203_vm0, %v8075_v31 }
 0x2e5   :  { %6668 = vmatprep.mubr.msk.f32.mxu0 %vm203_vm0, %v1628_v18  ;;  %6623 = vmatmul.mubr.msk.f32.gmra.mxu1 %vm203_vm0, %v8081_v51  ;;  %v8091_v6 = vld [vmem:[#allocation2 + $0x90] sm:$0xff]  ;;  %v1648_v42 = vld [vmem:[#allocation2 + $0x7a] sm:$0xff] }
 0x2e6   :  { %6669 = vmatmul.mubr.msk.f32.gmra.mxu0 %vm203_vm0, %v1629_v37  ;;  %v8086_v57 = vld [vmem:[#allocation2 + $0x88] sm:$0xff]  ;;  %9185 = vst [vmem:[#allocation34_spill] sm:$0xff] %v8091_v6  ;;  %v1647_v60 = vld [vmem:[#allocation2 + $0x72] sm:$0xff]  ;;  %v8175_v51 = vld [vmem:[%s9084_s5 + $0x1] ss:$0 sm:$0xff] }
 0x2e7   :  { %9184 = vst [vmem:[#allocation33_spill] sm:$0xff] %v8086_v57  ;;  %v1630_v35 = vld [vmem:[#allocation2 + $0x86] sm:$0xff]  ;;  %v1631_v47 = vld [vmem:[#allocation2 + $0x8e] sm:$0xff]  ;;  %6625 = vmatprep.mubr.msk.f32.mxu1 %vm203_vm0, %v8086_v57  ;;  %v5596_v37 = vld [vmem:[%s9085_s6 + $0x78] sm:$0xff] }
 0x2e8   :  { %6671 = vmatprep.mubr.msk.f32.mxu0 %vm203_vm0, %v1630_v35  ;;  %v8101_v9 = vld [vmem:[#allocation2 + $0xa0] sm:$0xff]  ;;  %v1650_v61 = vld [vmem:[#allocation2 + $0x8a] sm:$0xff]  ;;  %6723 = vmatprep.subr.mxu0 %v5596_v37 }
 0x2e9   :  { %6626 = vmatmul.mubr.msk.f32.gmra.mxu1 %vm203_vm0, %v8091_v6  ;;  %9187 = vst [vmem:[#allocation36_spill] sm:$0xff] %v8101_v9  ;;  %v1649_v30 = vld [vmem:[#allocation2 + $0x82] sm:$0xff]  ;;  %6724 = vmatpush3.msra.mxu0 %v5596_v37 }
 0x2ea   :  { %6672 = vmatmul.mubr.msk.f32.gmra.mxu0 %vm203_vm0, %v1631_v47  ;;  %v1653_v35 = vld [vmem:[#allocation2 + $0xa2] sm:$0xff]  ;;  %v5595_v47 = vld [vmem:[%s9085_s6 + $0x70] sm:$0xff] }
 0x2eb   :  { %v8096_v4 = vld [vmem:[#allocation2 + $0x98] sm:$0xff]  ;;  %6725 = vmatprep.subr.mxu0 %v5595_v47 }
 0x2ec   :  { %9186 = vst [vmem:[#allocation35_spill] sm:$0xff] %v8096_v4  ;;  %v1632_v32 = vld [vmem:[#allocation2 + $0x96] sm:$0xff]  ;;  %v1633_v22 = vld [vmem:[#allocation2 + $0x9e] sm:$0xff]  ;;  %6628 = vmatprep.mubr.msk.f32.mxu1 %vm203_vm0, %v8096_v4  ;;  %6726 = vmatpush3.msra.mxu0 %v5595_v47 }
 0x2ed   :  { %6674 = vmatprep.mubr.msk.f32.mxu0 %vm203_vm0, %v1632_v32  ;;  %6629 = vmatmul.mubr.msk.f32.gmra.mxu1 %vm203_vm0, %v8101_v9  ;;  %v1651_v55 = vld [vmem:[#allocation2 + $0x92] sm:$0xff]  ;;  %v1652_v18 = vld [vmem:[#allocation2 + $0x9a] sm:$0xff]  ;;  %v5594_v32 = vld [vmem:[%s9085_s6 + $0x68] sm:$0xff] }
 0x2ee   :  { %6675 = vmatmul.mubr.msk.f32.gmra.mxu0 %vm203_vm0, %v1633_v22  ;;  %6693 = vmatprep.mubr.msk.f32.mxu1 %vm203_vm0, %v1634_v41  ;;  %v5593_v22 = vld [vmem:[%s9085_s6 + $0x60] sm:$0xff]  ;;  %v5592_v41 = vld [vmem:[%s9085_s6 + $0x58] sm:$0xff] }
 0x2ef   :  { %6727 = vmatprep.subr.mxu0 %v5594_v32 }
 0x2f0   :  { %6728 = vmatpush3.msra.mxu0 %v5594_v32 }
 0x2f1   :  { %6694 = vmatmul.mubr.msk.f32.vlgmr.msra.gmra.mxu1 %vm203_vm0, %v1635_v54  ;;  %6729 = vmatprep.subr.mxu0 %v5593_v22  ;;  %v5591_v54 = vld [vmem:[%s9085_s6 + $0x50] sm:$0xff] }
 0x2f2   :  { %6696 = vmatprep.mubr.msk.f32.mxu1 %vm203_vm0, %v1636_v11  ;;  %6730 = vmatpush3.msra.mxu0 %v5593_v22  ;;  %v5590_v11 = vld [vmem:[%s9085_s6 + $0x48] sm:$0xff] }
 0x2f3   :  { %6731 = vmatprep.subr.mxu0 %v5592_v41 }
 0x2f4   :  { %6732 = vmatpush3.msra.mxu0 %v5592_v41 }
 0x2f5   :  { %6697 = vmatmul.mubr.msk.f32.gmra.mxu1 %vm203_vm0, %v1637_v46  ;;  %6733 = vmatprep.subr.mxu0 %v5591_v54  ;;  %v5589_v46 = vld [vmem:[%s9085_s6 + $0x40] sm:$0xff] }
 0x2f6   :  { %6699 = vmatprep.mubr.msk.f32.mxu1 %vm203_vm0, %v1638_v17  ;;  %6734 = vmatpush3.msra.mxu0 %v5591_v54  ;;  %v2803_v17 = vld [vmem:[#allocation3 + $0x1f8] sm:$0xff] }
 0x2f7   :  { %6735 = vmatprep.subr.mxu0 %v5590_v11  ;;  %6769 = vmatprep.subr.mxu1 %v2803_v17 }
 0x2f8   :  { %6736 = vmatpush3.msra.mxu0 %v5590_v11  ;;  %6770 = vmatpush3.msra.mxu1 %v2803_v17 }
 0x2f9   :  { %6700 = vmatmul.mubr.msk.f32.gmra.mxu1 %vm203_vm0, %v1639_v34  ;;  %6737 = vmatprep.subr.mxu0 %v5589_v46  ;;  %v2802_v34 = vld [vmem:[#allocation3 + $0x1f0] sm:$0xff] }
 0x2fa   :  { %6702 = vmatprep.mubr.msk.f32.mxu1 %vm203_vm0, %v1640_v12  ;;  %6738 = vmatpush3.msra.mxu0 %v5589_v46  ;;  %v2801_v12 = vld [vmem:[#allocation3 + $0x1e8] sm:$0xff] }
 0x2fb   :  { %6771 = vmatprep.subr.mxu1 %v2802_v34 }
 0x2fc   :  { %6772 = vmatpush3.msra.mxu1 %v2802_v34 }
 0x2fd   :  { %6703 = vmatmul.mubr.msk.f32.gmra.mxu1 %vm203_vm0, %v1641_v10  ;;  %v2800_v10 = vld [vmem:[#allocation3 + $0x1e0] sm:$0xff]  ;;  %6773 = vmatprep.subr.mxu1 %v2801_v12 }
 0x2fe   :  { %6705 = vmatprep.mubr.msk.f32.mxu1 %vm203_vm0, %v1642_v15  ;;  %6774 = vmatpush3.msra.mxu1 %v2801_v12  ;;  %v2799_v15 = vld [vmem:[#allocation3 + $0x1d8] sm:$0xff] }
 0x2ff   :  { %6775 = vmatprep.subr.mxu1 %v2800_v10 }
 0x300   :  { %6776 = vmatpush3.msra.mxu1 %v2800_v10 }
 0x301   :  { %6706 = vmatmul.mubr.msk.f32.gmra.mxu1 %vm203_vm0, %v1643_v26  ;;  %6777 = vmatprep.subr.mxu1 %v2799_v15 }
 0x302   :  { %6708 = vmatprep.mubr.msk.f32.mxu1 %vm203_vm0, %v1644_v24  ;;  %6778 = vmatpush3.msra.mxu1 %v2799_v15 }
 0x305   :  { %6709 = vmatmul.mubr.msk.f32.gmra.mxu1 %vm203_vm0, %v1645_v14 }
 0x306   :  { %6711 = vmatprep.mubr.msk.f32.mxu1 %vm203_vm0, %v1646_v19 }
 0x309   :  { %6712 = vmatmul.mubr.msk.f32.gmra.mxu1 %vm203_vm0, %v1647_v60 }
 0x30a   :  { %6714 = vmatprep.mubr.msk.f32.mxu1 %vm203_vm0, %v1648_v42 }
 0x30d   :  { %6715 = vmatmul.mubr.msk.f32.gmra.mxu1 %vm203_vm0, %v1649_v30 }
 0x30e   :  { %6717 = vmatprep.mubr.msk.f32.mxu1 %vm203_vm0, %v1650_v61 }
 0x311   :  { %6718 = vmatmul.mubr.msk.f32.gmra.mxu1 %vm203_vm0, %v1651_v55 }
 0x312   :  { %6720 = vmatprep.mubr.msk.f32.mxu1 %vm203_vm0, %v1652_v18 }
 0x315   :  { %6721 = vmatmul.mubr.msk.f32.gmra.mxu1 %vm203_vm0, %v1653_v35 }
 0x388   :  { %v6603_v26 = vpop.f32.mrf.mxu1 }
 0x389   :  { %v6649_v24 = vpop.f32.mrf.mxu0 }
 0x38a   :  { %v1798_v14 = vpop.f32.mrf.mxu1  ;;  %v2029_v6 = vadd.f32 %v6649_v24, %v6603_v26 }
 0x38b   :  { %v2023_v19 = vpop.f32.mrf.mxu0 }
 0x38c   :  { %v2024_v31 = vadd.f32 %v2023_v19, %v1798_v14 }
 0x38d   :  { %v6606_v60 = vpop.f32.mrf.mxu1  ;;  %v6652_v42 = vpop.f32.mrf.mxu0 }
 0x38e   :  { %v2039_v40 = vadd.f32 %v6652_v42, %v6606_v60 }
 0x38f   :  { %v1808_v30 = vpop.f32.mrf.mxu1  ;;  %v2033_v55 = vpop.f32.mrf.mxu0 }
 0x390   :  { %v2034_v50 = vadd.f32 %v2033_v55, %v1808_v30 }
 0x391   :  { %v6609_v61 = vpop.f32.mrf.mxu1  ;;  %v6655_v35 = vpop.f32.mrf.mxu0 }
 0x392   :  { %v2049_v14 = vadd.f32 %v6655_v35, %v6609_v61 }
 0x393   :  { %v1818_v18 = vpop.f32.mrf.mxu1  ;;  %v2043_v22 = vpop.f32.mrf.mxu0 }
 0x394   :  { %v2044_v49 = vadd.f32 %v2043_v22, %v1818_v18 }
 0x395   :  { %v6612_v37 = vpop.f32.mrf.mxu1  ;;  %v6658_v11 = vpop.f32.mrf.mxu0 }
 0x397   :  { %v1828_v47 = vpop.f32.mrf.mxu1  ;;  %v2053_v34 = vpop.f32.mrf.mxu0 }
 0x399   :  { %v6615_v32 = vpop.f32.mrf.mxu1  ;;  %v6661_v15 = vpop.f32.mrf.mxu0 }
 0x39a   :  { %v2069_v55 = vadd.f32 %v6661_v15, %v6615_v32 }
 0x39b   :  { %v8150_v41 = vpop.f32.mrf.mxu1  ;;  %v2063_v52 = vpop.f32.mrf.mxu0 }
 0x39c   :  { %v2064_v22 = vadd.f32 %v2063_v52, %v8150_v41 }
 0x39d   :  { %v8152_v54 = vpop.f32.mrf.mxu1 }
 0x39e   :  { %v6664_v57 = vpop.f32.mrf.mxu0 }
 0x39f   :  { %v8154_v46 = vpop.f32.mrf.mxu1 }
 0x3a0   :  { %v2073_v5 = vpop.f32.mrf.mxu0 }
 0x3a1   :  { %v8156_v17 = vpop.f32.mrf.mxu1 }
 0x3a2   :  { %v6667_v26 = vpop.f32.mrf.mxu0 }
 0x3a3   :  { %v8158_v12 = vpop.f32.mrf.mxu1 }
 0x3a5   :  { %v8160_v10 = vpop.f32.mrf.mxu1 }
 0x3a7   :  { %v8162_v0 = vpop.f32.mrf.mxu1 }
 0x3a9   :  { %v8164_v4 = vpop.f32.mrf.mxu1 }
 0x3ab   :  { %v8166_v9 = vpop.f32.mrf.mxu1 }
 0x3ad   :  { %v8168_v8 = vpop.f32.mrf.mxu1 }
 0x3af   :  { %v8170_v20 = vpop.f32.mrf.mxu1 }
 0x3b1   :  { %v6695_v21 = vpop.f32.mrf.mxu1 }
 0x3b2   :  { %v2357_v13 = vadd.f32 %v6695_v21, %v2029_v6 }
 0x3b3   :  { %v2257_v59 = vpop.f32.mrf.mxu1 }
 0x3b4   :  { %v2356_v58 = vadd.f32 %v2257_v59, %v2024_v31  ;;  %v2385_v63 = vadd.f32 %v8175_v51, %v2357_v13  ;;  %v2083_v13 = vpop.f32.mrf.mxu0 }
 0x3b5   :  { %v6698_v43 = vpop.f32.mrf.mxu1 }
 0x3b6   :  { %v2384_v25 = vadd.f32 %v8175_v51, %v2356_v58  ;;  %v2359_v45 = vadd.f32 %v6698_v43, %v2039_v40  ;;  %v2405_v19 = vmax.f32 %v2385_v63, 0.0  ;;  %v2059_v40 = vadd.f32 %v6658_v11, %v6612_v37 }
 0x3b7   :  { %v2267_v24 = vpop.f32.mrf.mxu1 }
 0x3b8   :  { %v2404_v21 = vmax.f32 %v2384_v25, 0.0  ;;  %v2358_v6 = vadd.f32 %v2267_v24, %v2034_v50  ;;  %v2387_v27 = vadd.f32 %v8175_v51, %v2359_v45  ;;  %v2054_v25 = vadd.f32 %v2053_v34, %v1828_v47 }
 0x3b9   :  { %v6701_v56 = vpop.f32.mrf.mxu1 }
 0x3ba   :  { %v2386_v60 = vadd.f32 %v8175_v51, %v2358_v6  ;;  %v2361_v59 = vadd.f32 %v6701_v56, %v2049_v14  ;;  %6739 = vmatprep.mubr.msk.f32.mxu0 %vm203_vm0, %v2404_v21  ;;  %v2407_v42 = vmax.f32 %v2387_v27, 0.0  ;;  %v6670_v56 = vpop.f32.mrf.mxu0  ;;  %v2079_v14 = vadd.f32 %v6664_v57, %v8152_v54 }
 0x3bb   :  { %v2277_v31 = vpop.f32.mrf.mxu1  ;;  %6740 = vmatmul.mubr.msk.f32.vlgmr.msra.gmra.mxu0 %vm203_vm0, %v2405_v19 }
 0x3bc   :  { %v2406_v43 = vmax.f32 %v2386_v60, 0.0  ;;  %v2360_v58 = vadd.f32 %v2277_v31, %v2044_v49  ;;  %v2389_v50 = vadd.f32 %v8175_v51, %v2361_v59  ;;  %v2093_v34 = vpop.f32.mrf.mxu0  ;;  %v2074_v60 = vadd.f32 %v2073_v5, %v8154_v46 }
 0x3bd   :  { %v6704_v63 = vpop.f32.mrf.mxu1 }
 0x3be   :  { %v2388_v45 = vadd.f32 %v8175_v51, %v2360_v58  ;;  %v2363_v30 = vadd.f32 %v6704_v63, %v2059_v40  ;;  %6742 = vmatprep.mubr.msk.f32.mxu0 %vm203_vm0, %v2406_v43  ;;  %v2409_v37 = vmax.f32 %v2389_v50, 0.0  ;;  %v6673_v59 = vpop.f32.mrf.mxu0  ;;  %v2089_v40 = vadd.f32 %v6667_v26, %v8156_v17 }
 0x3bf   :  { %v2287_v61 = vpop.f32.mrf.mxu1  ;;  %6743 = vmatmul.mubr.msk.f32.gmra.mxu0 %vm203_vm0, %v2407_v42  ;;  %v2084_v50 = vadd.f32 %v2083_v13, %v8158_v12 }
 0x3c0   :  { %v2408_v18 = vmax.f32 %v2388_v45, 0.0  ;;  %v2362_v35 = vadd.f32 %v2287_v61, %v2054_v25  ;;  %v2391_v49 = vadd.f32 %v8175_v51, %v2363_v30  ;;  %v2103_v63 = vpop.f32.mrf.mxu0  ;;  %v2099_v45 = vadd.f32 %v6670_v56, %v8160_v10 }
 0x3c1   :  { %v6707_v27 = vpop.f32.mrf.mxu1 }
 0x3c2   :  { %v2390_v47 = vadd.f32 %v8175_v51, %v2362_v35  ;;  %v2365_v11 = vadd.f32 %v6707_v27, %v2069_v55  ;;  %6745 = vmatprep.mubr.msk.f32.mxu0 %vm203_vm0, %v2408_v18  ;;  %v2411_v21 = vmax.f32 %v2391_v49, 0.0  ;;  %v2094_v18 = vadd.f32 %v2093_v34, %v8162_v0  ;;  %v6676_v35 = vpop.f32.mrf.mxu0 }
 0x3c3   :  { %v2297_v24 = vpop.f32.mrf.mxu1  ;;  %6746 = vmatmul.mubr.msk.f32.gmra.mxu0 %vm203_vm0, %v2409_v37  ;;  %v2109_v49 = vadd.f32 %v6673_v59, %v8164_v4 }
 0x3c4   :  { %v2410_v32 = vmax.f32 %v2390_v47, 0.0  ;;  %v2364_v15 = vadd.f32 %v2297_v24, %v2064_v22  ;;  %v2393_v6 = vadd.f32 %v8175_v51, %v2365_v11  ;;  %v2104_v11 = vadd.f32 %v2103_v63, %v8166_v9  ;;  %v2113_v24 = vpop.f32.mrf.mxu0  ;;  %v2789_v63 = vld [vmem:[#allocation3 + $0x190] sm:$0xff] }
 0x3c5   :  { %v6710_v19 = vpop.f32.mrf.mxu1 }
 0x3c6   :  { %v2392_v52 = vadd.f32 %v8175_v51, %v2364_v15  ;;  %v2367_v41 = vadd.f32 %v6710_v19, %v2079_v14  ;;  %6748 = vmatprep.mubr.msk.f32.mxu0 %vm203_vm0, %v2410_v32  ;;  %v2413_v43 = vmax.f32 %v2393_v6, 0.0  ;;  %v2119_v32 = vadd.f32 %v6676_v35, %v8168_v8 }
 0x3c7   :  { %v2307_v31 = vpop.f32.mrf.mxu1  ;;  %6749 = vmatmul.mubr.msk.f32.gmra.mxu0 %vm203_vm0, %v2411_v21 }
 0x3c8   :  { %v2412_v57 = vmax.f32 %v2392_v52, 0.0  ;;  %v2366_v54 = vadd.f32 %v2307_v31, %v2074_v60  ;;  %v2395_v58 = vadd.f32 %v8175_v51, %v2367_v41  ;;  %v2114_v60 = vadd.f32 %v2113_v24, %v8170_v20 }
 0x3c9   :  { %v6713_v42 = vpop.f32.mrf.mxu1 }
 0x3ca   :  { %v2394_v5 = vadd.f32 %v8175_v51, %v2366_v54  ;;  %v2369_v46 = vadd.f32 %v6713_v42, %v2089_v40  ;;  %6751 = vmatprep.mubr.msk.f32.mxu0 %vm203_vm0, %v2412_v57  ;;  %v2415_v30 = vmax.f32 %v2395_v58, 0.0  ;;  %v2793_v58 = vld [vmem:[#allocation3 + $0x1b0] sm:$0xff]  ;;  %v2792_v42 = vld [vmem:[#allocation3 + $0x1a8] sm:$0xff] }
 0x3cb   :  { %v2317_v25 = vpop.f32.mrf.mxu1  ;;  %6752 = vmatmul.mubr.msk.f32.gmra.mxu0 %vm203_vm0, %v2413_v43  ;;  %v2794_v43 = vld [vmem:[#allocation3 + $0x1b8] sm:$0xff] }
 0x3cc   :  { %v2414_v17 = vmax.f32 %v2394_v5, 0.0  ;;  %v2368_v26 = vadd.f32 %v2317_v25, %v2084_v50  ;;  %v2397_v61 = vadd.f32 %v8175_v51, %v2369_v46  ;;  %6815 = vmatprep.subr.mxu0 %v2794_v43  ;;  %v2798_v50 = vld [vmem:[#allocation3 + $0x1d0] sm:$0xff]  ;;  %v2790_v5 = vld [vmem:[#allocation3 + $0x198] sm:$0xff]  ;;  %v2797_v46 = vld [vmem:[#allocation3 + $0x1c8] sm:$0xff] }
 0x3cd   :  { %v6716_v55 = vpop.f32.mrf.mxu1  ;;  %6816 = vmatpush3.msra.mxu0 %v2794_v43  ;;  %6779 = vmatprep.subr.mxu1 %v2798_v50  ;;  %v2788_v25 = vld [vmem:[#allocation3 + $0x188] sm:$0xff] }
 0x3ce   :  { %v2396_v12 = vadd.f32 %v8175_v51, %v2368_v26  ;;  %v2371_v13 = vadd.f32 %v6716_v55, %v2099_v45  ;;  %6754 = vmatprep.mubr.msk.f32.mxu0 %vm203_vm0, %v2414_v17  ;;  %v2417_v27 = vmax.f32 %v2397_v61, 0.0  ;;  %6817 = vmatprep.subr.mxu0 %v2793_v58  ;;  %v2796_v45 = vld [vmem:[#allocation3 + $0x1c0] sm:$0xff]  ;;  %v3262_v26 = vld [vmem:[#allocation3 + $0x238] sm:$0xff] }
 0x3cf   :  { %v2327_v37 = vpop.f32.mrf.mxu1  ;;  %6755 = vmatmul.mubr.msk.f32.gmra.mxu0 %vm203_vm0, %v2415_v30  ;;  %6780 = vmatpush3.msra.mxu1 %v2798_v50  ;;  %v2787_v17 = vld [vmem:[#allocation3 + $0x180] sm:$0xff]  ;;  %v8231_v30 = vld [vmem:[%s9086_s7 + $0x1] ss:$0 sm:$0xff] }
 0x3d0   :  { %v2416_v10 = vmax.f32 %v2396_v12, 0.0  ;;  %v2370_v56 = vadd.f32 %v2327_v37, %v2094_v18  ;;  %v2399_v22 = vadd.f32 %v8175_v51, %v2371_v13  ;;  %6818 = vmatpush3.msra.mxu0 %v2793_v58  ;;  %6781 = vmatprep.subr.mxu1 %v2797_v46 }
 0x3d1   :  { %v6719_v47 = vpop.f32.mrf.mxu1  ;;  %6819 = vmatprep.subr.mxu0 %v2792_v42  ;;  %6782 = vmatpush3.msra.mxu1 %v2797_v46  ;;  %v9190_v46 = vld [vmem:[#allocation25_spill] sm:$0xff] }
 0x3d2   :  { %v2398_v0 = vadd.f32 %v8175_v51, %v2370_v56  ;;  %v2373_v34 = vadd.f32 %v6719_v47, %v2109_v49  ;;  %6757 = vmatprep.mubr.msk.f32.mxu0 %vm203_vm0, %v2416_v10  ;;  %v2419_v21 = vmax.f32 %v2399_v22, 0.0  ;;  %6820 = vmatpush3.msra.mxu0 %v2792_v42 }
 0x3d3   :  { %v2337_v14 = vpop.f32.mrf.mxu1  ;;  %6758 = vmatmul.mubr.msk.f32.gmra.mxu0 %vm203_vm0, %v2417_v27  ;;  %6783 = vmatprep.subr.mxu1 %v2796_v45 }
 0x3d4   :  { %v2418_v4 = vmax.f32 %v2398_v0, 0.0  ;;  %v2372_v15 = vadd.f32 %v2337_v14, %v2104_v11  ;;  %v2401_v6 = vadd.f32 %v8175_v51, %v2373_v34  ;;  %6784 = vmatpush3.msra.mxu1 %v2796_v45 }
 0x3d5   :  { %v6722_v19 = vpop.f32.mrf.mxu1  ;;  %6861 = vmatprep.subr.mxu1 %v3262_v26 }
 0x3d6   :  { %v2400_v9 = vadd.f32 %v8175_v51, %v2372_v15  ;;  %v2375_v52 = vadd.f32 %v6722_v19, %v2119_v32  ;;  %6760 = vmatprep.mubr.msk.f32.mxu0 %vm203_vm0, %v2418_v4  ;;  %v2421_v40 = vmax.f32 %v2401_v6, 0.0 }
 0x3d7   :  { %v2347_v41 = vpop.f32.mrf.mxu1  ;;  %6761 = vmatmul.mubr.msk.f32.gmra.mxu0 %vm203_vm0, %v2419_v21 }
 0x3d8   :  { %v2420_v59 = vmax.f32 %v2400_v9, 0.0  ;;  %v2374_v31 = vadd.f32 %v2347_v41, %v2114_v60  ;;  %v2403_v8 = vadd.f32 %v8175_v51, %v2375_v52 }
 0x3da   :  { %v2402_v57 = vadd.f32 %v8175_v51, %v2374_v31  ;;  %6763 = vmatprep.mubr.msk.f32.mxu0 %vm203_vm0, %v2420_v59  ;;  %v2423_v54 = vmax.f32 %v2403_v8, 0.0  ;;  %v2791_v51 = vld [vmem:[#allocation3 + $0x1a0] sm:$0xff] }
 0x3db   :  { %6764 = vmatmul.mubr.msk.f32.gmra.mxu0 %vm203_vm0, %v2421_v40  ;;  %6821 = vmatprep.subr.mxu0 %v2791_v51  ;;  %v3261_v40 = vld [vmem:[#allocation3 + $0x230] sm:$0xff] }
 0x3dc   :  { %v2422_v20 = vmax.f32 %v2402_v57, 0.0  ;;  %6822 = vmatpush3.msra.mxu0 %v2791_v51  ;;  %v9188_v57 = vld [vmem:[#allocation26_spill] sm:$0xff]  ;;  %v9189_v51 = vld [vmem:[#allocation17_spill] sm:$0xff] }
 0x3dd   :  { %6823 = vmatprep.subr.mxu0 %v2790_v5 }
 0x3de   :  { %6766 = vmatprep.mubr.msk.f32.mxu0 %vm203_vm0, %v2422_v20  ;;  %6824 = vmatpush3.msra.mxu0 %v2790_v5 }
 0x3df   :  { %6767 = vmatmul.mubr.msk.f32.gmra.mxu0 %vm203_vm0, %v2423_v54  ;;  %6825 = vmatprep.subr.mxu0 %v2789_v63 }
 0x3e0   :  { %6826 = vmatpush3.msra.mxu0 %v2789_v63 }
 0x3e1   :  { %6827 = vmatprep.subr.mxu0 %v2788_v25 }
 0x3e2   :  { %6828 = vmatpush3.msra.mxu0 %v2788_v25 }
 0x3e3   :  { %6829 = vmatprep.subr.mxu0 %v2787_v17 }
 0x3e4   :  { %6830 = vmatpush3.msra.mxu0 %v2787_v17  ;;  %v3260_v17 = vld [vmem:[#allocation3 + $0x228] sm:$0xff] }
 0x47b   :  { %v6741_v61 = vpop.f32.mrf.mxu0 }
 0x47c   :  { %v2573_v55 = vadd.f32 %v6741_v61, %v8231_v30  ;;  %v9191_v61 = vld [vmem:[#allocation18_spill] sm:$0xff] }
 0x47d   :  { %v2567_v18 = vpop.f32.mrf.mxu0 }
 0x47e   :  { %v2667_v12 = vadd.f32 %v2573_v55, %v7942_v29  ;;  %v2568_v13 = vadd.f32 %v8231_v30, %v2567_v18  ;;  %v9192_v18 = vld [vmem:[#allocation13_spill] sm:$0xff] }
 0x47f   :  { %v6744_v35 = vpop.f32.mrf.mxu0 }
 0x480   :  { %v2687_v37 = vmul.f32 %v2667_v12, %v7886_v2  ;;  %v2666_v49 = vadd.f32 %v2568_v13, %v7933_v62  ;;  %v2583_v10 = vadd.f32 %v6744_v35, %v8231_v30 }
 0x481   :  { %v2577_v56 = vpop.f32.mrf.mxu0 }
 0x482   :  { %2707 = vst.msk [vmem:[#allocation2 + $0x10] sm:$0xff] %vm203_vm0, %v2687_v37  ;;  %v2686_v27 = vmul.f32 %v2666_v49, %v7882_v23  ;;  %v2669_v22 = vadd.f32 %v2583_v10, %v7963_v33  ;;  %v2578_v47 = vadd.f32 %v8231_v30, %v2577_v56  ;;  %v9193_v56 = vld [vmem:[#allocation19_spill] sm:$0xff] }
 0x483   :  { %v6747_v11 = vpop.f32.mrf.mxu0 }
 0x484   :  { %2706 = vst.msk [vmem:[#allocation2 + $0x8] sm:$0xff] %vm203_vm0, %v2686_v27  ;;  %v2689_v29 = vmul.f32 %v2669_v22, %v7884_v1  ;;  %v2668_v0 = vadd.f32 %v2578_v47, %v7954_v53  ;;  %v2593_v62 = vadd.f32 %v6747_v11, %v8231_v30  ;;  %v9194_v22 = vld [vmem:[#allocation28_spill] sm:$0xff] }
 0x485   :  { %v2587_v34 = vpop.f32.mrf.mxu0 }
 0x486   :  { %2709 = vst.msk [vmem:[#allocation2 + $0x20] sm:$0xff] %vm203_vm0, %v2689_v29  ;;  %v2688_v24 = vmul.f32 %v2668_v0, %v7880_v16  ;;  %v2671_v14 = vadd.f32 %v2593_v62, %v7985_v38  ;;  %v2588_v33 = vadd.f32 %v8231_v30, %v2587_v34  ;;  %v3259_v0 = vld [vmem:[#allocation3 + $0x220] sm:$0xff]  ;;  %v9195_v34 = vld [vmem:[#allocation20_spill] sm:$0xff] }
 0x487   :  { %v6750_v32 = vpop.f32.mrf.mxu0 }
 0x488   :  { %2708 = vst.msk [vmem:[#allocation2 + $0x18] sm:$0xff] %vm203_vm0, %v2688_v24  ;;  %v2691_v4 = vmul.f32 %v2671_v14, %v7888_v36  ;;  %v2670_v15 = vadd.f32 %v2588_v33, %v7976_v39  ;;  %v2603_v53 = vadd.f32 %v6750_v32, %v8231_v30  ;;  %v9196_v14 = vld [vmem:[#allocation15_spill] sm:$0xff] }
 0x489   :  { %v2597_v21 = vpop.f32.mrf.mxu0 }
 0x48a   :  { %2711 = vst.msk [vmem:[#allocation2 + $0x30] sm:$0xff] %vm203_vm0, %v2691_v4  ;;  %v2690_v6 = vmul.f32 %v2670_v15, %v7895_v3  ;;  %v2673_v19 = vadd.f32 %v2603_v53, %v8005_v44  ;;  %v2598_v38 = vadd.f32 %v8231_v30, %v2597_v21  ;;  %v8268_v44 = vld [vmem:[#allocation2 + $0x10] sm:$0xff] }
 0x48b   :  { %v6753_v60 = vpop.f32.mrf.mxu0  ;;  %v8259_v9 = vld [vmem:[#allocation2 + $0x8] sm:$0xff] }
 0x48c   :  { %v2746_v52 = vld [vmem:[#allocation2 + $0x5] sm:$0xff]  ;;  %v2747_v41 = vld [vmem:[#allocation2 + $0xd] sm:$0xff]  ;;  %2710 = vst.msk [vmem:[#allocation2 + $0x28] sm:$0xff] %vm203_vm0, %v2690_v6  ;;  %v2693_v39 = vmul.f32 %v2673_v19, %v7900_v28  ;;  %v2672_v59 = vadd.f32 %v2598_v38, %v7996_v48  ;;  %v2613_v31 = vadd.f32 %v6753_v60, %v8231_v30  ;;  %6785 = vmatprep.mubr.msk.f32.mxu1 %vm203_vm0, %v8259_v9 }
 0x48d   :  { %6831 = vmatprep.mubr.msk.f32.mxu0 %vm203_vm0, %v2746_v52  ;;  %v2607_v8 = vpop.f32.mrf.mxu0  ;;  %6786 = vmatmul.mubr.msk.f32.vlgmr.msra.gmra.mxu1 %vm203_vm0, %v8268_v44  ;;  %v8286_v45 = vld [vmem:[#allocation2 + $0x20] sm:$0xff]  ;;  %v9197_v6 = vld [vmem:[#allocation21_spill] sm:$0xff] }
 0x48e   :  { %6832 = vmatmul.mubr.msk.f32.vlgmr.msra.gmra.mxu0 %vm203_vm0, %v2747_v41  ;;  %2713 = vst.msk [vmem:[#allocation2 + $0x40] sm:$0xff] %vm203_vm0, %v2693_v39  ;;  %v2692_v48 = vmul.f32 %v2672_v59, %v7905_v7  ;;  %v2675_v20 = vadd.f32 %v2613_v31, %v9188_v57  ;;  %v2608_v54 = vadd.f32 %v8231_v30, %v2607_v8  ;;  %v9198_v38 = vld [vmem:[#allocation29_spill] sm:$0xff]  ;;  %v3258_v39 = vld [vmem:[#allocation3 + $0x218] sm:$0xff]  ;;  %v9199_v31 = vld [vmem:[#allocation22_spill] sm:$0xff] }
 0x48f   :  { %6862 = vmatpush3.msra.mxu1 %v3262_v26  ;;  %v6756_v43 = vpop.f32.mrf.mxu0  ;;  %v8277_v58 = vld [vmem:[#allocation2 + $0x18] sm:$0xff]  ;;  %v9200_v8 = vld [vmem:[#allocation32_spill] sm:$0xff] }
 0x490   :  { %v2748_v42 = vld [vmem:[#allocation2 + $0x15] sm:$0xff]  ;;  %v2749_v50 = vld [vmem:[#allocation2 + $0x1d] sm:$0xff]  ;;  %6863 = vmatprep.subr.mxu1 %v3261_v40  ;;  %2712 = vst.msk [vmem:[#allocation2 + $0x38] sm:$0xff] %vm203_vm0, %v2692_v48  ;;  %v2695_v5 = vmul.f32 %v2675_v20, %v9189_v51  ;;  %v2674_v63 = vadd.f32 %v2608_v54, %v9190_v46  ;;  %v2623_v25 = vadd.f32 %v6756_v43, %v8231_v30 }
 0x491   :  { %6788 = vmatprep.mubr.msk.f32.mxu1 %vm203_vm0, %v8277_v58  ;;  %6834 = vmatprep.mubr.msk.f32.mxu0 %vm203_vm0, %v2748_v42  ;;  %v2617_v26 = vpop.f32.mrf.mxu0  ;;  %v8304_v29 = vld [vmem:[#allocation2 + $0x30] sm:$0xff]  ;;  %v9203_v46 = vld [vmem:[#allocation31_spill] sm:$0xff] }
 0x492   :  { %6789 = vmatmul.mubr.msk.f32.gmra.mxu1 %vm203_vm0, %v8286_v45  ;;  %6835 = vmatmul.mubr.msk.f32.gmra.mxu0 %vm203_vm0, %v2749_v50  ;;  %2715 = vst.msk [vmem:[#allocation2 + $0x50] sm:$0xff] %vm203_vm0, %v2695_v5  ;;  %v2694_v55 = vmul.f32 %v2674_v63, %v9191_v61  ;;  %v2677_v12 = vadd.f32 %v2623_v25, %v9192_v18  ;;  %v9202_v50 = vld [vmem:[#allocation23_spill] sm:$0xff]  ;;  %v9205_v18 = vld [vmem:[#allocation24_spill] sm:$0xff] }
 0x493   :  { %v2618_v13 = vadd.f32 %v8231_v30, %v2617_v26  ;;  %6864 = vmatpush3.msra.mxu1 %v3261_v40  ;;  %v6759_v35 = vpop.f32.mrf.mxu0  ;;  %v8295_v37 = vld [vmem:[#allocation2 + $0x28] sm:$0xff]  ;;  %v3257_v26 = vld [vmem:[#allocation3 + $0x210] sm:$0xff] }
 0x494   :  { %v2750_v49 = vld [vmem:[#allocation2 + $0x25] sm:$0xff]  ;;  %v2751_v10 = vld [vmem:[#allocation2 + $0x2d] sm:$0xff]  ;;  %6865 = vmatprep.subr.mxu1 %v3260_v17  ;;  %2714 = vst.msk [vmem:[#allocation2 + $0x48] sm:$0xff] %vm203_vm0, %v2694_v55  ;;  %v2697_v27 = vmul.f32 %v2677_v12, %v9193_v56  ;;  %v2633_v11 = vadd.f32 %v6759_v35, %v8231_v30  ;;  %6791 = vmatprep.mubr.msk.f32.mxu1 %vm203_vm0, %v8295_v37 }
 0x495   :  { %v2676_v47 = vadd.f32 %v2618_v13, %v9194_v22  ;;  %6837 = vmatprep.mubr.msk.f32.mxu0 %vm203_vm0, %v2750_v49  ;;  %v2627_v62 = vpop.f32.mrf.mxu0  ;;  %6866 = vmatpush3.msra.mxu1 %v3260_v17  ;;  %v8322_v41 = vld [vmem:[#allocation2 + $0x40] sm:$0xff]  ;;  %v9206_v13 = vld [vmem:[#allocation34_spill] sm:$0xff] }
 0x496   :  { %6792 = vmatmul.mubr.msk.f32.gmra.mxu1 %vm203_vm0, %v8304_v29  ;;  %6838 = vmatmul.mubr.msk.f32.gmra.mxu0 %vm203_vm0, %v2751_v10  ;;  %2717 = vst.msk [vmem:[#allocation2 + $0x60] sm:$0xff] %vm203_vm0, %v2697_v27  ;;  %v2679_v33 = vadd.f32 %v2633_v11, %v9196_v14  ;;  %v2628_v32 = vadd.f32 %v8231_v30, %v2627_v62  ;;  %v9208_v11 = vld [vmem:[#allocation27_spill] sm:$0xff]  ;;  %v9209_v62 = vld [vmem:[#allocation33_spill] sm:$0xff] }
 0x497   :  { %v2696_v24 = vmul.f32 %v2676_v47, %v9195_v34  ;;  %v6762_v4 = vpop.f32.mrf.mxu0  ;;  %v8313_v15 = vld [vmem:[#allocation2 + $0x38] sm:$0xff]  ;;  %6867 = vmatprep.subr.mxu1 %v3259_v0 }
 0x498   :  { %v2752_v53 = vld [vmem:[#allocation2 + $0x35] sm:$0xff]  ;;  %v2753_v21 = vld [vmem:[#allocation2 + $0x3d] sm:$0xff]  ;;  %v2699_v19 = vmul.f32 %v2679_v33, %v9197_v6  ;;  %v2678_v60 = vadd.f32 %v2628_v32, %v9198_v38  ;;  %v2643_v52 = vadd.f32 %v6762_v4, %v8231_v30  ;;  %6794 = vmatprep.mubr.msk.f32.mxu1 %vm203_vm0, %v8313_v15  ;;  %6868 = vmatpush3.msra.mxu1 %v3259_v0 }
 0x499   :  { %2716 = vst.msk [vmem:[#allocation2 + $0x58] sm:$0xff] %vm203_vm0, %v2696_v24  ;;  %6840 = vmatprep.mubr.msk.f32.mxu0 %vm203_vm0, %v2752_v53  ;;  %v2637_v59 = vpop.f32.mrf.mxu0  ;;  %6869 = vmatprep.subr.mxu1 %v3258_v39  ;;  %v8340_v17 = vld [vmem:[#allocation2 + $0x50] sm:$0xff]  ;;  %v3256_v32 = vld [vmem:[#allocation3 + $0x208] sm:$0xff] }
 0x49a   :  { %6795 = vmatmul.mubr.msk.f32.gmra.mxu1 %vm203_vm0, %v8322_v41  ;;  %6841 = vmatmul.mubr.msk.f32.gmra.mxu0 %vm203_vm0, %v2753_v21  ;;  %2719 = vst.msk [vmem:[#allocation2 + $0x70] sm:$0xff] %vm203_vm0, %v2699_v19  ;;  %v2698_v40 = vmul.f32 %v2678_v60, %v9199_v31  ;;  %v2681_v48 = vadd.f32 %v2643_v52, %v9200_v8  ;;  %9204 = vst [vmem:[#allocation25_spill] sm:$0xff] %v8340_v17  ;;  %v9211_v53 = vld [vmem:[#allocation14_spill] sm:$0xff]  ;;  %v9212_v19 = vld [vmem:[#allocation36_spill] sm:$0xff] }
 0x49b   :  { %v2638_v57 = vadd.f32 %v8231_v30, %v2637_v59  ;;  %v6765_v20 = vpop.f32.mrf.mxu0  ;;  %v8331_v54 = vld [vmem:[#allocation2 + $0x48] sm:$0xff]  ;;  %6870 = vmatpush3.msra.mxu1 %v3258_v39 }
 0x49c   :  { %9201 = vst [vmem:[#allocation26_spill] sm:$0xff] %v8331_v54  ;;  %v2754_v43 = vld [vmem:[#allocation2 + $0x45] sm:$0xff]  ;;  %v2755_v42 = vld [vmem:[#allocation2 + $0x4d] sm:$0xff]  ;;  %2718 = vst.msk [vmem:[#allocation2 + $0x68] sm:$0xff] %vm203_vm0, %v2698_v40  ;;  %v2701_v5 = vmul.f32 %v2681_v48, %v9202_v50  ;;  %v2653_v25 = vadd.f32 %v6765_v20, %v8231_v30  ;;  %6797 = vmatprep.mubr.msk.f32.mxu1 %vm203_vm0, %v8331_v54  ;;  %6871 = vmatprep.subr.mxu1 %v3257_v26 }
 0x49d   :  { %v2680_v63 = vadd.f32 %v2638_v57, %v9203_v46  ;;  %6843 = vmatprep.mubr.msk.f32.mxu0 %vm203_vm0, %v2754_v43  ;;  %v2647_v55 = vpop.f32.mrf.mxu0  ;;  %v8358_v33 = vld [vmem:[#allocation2 + $0x60] sm:$0xff]  ;;  %6872 = vmatpush3.msra.mxu1 %v3257_v26  ;;  %v9214_v40 = vld [vmem:[#allocation16_spill] sm:$0xff]  ;;  %v9217_v43 = vld [vmem:[#allocation30_spill] sm:$0xff] }
 0x49e   :  { %6798 = vmatmul.mubr.msk.f32.gmra.mxu1 %vm203_vm0, %v8340_v17  ;;  %6844 = vmatmul.mubr.msk.f32.gmra.mxu0 %vm203_vm0, %v2755_v42  ;;  %2721 = vst.msk [vmem:[#allocation2 + $0x80] sm:$0xff] %vm203_vm0, %v2701_v5  ;;  %v2683_v35 = vadd.f32 %v2653_v25, %v9206_v13  ;;  %v2648_v49 = vadd.f32 %v8231_v30, %v2647_v55  ;;  %9210 = vst [vmem:[#allocation28_spill] sm:$0xff] %v8358_v33  ;;  %v9215_v48 = vld [vmem:[#allocation35_spill] sm:$0xff] }
 0x49f   :  { %v2700_v12 = vmul.f32 %v2680_v63, %v9205_v18  ;;  %v6768_v10 = vpop.f32.mrf.mxu0  ;;  %6873 = vmatprep.subr.mxu1 %v3256_v32 }
 0x4a0   :  { %v8349_v27 = vld [vmem:[#allocation2 + $0x58] sm:$0xff]  ;;  %v2703_v0 = vmul.f32 %v2683_v35, %v9208_v11  ;;  %v2682_v24 = vadd.f32 %v2648_v49, %v9209_v62  ;;  %v2663_v14 = vadd.f32 %v6768_v10, %v8231_v30  ;;  %6874 = vmatpush3.msra.mxu1 %v3256_v32 }
 0x4a1   :  { %9207 = vst [vmem:[#allocation13_spill] sm:$0xff] %v8349_v27  ;;  %v2756_v22 = vld [vmem:[#allocation2 + $0x55] sm:$0xff]  ;;  %v2757_v47 = vld [vmem:[#allocation2 + $0x5d] sm:$0xff]  ;;  %2720 = vst.msk [vmem:[#allocation2 + $0x78] sm:$0xff] %vm203_vm0, %v2700_v12  ;;  %6800 = vmatprep.mubr.msk.f32.mxu1 %vm203_vm0, %v8349_v27  ;;  %v2657_v4 = vpop.f32.mrf.mxu0 }
 0x4a2   :  { %6846 = vmatprep.mubr.msk.f32.mxu0 %vm203_vm0, %v2756_v22  ;;  %6801 = vmatmul.mubr.msk.f32.gmra.mxu1 %vm203_vm0, %v8358_v33  ;;  %2723 = vst.msk [vmem:[#allocation2 + $0x90] sm:$0xff] %vm203_vm0, %v2703_v0  ;;  %v2702_v21 = vmul.f32 %v2682_v24, %v9211_v53  ;;  %v2685_v38 = vadd.f32 %v2663_v14, %v9212_v19  ;;  %v8375_v20 = vld [vmem:[#allocation2 + $0x70] sm:$0xff]  ;;  %v2768_v62 = vld [vmem:[#allocation2 + $0x1b] sm:$0xff]  ;;  %v2769_v24 = vld [vmem:[#allocation2 + $0x23] sm:$0xff] }
 0x4a3   :  { %6847 = vmatmul.mubr.msk.f32.gmra.mxu0 %vm203_vm0, %v2757_v47  ;;  %v2658_v60 = vadd.f32 %v8231_v30, %v2657_v4  ;;  %v8367_v52 = vld [vmem:[#allocation2 + $0x68] sm:$0xff]  ;;  %9216 = vst [vmem:[#allocation29_spill] sm:$0xff] %v8375_v20  ;;  %v3255_v30 = vld [vmem:[#allocation3 + $0x200] sm:$0xff]  ;;  %v2772_v4 = vld [vmem:[#allocation2 + $0x3b] sm:$0xff] }
 0x4a4   :  { %9213 = vst [vmem:[#allocation15_spill] sm:$0xff] %v8367_v52  ;;  %v2758_v39 = vld [vmem:[#allocation2 + $0x65] sm:$0xff]  ;;  %v2759_v59 = vld [vmem:[#allocation2 + $0x6d] sm:$0xff]  ;;  %2722 = vst.msk [vmem:[#allocation2 + $0x88] sm:$0xff] %vm203_vm0, %v2702_v21  ;;  %v2705_v8 = vmul.f32 %v2685_v38, %v9214_v40  ;;  %6803 = vmatprep.mubr.msk.f32.mxu1 %vm203_vm0, %v8367_v52  ;;  %6875 = vmatprep.subr.mxu1 %v3255_v30 }
 0x4a5   :  { %v2684_v57 = vadd.f32 %v2658_v60, %v9215_v48  ;;  %6849 = vmatprep.mubr.msk.f32.mxu0 %vm203_vm0, %v2758_v39  ;;  %v8388_v25 = vld [vmem:[#allocation2 + $0x80] sm:$0xff]  ;;  %6876 = vmatpush3.msra.mxu1 %v3255_v30  ;;  %v2766_v47 = vld [vmem:[#allocation2 + $0xb] sm:$0xff]  ;;  %v2767_v0 = vld [vmem:[#allocation2 + $0x13] sm:$0xff] }
 0x4a6   :  { %6804 = vmatmul.mubr.msk.f32.gmra.mxu1 %vm203_vm0, %v8375_v20  ;;  %2725 = vst.msk [vmem:[#allocation2 + $0xa0] sm:$0xff] %vm203_vm0, %v2705_v8  ;;  %9219 = vst [vmem:[#allocation31_spill] sm:$0xff] %v8388_v25  ;;  %v2770_v14 = vld [vmem:[#allocation2 + $0x2b] sm:$0xff]  ;;  %v2771_v32 = vld [vmem:[#allocation2 + $0x33] sm:$0xff] }
 0x4a7   :  { %6850 = vmatmul.mubr.msk.f32.gmra.mxu0 %vm203_vm0, %v2759_v59  ;;  %v2704_v42 = vmul.f32 %v2684_v57, %v9217_v43  ;;  %v2773_v21 = vld [vmem:[#allocation2 + $0x43] sm:$0xff]  ;;  %v2774_v19 = vld [vmem:[#allocation2 + $0x4b] sm:$0xff]  ;;  %v2775_v38 = vld [vmem:[#allocation2 + $0x53] sm:$0xff] }
 0x4a8   :  { %v8382_v5 = vld [vmem:[#allocation2 + $0x78] sm:$0xff]  ;;  %v2777_v39 = vld [vmem:[#allocation2 + $0x63] sm:$0xff]  ;;  %v2778_v59 = vld [vmem:[#allocation2 + $0x6b] sm:$0xff] }
 0x4a9   :  { %9218 = vst [vmem:[#allocation32_spill] sm:$0xff] %v8382_v5  ;;  %v2760_v46 = vld [vmem:[#allocation2 + $0x75] sm:$0xff]  ;;  %v2761_v63 = vld [vmem:[#allocation2 + $0x7d] sm:$0xff]  ;;  %2724 = vst.msk [vmem:[#allocation2 + $0x98] sm:$0xff] %vm203_vm0, %v2704_v42  ;;  %6806 = vmatprep.mubr.msk.f32.mxu1 %vm203_vm0, %v8382_v5 }
 0x4aa   :  { %6852 = vmatprep.mubr.msk.f32.mxu0 %vm203_vm0, %v2760_v46  ;;  %6807 = vmatmul.mubr.msk.f32.gmra.mxu1 %vm203_vm0, %v8388_v25  ;;  %v8398_v13 = vld [vmem:[#allocation2 + $0x90] sm:$0xff]  ;;  %v2776_v60 = vld [vmem:[#allocation2 + $0x5b] sm:$0xff] }
 0x4ab   :  { %6853 = vmatmul.mubr.msk.f32.gmra.mxu0 %vm203_vm0, %v2761_v63  ;;  %v8393_v26 = vld [vmem:[#allocation2 + $0x88] sm:$0xff]  ;;  %9221 = vst [vmem:[#allocation33_spill] sm:$0xff] %v8398_v13  ;;  %v2779_v8 = vld [vmem:[#allocation2 + $0x73] sm:$0xff]  ;;  %v2780_v48 = vld [vmem:[#allocation2 + $0x7b] sm:$0xff] }
 0x4ac   :  { %9220 = vst [vmem:[#allocation34_spill] sm:$0xff] %v8393_v26  ;;  %v2762_v55 = vld [vmem:[#allocation2 + $0x85] sm:$0xff]  ;;  %v2763_v12 = vld [vmem:[#allocation2 + $0x8d] sm:$0xff]  ;;  %6809 = vmatprep.mubr.msk.f32.mxu1 %vm203_vm0, %v8393_v26  ;;  %v5688_v63 = vld [vmem:[%s9085_s6 + $0xb8] sm:$0xff] }
 0x4ad   :  { %6855 = vmatprep.mubr.msk.f32.mxu0 %vm203_vm0, %v2762_v55  ;;  %v8408_v22 = vld [vmem:[#allocation2 + $0xa0] sm:$0xff]  ;;  %v2782_v30 = vld [vmem:[#allocation2 + $0x8b] sm:$0xff]  ;;  %6907 = vmatprep.subr.mxu0 %v5688_v63 }
 0x4ae   :  { %6810 = vmatmul.mubr.msk.f32.gmra.mxu1 %vm203_vm0, %v8398_v13  ;;  %9223 = vst [vmem:[#allocation35_spill] sm:$0xff] %v8408_v22  ;;  %v2781_v57 = vld [vmem:[#allocation2 + $0x83] sm:$0xff]  ;;  %6908 = vmatpush3.msra.mxu0 %v5688_v63  ;;  %v8482_v25 = vld [vmem:[%s9084_s5 + $0x2] ss:$0 sm:$0xff] }
 0x4af   :  { %6856 = vmatmul.mubr.msk.f32.gmra.mxu0 %vm203_vm0, %v2763_v12  ;;  %v2785_v55 = vld [vmem:[#allocation2 + $0xa3] sm:$0xff]  ;;  %v5687_v12 = vld [vmem:[%s9085_s6 + $0xb0] sm:$0xff] }
 0x4b0   :  { %v8403_v35 = vld [vmem:[#allocation2 + $0x98] sm:$0xff]  ;;  %6909 = vmatprep.subr.mxu0 %v5687_v12 }
 0x4b1   :  { %9222 = vst [vmem:[#allocation36_spill] sm:$0xff] %v8403_v35  ;;  %v2764_v49 = vld [vmem:[#allocation2 + $0x95] sm:$0xff]  ;;  %v2765_v10 = vld [vmem:[#allocation2 + $0x9d] sm:$0xff]  ;;  %6812 = vmatprep.mubr.msk.f32.mxu1 %vm203_vm0, %v8403_v35  ;;  %6910 = vmatpush3.msra.mxu0 %v5687_v12 }
 0x4b2   :  { %6858 = vmatprep.mubr.msk.f32.mxu0 %vm203_vm0, %v2764_v49  ;;  %6813 = vmatmul.mubr.msk.f32.gmra.mxu1 %vm203_vm0, %v8408_v22  ;;  %v2783_v42 = vld [vmem:[#allocation2 + $0x93] sm:$0xff]  ;;  %v2784_v46 = vld [vmem:[#allocation2 + $0x9b] sm:$0xff]  ;;  %v5686_v49 = vld [vmem:[%s9085_s6 + $0xa8] sm:$0xff] }
 0x4b3   :  { %6859 = vmatmul.mubr.msk.f32.gmra.mxu0 %vm203_vm0, %v2765_v10  ;;  %6877 = vmatprep.mubr.msk.f32.mxu1 %vm203_vm0, %v2766_v47  ;;  %v5685_v10 = vld [vmem:[%s9085_s6 + $0xa0] sm:$0xff]  ;;  %v5684_v47 = vld [vmem:[%s9085_s6 + $0x98] sm:$0xff] }
 0x4b4   :  { %6911 = vmatprep.subr.mxu0 %v5686_v49 }
 0x4b5   :  { %6912 = vmatpush3.msra.mxu0 %v5686_v49 }
 0x4b6   :  { %6878 = vmatmul.mubr.msk.f32.vlgmr.msra.gmra.mxu1 %vm203_vm0, %v2767_v0  ;;  %6913 = vmatprep.subr.mxu0 %v5685_v10  ;;  %v5683_v0 = vld [vmem:[%s9085_s6 + $0x90] sm:$0xff] }
 0x4b7   :  { %6880 = vmatprep.mubr.msk.f32.mxu1 %vm203_vm0, %v2768_v62  ;;  %6914 = vmatpush3.msra.mxu0 %v5685_v10  ;;  %v5682_v62 = vld [vmem:[%s9085_s6 + $0x88] sm:$0xff] }
 0x4b8   :  { %6915 = vmatprep.subr.mxu0 %v5684_v47 }
 0x4b9   :  { %6916 = vmatpush3.msra.mxu0 %v5684_v47 }
 0x4ba   :  { %6881 = vmatmul.mubr.msk.f32.gmra.mxu1 %vm203_vm0, %v2769_v24  ;;  %6917 = vmatprep.subr.mxu0 %v5683_v0  ;;  %v5681_v24 = vld [vmem:[%s9085_s6 + $0x80] sm:$0xff] }
 0x4bb   :  { %6883 = vmatprep.mubr.msk.f32.mxu1 %vm203_vm0, %v2770_v14  ;;  %6918 = vmatpush3.msra.mxu0 %v5683_v0  ;;  %v3916_v14 = vld [vmem:[#allocation3 + $0x2b8] sm:$0xff] }
 0x4bc   :  { %6919 = vmatprep.subr.mxu0 %v5682_v62  ;;  %6953 = vmatprep.subr.mxu1 %v3916_v14 }
 0x4bd   :  { %6920 = vmatpush3.msra.mxu0 %v5682_v62  ;;  %6954 = vmatpush3.msra.mxu1 %v3916_v14 }
 0x4be   :  { %6884 = vmatmul.mubr.msk.f32.gmra.mxu1 %vm203_vm0, %v2771_v32  ;;  %6921 = vmatprep.subr.mxu0 %v5681_v24  ;;  %v3915_v32 = vld [vmem:[#allocation3 + $0x2b0] sm:$0xff] }
 0x4bf   :  { %6886 = vmatprep.mubr.msk.f32.mxu1 %vm203_vm0, %v2772_v4  ;;  %6922 = vmatpush3.msra.mxu0 %v5681_v24  ;;  %v3914_v4 = vld [vmem:[#allocation3 + $0x2a8] sm:$0xff] }
 0x4c0   :  { %6955 = vmatprep.subr.mxu1 %v3915_v32 }
 0x4c1   :  { %6956 = vmatpush3.msra.mxu1 %v3915_v32 }
 0x4c2   :  { %6887 = vmatmul.mubr.msk.f32.gmra.mxu1 %vm203_vm0, %v2773_v21  ;;  %v3913_v21 = vld [vmem:[#allocation3 + $0x2a0] sm:$0xff]  ;;  %6957 = vmatprep.subr.mxu1 %v3914_v4 }
 0x4c3   :  { %6889 = vmatprep.mubr.msk.f32.mxu1 %vm203_vm0, %v2774_v19  ;;  %6958 = vmatpush3.msra.mxu1 %v3914_v4  ;;  %v3912_v19 = vld [vmem:[#allocation3 + $0x298] sm:$0xff] }
 0x4c4   :  { %6959 = vmatprep.subr.mxu1 %v3913_v21 }
 0x4c5   :  { %6960 = vmatpush3.msra.mxu1 %v3913_v21 }
 0x4c6   :  { %6890 = vmatmul.mubr.msk.f32.gmra.mxu1 %vm203_vm0, %v2775_v38  ;;  %6961 = vmatprep.subr.mxu1 %v3912_v19 }
 0x4c7   :  { %6892 = vmatprep.mubr.msk.f32.mxu1 %vm203_vm0, %v2776_v60  ;;  %6962 = vmatpush3.msra.mxu1 %v3912_v19 }
 0x4ca   :  { %6893 = vmatmul.mubr.msk.f32.gmra.mxu1 %vm203_vm0, %v2777_v39 }
 0x4cb   :  { %6895 = vmatprep.mubr.msk.f32.mxu1 %vm203_vm0, %v2778_v59 }
 0x4ce   :  { %6896 = vmatmul.mubr.msk.f32.gmra.mxu1 %vm203_vm0, %v2779_v8 }
 0x4cf   :  { %6898 = vmatprep.mubr.msk.f32.mxu1 %vm203_vm0, %v2780_v48 }
 0x4d2   :  { %6899 = vmatmul.mubr.msk.f32.gmra.mxu1 %vm203_vm0, %v2781_v57 }
 0x4d3   :  { %6901 = vmatprep.mubr.msk.f32.mxu1 %vm203_vm0, %v2782_v30 }
 0x4d6   :  { %6902 = vmatmul.mubr.msk.f32.gmra.mxu1 %vm203_vm0, %v2783_v42 }
 0x4d7   :  { %6904 = vmatprep.mubr.msk.f32.mxu1 %vm203_vm0, %v2784_v46 }
 0x4da   :  { %6905 = vmatmul.mubr.msk.f32.gmra.mxu1 %vm203_vm0, %v2785_v55 }
 0x54d   :  { %v6787_v38 = vpop.f32.mrf.mxu1 }
 0x54e   :  { %v6833_v60 = vpop.f32.mrf.mxu0 }
 0x54f   :  { %v2930_v39 = vpop.f32.mrf.mxu1  ;;  %v3161_v13 = vadd.f32 %v6833_v60, %v6787_v38 }
 0x550   :  { %v3155_v59 = vpop.f32.mrf.mxu0 }
 0x551   :  { %v3156_v5 = vadd.f32 %v3155_v59, %v2930_v39 }
 0x552   :  { %v6790_v8 = vpop.f32.mrf.mxu1  ;;  %v6836_v48 = vpop.f32.mrf.mxu0 }
 0x553   :  { %v3171_v6 = vadd.f32 %v6836_v48, %v6790_v8 }
 0x554   :  { %v2940_v57 = vpop.f32.mrf.mxu1  ;;  %v3165_v42 = vpop.f32.mrf.mxu0 }
 0x555   :  { %v3166_v56 = vadd.f32 %v3165_v42, %v2940_v57 }
 0x556   :  { %v6793_v30 = vpop.f32.mrf.mxu1  ;;  %v6839_v55 = vpop.f32.mrf.mxu0 }
 0x557   :  { %v3181_v39 = vadd.f32 %v6839_v55, %v6793_v30 }
 0x558   :  { %v2950_v46 = vpop.f32.mrf.mxu1  ;;  %v3175_v10 = vpop.f32.mrf.mxu0 }
 0x559   :  { %v3176_v17 = vadd.f32 %v3175_v10, %v2950_v46 }
 0x55a   :  { %v6796_v63 = vpop.f32.mrf.mxu1  ;;  %v6842_v62 = vpop.f32.mrf.mxu0 }
 0x55c   :  { %v2960_v12 = vpop.f32.mrf.mxu1  ;;  %v3185_v32 = vpop.f32.mrf.mxu0 }
 0x55e   :  { %v6799_v49 = vpop.f32.mrf.mxu1  ;;  %v6845_v19 = vpop.f32.mrf.mxu0 }
 0x55f   :  { %v3201_v42 = vadd.f32 %v6845_v19, %v6799_v49 }
 0x560   :  { %v8457_v47 = vpop.f32.mrf.mxu1  ;;  %v3195_v40 = vpop.f32.mrf.mxu0 }
 0x561   :  { %v3196_v10 = vadd.f32 %v3195_v40, %v8457_v47 }
 0x562   :  { %v8459_v0 = vpop.f32.mrf.mxu1 }
 0x563   :  { %v6848_v26 = vpop.f32.mrf.mxu0 }
 0x564   :  { %v8461_v24 = vpop.f32.mrf.mxu1 }
 0x565   :  { %v3205_v31 = vpop.f32.mrf.mxu0 }
 0x566   :  { %v8463_v14 = vpop.f32.mrf.mxu1 }
 0x567   :  { %v6851_v38 = vpop.f32.mrf.mxu0 }
 0x568   :  { %v8465_v4 = vpop.f32.mrf.mxu1 }
 0x56a   :  { %v8467_v21 = vpop.f32.mrf.mxu1 }
 0x56c   :  { %v8469_v43 = vpop.f32.mrf.mxu1 }
 0x56e   :  { %v8471_v35 = vpop.f32.mrf.mxu1 }
 0x570   :  { %v8473_v22 = vpop.f32.mrf.mxu1 }
 0x572   :  { %v8475_v53 = vpop.f32.mrf.mxu1 }
 0x574   :  { %v8477_v11 = vpop.f32.mrf.mxu1 }
 0x576   :  { %v6879_v18 = vpop.f32.mrf.mxu1 }
 0x577   :  { %v3489_v50 = vadd.f32 %v6879_v18, %v3161_v13 }
 0x578   :  { %v3389_v52 = vpop.f32.mrf.mxu1 }
 0x579   :  { %v3488_v20 = vadd.f32 %v3389_v52, %v3156_v5  ;;  %v3517_v34 = vadd.f32 %v8482_v25, %v3489_v50  ;;  %v3215_v50 = vpop.f32.mrf.mxu0 }
 0x57a   :  { %v6882_v27 = vpop.f32.mrf.mxu1 }
 0x57b   :  { %v3516_v33 = vadd.f32 %v8482_v25, %v3488_v20  ;;  %v3491_v61 = vadd.f32 %v6882_v27, %v3171_v6  ;;  %v3537_v59 = vmax.f32 %v3517_v34, 0.0  ;;  %v3191_v6 = vadd.f32 %v6842_v62, %v6796_v63 }
 0x57c   :  { %v3399_v60 = vpop.f32.mrf.mxu1 }
 0x57d   :  { %v3536_v18 = vmax.f32 %v3516_v33, 0.0  ;;  %v3490_v13 = vadd.f32 %v3399_v60, %v3166_v56  ;;  %v3519_v54 = vadd.f32 %v8482_v25, %v3491_v61  ;;  %v3186_v33 = vadd.f32 %v3185_v32, %v2960_v12 }
 0x57e   :  { %v6885_v51 = vpop.f32.mrf.mxu1 }
 0x57f   :  { %v3518_v8 = vadd.f32 %v8482_v25, %v3490_v13  ;;  %v3493_v52 = vadd.f32 %v6885_v51, %v3181_v39  ;;  %6923 = vmatprep.mubr.msk.f32.mxu0 %vm203_vm0, %v3536_v18  ;;  %v3539_v48 = vmax.f32 %v3519_v54, 0.0  ;;  %v6854_v51 = vpop.f32.mrf.mxu0  ;;  %v3211_v39 = vadd.f32 %v6848_v26, %v8459_v0 }
 0x580   :  { %v3409_v5 = vpop.f32.mrf.mxu1  ;;  %6924 = vmatmul.mubr.msk.f32.vlgmr.msra.gmra.mxu0 %vm203_vm0, %v3537_v59 }
 0x581   :  { %v3538_v27 = vmax.f32 %v3518_v8, 0.0  ;;  %v3492_v20 = vadd.f32 %v3409_v5, %v3176_v17  ;;  %v3521_v56 = vadd.f32 %v8482_v25, %v3493_v52  ;;  %v3225_v32 = vpop.f32.mrf.mxu0  ;;  %v3206_v8 = vadd.f32 %v3205_v31, %v8461_v24 }
 0x582   :  { %v6888_v34 = vpop.f32.mrf.mxu1 }
 0x583   :  { %v3520_v61 = vadd.f32 %v8482_v25, %v3492_v20  ;;  %v3495_v57 = vadd.f32 %v6888_v34, %v3191_v6  ;;  %6926 = vmatprep.mubr.msk.f32.mxu0 %vm203_vm0, %v3538_v27  ;;  %v3541_v63 = vmax.f32 %v3521_v56, 0.0  ;;  %v6857_v52 = vpop.f32.mrf.mxu0  ;;  %v3221_v6 = vadd.f32 %v6851_v38, %v8463_v14 }
 0x584   :  { %v3419_v30 = vpop.f32.mrf.mxu1  ;;  %6927 = vmatmul.mubr.msk.f32.gmra.mxu0 %vm203_vm0, %v3539_v48  ;;  %v3216_v56 = vadd.f32 %v3215_v50, %v8465_v4 }
 0x585   :  { %v3540_v46 = vmax.f32 %v3520_v61, 0.0  ;;  %v3494_v55 = vadd.f32 %v3419_v30, %v3186_v33  ;;  %v3523_v17 = vadd.f32 %v8482_v25, %v3495_v57  ;;  %v3235_v34 = vpop.f32.mrf.mxu0  ;;  %v3231_v61 = vadd.f32 %v6854_v51, %v8467_v21 }
 0x586   :  { %v6891_v54 = vpop.f32.mrf.mxu1 }
 0x587   :  { %v3522_v12 = vadd.f32 %v8482_v25, %v3494_v55  ;;  %v3497_v62 = vadd.f32 %v6891_v54, %v3201_v42  ;;  %6929 = vmatprep.mubr.msk.f32.mxu0 %vm203_vm0, %v3540_v46  ;;  %v3543_v18 = vmax.f32 %v3523_v17, 0.0  ;;  %v3226_v46 = vadd.f32 %v3225_v32, %v8469_v43  ;;  %v6860_v55 = vpop.f32.mrf.mxu0 }
 0x588   :  { %v3429_v60 = vpop.f32.mrf.mxu1  ;;  %6930 = vmatmul.mubr.msk.f32.gmra.mxu0 %vm203_vm0, %v3541_v63  ;;  %v3241_v17 = vadd.f32 %v6857_v52, %v8471_v35 }
 0x589   :  { %v3542_v49 = vmax.f32 %v3522_v12, 0.0  ;;  %v3496_v19 = vadd.f32 %v3429_v60, %v3196_v10  ;;  %v3525_v13 = vadd.f32 %v8482_v25, %v3497_v62  ;;  %v3236_v62 = vadd.f32 %v3235_v34, %v8473_v22  ;;  %v3245_v60 = vpop.f32.mrf.mxu0  ;;  %v3902_v34 = vld [vmem:[#allocation3 + $0x250] sm:$0xff] }
 0x58a   :  { %v6894_v59 = vpop.f32.mrf.mxu1 }
 0x58b   :  { %v3524_v40 = vadd.f32 %v8482_v25, %v3496_v19  ;;  %v3499_v47 = vadd.f32 %v6894_v59, %v3211_v39  ;;  %6932 = vmatprep.mubr.msk.f32.mxu0 %vm203_vm0, %v3542_v49  ;;  %v3545_v27 = vmax.f32 %v3525_v13, 0.0  ;;  %v3251_v49 = vadd.f32 %v6860_v55, %v8475_v53 }
 0x58c   :  { %v3439_v5 = vpop.f32.mrf.mxu1  ;;  %6933 = vmatmul.mubr.msk.f32.gmra.mxu0 %vm203_vm0, %v3543_v18 }
 0x58d   :  { %v3544_v26 = vmax.f32 %v3524_v40, 0.0  ;;  %v3498_v0 = vadd.f32 %v3439_v5, %v3206_v8  ;;  %v3527_v20 = vadd.f32 %v8482_v25, %v3499_v47  ;;  %v3246_v8 = vadd.f32 %v3245_v60, %v8477_v11 }
 0x58e   :  { %v6897_v48 = vpop.f32.mrf.mxu1 }
 0x58f   :  { %v3526_v31 = vadd.f32 %v8482_v25, %v3498_v0  ;;  %v3501_v24 = vadd.f32 %v6897_v48, %v3221_v6  ;;  %6935 = vmatprep.mubr.msk.f32.mxu0 %vm203_vm0, %v3544_v26  ;;  %v3547_v57 = vmax.f32 %v3527_v20, 0.0  ;;  %v3906_v20 = vld [vmem:[#allocation3 + $0x270] sm:$0xff]  ;;  %v3905_v48 = vld [vmem:[#allocation3 + $0x268] sm:$0xff] }
 0x590   :  { %v3449_v33 = vpop.f32.mrf.mxu1  ;;  %6936 = vmatmul.mubr.msk.f32.gmra.mxu0 %vm203_vm0, %v3545_v27  ;;  %v3907_v27 = vld [vmem:[#allocation3 + $0x278] sm:$0xff] }
 0x591   :  { %v3546_v14 = vmax.f32 %v3526_v31, 0.0  ;;  %v3500_v38 = vadd.f32 %v3449_v33, %v3216_v56  ;;  %v3529_v30 = vadd.f32 %v8482_v25, %v3501_v24  ;;  %6999 = vmatprep.subr.mxu0 %v3907_v27  ;;  %v3911_v56 = vld [vmem:[#allocation3 + $0x290] sm:$0xff]  ;;  %v3903_v31 = vld [vmem:[#allocation3 + $0x258] sm:$0xff]  ;;  %v3910_v24 = vld [vmem:[#allocation3 + $0x288] sm:$0xff] }
 0x592   :  { %v6900_v42 = vpop.f32.mrf.mxu1  ;;  %7000 = vmatpush3.msra.mxu0 %v3907_v27  ;;  %6963 = vmatprep.subr.mxu1 %v3911_v56  ;;  %v3901_v33 = vld [vmem:[#allocation3 + $0x248] sm:$0xff] }
 0x593   :  { %v3528_v4 = vadd.f32 %v8482_v25, %v3500_v38  ;;  %v3503_v50 = vadd.f32 %v6900_v42, %v3231_v61  ;;  %6938 = vmatprep.mubr.msk.f32.mxu0 %vm203_vm0, %v3546_v14  ;;  %v3549_v54 = vmax.f32 %v3529_v30, 0.0  ;;  %7001 = vmatprep.subr.mxu0 %v3906_v20  ;;  %v3909_v61 = vld [vmem:[#allocation3 + $0x280] sm:$0xff]  ;;  %v4375_v38 = vld [vmem:[#allocation3 + $0x2f8] sm:$0xff] }
 0x594   :  { %v3459_v63 = vpop.f32.mrf.mxu1  ;;  %6939 = vmatmul.mubr.msk.f32.gmra.mxu0 %vm203_vm0, %v3547_v57  ;;  %6964 = vmatpush3.msra.mxu1 %v3911_v56  ;;  %v3900_v14 = vld [vmem:[#allocation3 + $0x240] sm:$0xff]  ;;  %v8538_v57 = vld [vmem:[%s9086_s7 + $0x2] ss:$0 sm:$0xff] }
 0x595   :  { %v3548_v21 = vmax.f32 %v3528_v4, 0.0  ;;  %v3502_v51 = vadd.f32 %v3459_v63, %v3226_v46  ;;  %v3531_v10 = vadd.f32 %v8482_v25, %v3503_v50  ;;  %7002 = vmatpush3.msra.mxu0 %v3906_v20  ;;  %6965 = vmatprep.subr.mxu1 %v3910_v24 }
 0x596   :  { %v6903_v12 = vpop.f32.mrf.mxu1  ;;  %7003 = vmatprep.subr.mxu0 %v3905_v48  ;;  %6966 = vmatpush3.msra.mxu1 %v3910_v24  ;;  %v9226_v24 = vld [vmem:[#allocation26_spill] sm:$0xff] }
 0x597   :  { %v3530_v43 = vadd.f32 %v8482_v25, %v3502_v51  ;;  %v3505_v32 = vadd.f32 %v6903_v12, %v3241_v17  ;;  %6941 = vmatprep.mubr.msk.f32.mxu0 %vm203_vm0, %v3548_v21  ;;  %v3551_v18 = vmax.f32 %v3531_v10, 0.0  ;;  %7004 = vmatpush3.msra.mxu0 %v3905_v48 }
 0x598   :  { %v3469_v39 = vpop.f32.mrf.mxu1  ;;  %6942 = vmatmul.mubr.msk.f32.gmra.mxu0 %vm203_vm0, %v3549_v54  ;;  %6967 = vmatprep.subr.mxu1 %v3909_v61 }
 0x599   :  { %v3550_v35 = vmax.f32 %v3530_v43, 0.0  ;;  %v3504_v19 = vadd.f32 %v3469_v39, %v3236_v62  ;;  %v3533_v13 = vadd.f32 %v8482_v25, %v3505_v32  ;;  %6968 = vmatpush3.msra.mxu1 %v3909_v61 }
 0x59a   :  { %v6906_v59 = vpop.f32.mrf.mxu1  ;;  %7045 = vmatprep.subr.mxu1 %v4375_v38 }
 0x59b   :  { %v3532_v22 = vadd.f32 %v8482_v25, %v3504_v19  ;;  %v3507_v40 = vadd.f32 %v6906_v59, %v3251_v49  ;;  %6944 = vmatprep.mubr.msk.f32.mxu0 %vm203_vm0, %v3550_v35  ;;  %v3553_v6 = vmax.f32 %v3533_v13, 0.0 }
 0x59c   :  { %v3479_v47 = vpop.f32.mrf.mxu1  ;;  %6945 = vmatmul.mubr.msk.f32.gmra.mxu0 %vm203_vm0, %v3551_v18 }
 0x59d   :  { %v3552_v52 = vmax.f32 %v3532_v22, 0.0  ;;  %v3506_v5 = vadd.f32 %v3479_v47, %v3246_v8  ;;  %v3535_v53 = vadd.f32 %v8482_v25, %v3507_v40 }
 0x59f   :  { %v3534_v26 = vadd.f32 %v8482_v25, %v3506_v5  ;;  %6947 = vmatprep.mubr.msk.f32.mxu0 %vm203_vm0, %v3552_v52  ;;  %v3555_v0 = vmax.f32 %v3535_v53, 0.0  ;;  %v3904_v25 = vld [vmem:[#allocation3 + $0x260] sm:$0xff] }
 0x5a0   :  { %6948 = vmatmul.mubr.msk.f32.gmra.mxu0 %vm203_vm0, %v3553_v6  ;;  %7005 = vmatprep.subr.mxu0 %v3904_v25  ;;  %v4374_v6 = vld [vmem:[#allocation3 + $0x2f0] sm:$0xff] }
 0x5a1   :  { %v3554_v11 = vmax.f32 %v3534_v26, 0.0  ;;  %7006 = vmatpush3.msra.mxu0 %v3904_v25  ;;  %v9224_v26 = vld [vmem:[#allocation25_spill] sm:$0xff] }
 0x5a2   :  { %7007 = vmatprep.subr.mxu0 %v3903_v31  ;;  %v9225_v25 = vld [vmem:[#allocation17_spill] sm:$0xff] }
 0x5a3   :  { %6950 = vmatprep.mubr.msk.f32.mxu0 %vm203_vm0, %v3554_v11  ;;  %7008 = vmatpush3.msra.mxu0 %v3903_v31 }
 0x5a4   :  { %6951 = vmatmul.mubr.msk.f32.gmra.mxu0 %vm203_vm0, %v3555_v0  ;;  %7009 = vmatprep.subr.mxu0 %v3902_v34 }
 0x5a5   :  { %7010 = vmatpush3.msra.mxu0 %v3902_v34 }
 0x5a6   :  { %7011 = vmatprep.subr.mxu0 %v3901_v33 }
 0x5a7   :  { %7012 = vmatpush3.msra.mxu0 %v3901_v33 }
 0x5a8   :  { %7013 = vmatprep.subr.mxu0 %v3900_v14 }
 0x5a9   :  { %7014 = vmatpush3.msra.mxu0 %v3900_v14  ;;  %v4373_v14 = vld [vmem:[#allocation3 + $0x2e8] sm:$0xff] }
 0x640   :  { %v6925_v30 = vpop.f32.mrf.mxu0 }
 0x641   :  { %v3705_v42 = vadd.f32 %v6925_v30, %v8538_v57  ;;  %v9227_v30 = vld [vmem:[#allocation18_spill] sm:$0xff] }
 0x642   :  { %v3699_v46 = vpop.f32.mrf.mxu0 }
 0x643   :  { %v3799_v4 = vadd.f32 %v3705_v42, %v8268_v44  ;;  %v3700_v50 = vadd.f32 %v8538_v57, %v3699_v46  ;;  %v9228_v46 = vld [vmem:[#allocation28_spill] sm:$0xff] }
 0x644   :  { %v6928_v55 = vpop.f32.mrf.mxu0 }
 0x645   :  { %v3819_v63 = vmul.f32 %v3799_v4, %v7886_v2  ;;  %v3798_v17 = vadd.f32 %v3700_v50, %v8259_v9  ;;  %v3715_v21 = vadd.f32 %v6928_v55, %v8538_v57 }
 0x646   :  { %v3709_v51 = vpop.f32.mrf.mxu0 }
 0x647   :  { %3839 = vst.msk [vmem:[#allocation2 + $0x10] sm:$0xff] %vm203_vm0, %v3819_v63  ;;  %v3818_v54 = vmul.f32 %v3798_v17, %v7882_v23  ;;  %v3801_v10 = vadd.f32 %v3715_v21, %v8286_v45  ;;  %v3710_v12 = vadd.f32 %v8538_v57, %v3709_v51  ;;  %v9229_v51 = vld [vmem:[#allocation19_spill] sm:$0xff] }
 0x648   :  { %v6931_v62 = vpop.f32.mrf.mxu0 }
 0x649   :  { %3838 = vst.msk [vmem:[#allocation2 + $0x8] sm:$0xff] %vm203_vm0, %v3818_v54  ;;  %v3821_v44 = vmul.f32 %v3801_v10, %v7884_v1  ;;  %v3800_v43 = vadd.f32 %v3710_v12, %v8277_v58  ;;  %v3725_v9 = vadd.f32 %v6931_v62, %v8538_v57  ;;  %v9230_v10 = vld [vmem:[#allocation13_spill] sm:$0xff] }
 0x64a   :  { %v3719_v32 = vpop.f32.mrf.mxu0 }
 0x64b   :  { %3841 = vst.msk [vmem:[#allocation2 + $0x20] sm:$0xff] %vm203_vm0, %v3821_v44  ;;  %v3820_v60 = vmul.f32 %v3800_v43, %v7880_v16  ;;  %v3803_v39 = vadd.f32 %v3725_v9, %v8304_v29  ;;  %v3720_v45 = vadd.f32 %v8538_v57, %v3719_v32  ;;  %v4372_v43 = vld [vmem:[#allocation3 + $0x2e0] sm:$0xff]  ;;  %v9231_v32 = vld [vmem:[#allocation20_spill] sm:$0xff] }
 0x64c   :  { %v6934_v49 = vpop.f32.mrf.mxu0 }
 0x64d   :  { %3840 = vst.msk [vmem:[#allocation2 + $0x18] sm:$0xff] %vm203_vm0, %v3820_v60  ;;  %v3823_v35 = vmul.f32 %v3803_v39, %v7888_v36  ;;  %v3802_v19 = vadd.f32 %v3720_v45, %v8295_v37  ;;  %v3735_v58 = vadd.f32 %v6934_v49, %v8538_v57  ;;  %v9232_v39 = vld [vmem:[#allocation29_spill] sm:$0xff] }
 0x64e   :  { %v3729_v18 = vpop.f32.mrf.mxu0 }
 0x64f   :  { %3843 = vst.msk [vmem:[#allocation2 + $0x30] sm:$0xff] %vm203_vm0, %v3823_v35  ;;  %v3822_v13 = vmul.f32 %v3802_v19, %v7895_v3  ;;  %v3805_v59 = vadd.f32 %v3735_v58, %v8322_v41  ;;  %v3730_v29 = vadd.f32 %v8538_v57, %v3729_v18  ;;  %v8577_v41 = vld [vmem:[#allocation2 + $0x10] sm:$0xff] }
 0x650   :  { %v6937_v8 = vpop.f32.mrf.mxu0  ;;  %v8566_v22 = vld [vmem:[#allocation2 + $0x8] sm:$0xff] }
 0x651   :  { %v3878_v40 = vld [vmem:[#allocation2 + $0x4] sm:$0xff]  ;;  %v8568_v47 = vld [vmem:[#allocation2 + $0xc] sm:$0xff]  ;;  %3842 = vst.msk [vmem:[#allocation2 + $0x28] sm:$0xff] %vm203_vm0, %v3822_v13  ;;  %v3825_v37 = vmul.f32 %v3805_v59, %v7900_v28  ;;  %v3804_v52 = vadd.f32 %v3730_v29, %v8313_v15  ;;  %v3745_v5 = vadd.f32 %v6937_v8, %v8538_v57  ;;  %6969 = vmatprep.mubr.msk.f32.mxu1 %vm203_vm0, %v8566_v22 }
 0x652   :  { %7015 = vmatprep.mubr.msk.f32.mxu0 %vm203_vm0, %v3878_v40  ;;  %v3739_v53 = vpop.f32.mrf.mxu0  ;;  %6970 = vmatmul.mubr.msk.f32.vlgmr.msra.gmra.mxu1 %vm203_vm0, %v8577_v41  ;;  %v8601_v61 = vld [vmem:[#allocation2 + $0x20] sm:$0xff]  ;;  %v9233_v13 = vld [vmem:[#allocation21_spill] sm:$0xff] }
 0x653   :  { %7016 = vmatmul.mubr.msk.f32.vlgmr.msra.gmra.mxu0 %vm203_vm0, %v8568_v47  ;;  %3845 = vst.msk [vmem:[#allocation2 + $0x40] sm:$0xff] %vm203_vm0, %v3825_v37  ;;  %v3824_v15 = vmul.f32 %v3804_v52, %v7905_v7  ;;  %v3807_v11 = vadd.f32 %v3745_v5, %v9224_v26  ;;  %v3740_v0 = vadd.f32 %v8538_v57, %v3739_v53  ;;  %v9234_v29 = vld [vmem:[#allocation15_spill] sm:$0xff]  ;;  %v4371_v52 = vld [vmem:[#allocation3 + $0x2d8] sm:$0xff] }
 0x654   :  { %7046 = vmatpush3.msra.mxu1 %v4375_v38  ;;  %v6940_v27 = vpop.f32.mrf.mxu0  ;;  %v8587_v20 = vld [vmem:[#allocation2 + $0x18] sm:$0xff] }
 0x655   :  { %v8589_v48 = vld [vmem:[#allocation2 + $0x14] sm:$0xff]  ;;  %v8591_v56 = vld [vmem:[#allocation2 + $0x1c] sm:$0xff]  ;;  %7047 = vmatprep.subr.mxu1 %v4374_v6  ;;  %3844 = vst.msk [vmem:[#allocation2 + $0x38] sm:$0xff] %vm203_vm0, %v3824_v15  ;;  %v3827_v31 = vmul.f32 %v3807_v11, %v9225_v25  ;;  %v3806_v34 = vadd.f32 %v3740_v0, %v9226_v24  ;;  %v3755_v33 = vadd.f32 %v6940_v27, %v8538_v57 }
 0x656   :  { %6972 = vmatprep.mubr.msk.f32.mxu1 %vm203_vm0, %v8587_v20  ;;  %7018 = vmatprep.mubr.msk.f32.mxu0 %vm203_vm0, %v8589_v48  ;;  %v3749_v38 = vpop.f32.mrf.mxu0  ;;  %v8625_v44 = vld [vmem:[#allocation2 + $0x30] sm:$0xff]  ;;  %v9236_v15 = vld [vmem:[#allocation31_spill] sm:$0xff] }
 0x657   :  { %6973 = vmatmul.mubr.msk.f32.gmra.mxu1 %vm203_vm0, %v8601_v61  ;;  %7019 = vmatmul.mubr.msk.f32.gmra.mxu0 %vm203_vm0, %v8591_v56  ;;  %3847 = vst.msk [vmem:[#allocation2 + $0x50] sm:$0xff] %vm203_vm0, %v3827_v31  ;;  %v3826_v42 = vmul.f32 %v3806_v34, %v9227_v30  ;;  %v3809_v4 = vadd.f32 %v3755_v33, %v9228_v46  ;;  %v9238_v34 = vld [vmem:[#allocation23_spill] sm:$0xff] }
 0x658   :  { %v3750_v50 = vadd.f32 %v8538_v57, %v3749_v38  ;;  %7048 = vmatpush3.msra.mxu1 %v4374_v6  ;;  %v6943_v55 = vpop.f32.mrf.mxu0  ;;  %v8611_v63 = vld [vmem:[#allocation2 + $0x28] sm:$0xff]  ;;  %v9235_v6 = vld [vmem:[#allocation22_spill] sm:$0xff] }
 0x659   :  { %v8613_v17 = vld [vmem:[#allocation2 + $0x24] sm:$0xff]  ;;  %v8615_v21 = vld [vmem:[#allocation2 + $0x2c] sm:$0xff]  ;;  %7049 = vmatprep.subr.mxu1 %v4373_v14  ;;  %3846 = vst.msk [vmem:[#allocation2 + $0x48] sm:$0xff] %vm203_vm0, %v3826_v42  ;;  %v3829_v54 = vmul.f32 %v3809_v4, %v9229_v51  ;;  %v3765_v62 = vadd.f32 %v6943_v55, %v8538_v57  ;;  %6975 = vmatprep.mubr.msk.f32.mxu1 %vm203_vm0, %v8611_v63 }
 0x65a   :  { %v3808_v12 = vadd.f32 %v3750_v50, %v9230_v10  ;;  %7021 = vmatprep.mubr.msk.f32.mxu0 %vm203_vm0, %v8613_v17  ;;  %v3759_v9 = vpop.f32.mrf.mxu0  ;;  %7050 = vmatpush3.msra.mxu1 %v4373_v14  ;;  %v8649_v37 = vld [vmem:[#allocation2 + $0x40] sm:$0xff]  ;;  %v9239_v14 = vld [vmem:[#allocation32_spill] sm:$0xff]  ;;  %v9242_v10 = vld [vmem:[#allocation33_spill] sm:$0xff] }
 0x65b   :  { %6976 = vmatmul.mubr.msk.f32.gmra.mxu1 %vm203_vm0, %v8625_v44  ;;  %7022 = vmatmul.mubr.msk.f32.gmra.mxu0 %vm203_vm0, %v8615_v21  ;;  %3849 = vst.msk [vmem:[#allocation2 + $0x60] sm:$0xff] %vm203_vm0, %v3829_v54  ;;  %v3811_v45 = vadd.f32 %v3765_v62, %v9232_v39  ;;  %v3760_v49 = vadd.f32 %v8538_v57, %v3759_v9  ;;  %v4370_v4 = vld [vmem:[#allocation3 + $0x2d0] sm:$0xff]  ;;  %v9241_v55 = vld [vmem:[#allocation24_spill] sm:$0xff] }
 0x65c   :  { %v3828_v60 = vmul.f32 %v3808_v12, %v9231_v32  ;;  %v6946_v35 = vpop.f32.mrf.mxu0  ;;  %v8635_v19 = vld [vmem:[#allocation2 + $0x38] sm:$0xff]  ;;  %7051 = vmatprep.subr.mxu1 %v4372_v43 }
 0x65d   :  { %v8637_v58 = vld [vmem:[#allocation2 + $0x34] sm:$0xff]  ;;  %v8639_v18 = vld [vmem:[#allocation2 + $0x3c] sm:$0xff]  ;;  %v3831_v59 = vmul.f32 %v3811_v45, %v9233_v13  ;;  %v3810_v8 = vadd.f32 %v3760_v49, %v9234_v29  ;;  %v3775_v40 = vadd.f32 %v6946_v35, %v8538_v57  ;;  %6978 = vmatprep.mubr.msk.f32.mxu1 %vm203_vm0, %v8635_v19  ;;  %7052 = vmatpush3.msra.mxu1 %v4372_v43 }
 0x65e   :  { %3848 = vst.msk [vmem:[#allocation2 + $0x58] sm:$0xff] %vm203_vm0, %v3828_v60  ;;  %7024 = vmatprep.mubr.msk.f32.mxu0 %vm203_vm0, %v8637_v58  ;;  %v3769_v5 = vpop.f32.mrf.mxu0  ;;  %7053 = vmatprep.subr.mxu1 %v4371_v52  ;;  %v8673_v46 = vld [vmem:[#allocation2 + $0x50] sm:$0xff]  ;;  %v9244_v45 = vld [vmem:[#allocation27_spill] sm:$0xff]  ;;  %v9245_v35 = vld [vmem:[#allocation34_spill] sm:$0xff] }
 0x65f   :  { %6979 = vmatmul.mubr.msk.f32.gmra.mxu1 %vm203_vm0, %v8649_v37  ;;  %7025 = vmatmul.mubr.msk.f32.gmra.mxu0 %vm203_vm0, %v8639_v18  ;;  %3851 = vst.msk [vmem:[#allocation2 + $0x70] sm:$0xff] %vm203_vm0, %v3831_v59  ;;  %v3830_v53 = vmul.f32 %v3810_v8, %v9235_v6  ;;  %v3813_v26 = vadd.f32 %v3775_v40, %v9236_v15  ;;  %9240 = vst [vmem:[#allocation26_spill] sm:$0xff] %v8673_v46  ;;  %v4369_v40 = vld [vmem:[#allocation3 + $0x2c8] sm:$0xff]  ;;  %v9248_v15 = vld [vmem:[#allocation35_spill] sm:$0xff] }
 0x660   :  { %v3770_v11 = vadd.f32 %v8538_v57, %v3769_v5  ;;  %v6949_v0 = vpop.f32.mrf.mxu0  ;;  %v8659_v27 = vld [vmem:[#allocation2 + $0x48] sm:$0xff]  ;;  %7054 = vmatpush3.msra.mxu1 %v4371_v52  ;;  %v9247_v5 = vld [vmem:[#allocation14_spill] sm:$0xff] }
 0x661   :  { %9237 = vst [vmem:[#allocation25_spill] sm:$0xff] %v8659_v27  ;;  %v8661_v31 = vld [vmem:[#allocation2 + $0x44] sm:$0xff]  ;;  %v8663_v24 = vld [vmem:[#allocation2 + $0x4c] sm:$0xff]  ;;  %3850 = vst.msk [vmem:[#allocation2 + $0x68] sm:$0xff] %vm203_vm0, %v3830_v53  ;;  %v3833_v33 = vmul.f32 %v3813_v26, %v9238_v34  ;;  %v3785_v42 = vadd.f32 %v6949_v0, %v8538_v57  ;;  %6981 = vmatprep.mubr.msk.f32.mxu1 %vm203_vm0, %v8659_v27  ;;  %7055 = vmatprep.subr.mxu1 %v4370_v4 }
 0x662   :  { %v3812_v38 = vadd.f32 %v3770_v11, %v9239_v14  ;;  %7027 = vmatprep.mubr.msk.f32.mxu0 %vm203_vm0, %v8661_v31  ;;  %v3779_v50 = vpop.f32.mrf.mxu0  ;;  %v8697_v8 = vld [vmem:[#allocation2 + $0x60] sm:$0xff]  ;;  %7056 = vmatpush3.msra.mxu1 %v4370_v4  ;;  %v9253_v4 = vld [vmem:[#allocation30_spill] sm:$0xff] }
 0x663   :  { %6982 = vmatmul.mubr.msk.f32.gmra.mxu1 %vm203_vm0, %v8673_v46  ;;  %7028 = vmatmul.mubr.msk.f32.gmra.mxu0 %vm203_vm0, %v8663_v24  ;;  %3853 = vst.msk [vmem:[#allocation2 + $0x80] sm:$0xff] %vm203_vm0, %v3833_v33  ;;  %v3815_v12 = vadd.f32 %v3785_v42, %v9242_v10  ;;  %v3780_v62 = vadd.f32 %v8538_v57, %v3779_v50  ;;  %9246 = vst [vmem:[#allocation13_spill] sm:$0xff] %v8697_v8  ;;  %v9251_v50 = vld [vmem:[#allocation36_spill] sm:$0xff] }
 0x664   :  { %v3832_v54 = vmul.f32 %v3812_v38, %v9241_v55  ;;  %v6952_v43 = vpop.f32.mrf.mxu0  ;;  %7057 = vmatprep.subr.mxu1 %v4369_v40  ;;  %v9250_v38 = vld [vmem:[#allocation16_spill] sm:$0xff] }
 0x665   :  { %v8683_v9 = vld [vmem:[#allocation2 + $0x58] sm:$0xff]  ;;  %v3835_v49 = vmul.f32 %v3815_v12, %v9244_v45  ;;  %v3814_v59 = vadd.f32 %v3780_v62, %v9245_v35  ;;  %v3795_v29 = vadd.f32 %v6952_v43, %v8538_v57  ;;  %7058 = vmatpush3.msra.mxu1 %v4369_v40 }
 0x666   :  { %9243 = vst [vmem:[#allocation28_spill] sm:$0xff] %v8683_v9  ;;  %v8685_v60 = vld [vmem:[#allocation2 + $0x54] sm:$0xff]  ;;  %v8687_v39 = vld [vmem:[#allocation2 + $0x5c] sm:$0xff]  ;;  %3852 = vst.msk [vmem:[#allocation2 + $0x78] sm:$0xff] %vm203_vm0, %v3832_v54  ;;  %6984 = vmatprep.mubr.msk.f32.mxu1 %vm203_vm0, %v8683_v9  ;;  %v3789_v52 = vpop.f32.mrf.mxu0 }
 0x667   :  { %7030 = vmatprep.mubr.msk.f32.mxu0 %vm203_vm0, %v8685_v60  ;;  %6985 = vmatmul.mubr.msk.f32.gmra.mxu1 %vm203_vm0, %v8697_v8  ;;  %3855 = vst.msk [vmem:[#allocation2 + $0x90] sm:$0xff] %vm203_vm0, %v3835_v49  ;;  %v3834_v53 = vmul.f32 %v3814_v59, %v9247_v5  ;;  %v3817_v26 = vadd.f32 %v3795_v29, %v9248_v15  ;;  %v8715_v10 = vld [vmem:[#allocation2 + $0x70] sm:$0xff] }
 0x668   :  { %7031 = vmatmul.mubr.msk.f32.gmra.mxu0 %vm203_vm0, %v8687_v39  ;;  %v3790_v11 = vadd.f32 %v8538_v57, %v3789_v52  ;;  %v8707_v0 = vld [vmem:[#allocation2 + $0x68] sm:$0xff]  ;;  %9252 = vst [vmem:[#allocation15_spill] sm:$0xff] %v8715_v10  ;;  %v4368_v57 = vld [vmem:[#allocation3 + $0x2c0] sm:$0xff] }
 0x669   :  { %9249 = vst [vmem:[#allocation29_spill] sm:$0xff] %v8707_v0  ;;  %v3890_v33 = vld [vmem:[#allocation2 + $0x64] sm:$0xff]  ;;  %v3891_v14 = vld [vmem:[#allocation2 + $0x6c] sm:$0xff]  ;;  %3854 = vst.msk [vmem:[#allocation2 + $0x88] sm:$0xff] %vm203_vm0, %v3834_v53  ;;  %v3837_v42 = vmul.f32 %v3817_v26, %v9250_v38  ;;  %6987 = vmatprep.mubr.msk.f32.mxu1 %vm203_vm0, %v8707_v0  ;;  %7059 = vmatprep.subr.mxu1 %v4368_v57 }
 0x66a   :  { %v3816_v54 = vadd.f32 %v3790_v11, %v9251_v50  ;;  %7033 = vmatprep.mubr.msk.f32.mxu0 %vm203_vm0, %v3890_v33  ;;  %v8728_v35 = vld [vmem:[#allocation2 + $0x80] sm:$0xff]  ;;  %7060 = vmatpush3.msra.mxu1 %v4368_v57 }
 0x66b   :  { %6988 = vmatmul.mubr.msk.f32.gmra.mxu1 %vm203_vm0, %v8715_v10  ;;  %3857 = vst.msk [vmem:[#allocation2 + $0xa0] sm:$0xff] %vm203_vm0, %v3837_v42  ;;  %9255 = vst [vmem:[#allocation32_spill] sm:$0xff] %v8728_v35  ;;  %v4937_v42 = vld [vmem:[#allocation6 + $0x18] sm:$0xff] }
 0x66c   :  { %7034 = vmatmul.mubr.msk.f32.gmra.mxu0 %vm203_vm0, %v3891_v14  ;;  %v3836_v12 = vmul.f32 %v3816_v54, %v9253_v4 }
 0x66d   :  { %v8722_v62 = vld [vmem:[#allocation2 + $0x78] sm:$0xff] }
 0x66e   :  { %9254 = vst [vmem:[#allocation31_spill] sm:$0xff] %v8722_v62  ;;  %v3892_v43 = vld [vmem:[#allocation2 + $0x74] sm:$0xff]  ;;  %v3893_v49 = vld [vmem:[#allocation2 + $0x7c] sm:$0xff]  ;;  %3856 = vst.msk [vmem:[#allocation2 + $0x98] sm:$0xff] %vm203_vm0, %v3836_v12  ;;  %6990 = vmatprep.mubr.msk.f32.mxu1 %vm203_vm0, %v8722_v62 }
 0x66f   :  { %7036 = vmatprep.mubr.msk.f32.mxu0 %vm203_vm0, %v3892_v43  ;;  %6991 = vmatmul.mubr.msk.f32.gmra.mxu1 %vm203_vm0, %v8728_v35  ;;  %v8738_v52 = vld [vmem:[#allocation2 + $0x90] sm:$0xff]  ;;  %v8833_v35 = vld [vmem:[%s9084_s5 + $0x3] ss:$0 sm:$0xff] }
 0x670   :  { %7037 = vmatmul.mubr.msk.f32.gmra.mxu0 %vm203_vm0, %v3893_v49  ;;  %v8733_v59 = vld [vmem:[#allocation2 + $0x88] sm:$0xff]  ;;  %9257 = vst [vmem:[#allocation34_spill] sm:$0xff] %v8738_v52 }
 0x671   :  { %9256 = vst [vmem:[#allocation33_spill] sm:$0xff] %v8733_v59  ;;  %v3894_v29 = vld [vmem:[#allocation2 + $0x84] sm:$0xff]  ;;  %v3895_v40 = vld [vmem:[#allocation2 + $0x8c] sm:$0xff]  ;;  %6993 = vmatprep.mubr.msk.f32.mxu1 %vm203_vm0, %v8733_v59 }
 0x672   :  { %7039 = vmatprep.mubr.msk.f32.mxu0 %vm203_vm0, %v3894_v29  ;;  %v8748_v11 = vld [vmem:[#allocation2 + $0xa0] sm:$0xff] }
 0x673   :  { %6994 = vmatmul.mubr.msk.f32.gmra.mxu1 %vm203_vm0, %v8738_v52  ;;  %9259 = vst [vmem:[#allocation36_spill] sm:$0xff] %v8748_v11 }
 0x674   :  { %7040 = vmatmul.mubr.msk.f32.gmra.mxu0 %vm203_vm0, %v3895_v40 }
 0x675   :  { %v8743_v53 = vld [vmem:[#allocation2 + $0x98] sm:$0xff] }
 0x676   :  { %9258 = vst [vmem:[#allocation35_spill] sm:$0xff] %v8743_v53  ;;  %v3896_v15 = vld [vmem:[#allocation2 + $0x94] sm:$0xff]  ;;  %v3897_v26 = vld [vmem:[#allocation2 + $0x9c] sm:$0xff]  ;;  %6996 = vmatprep.mubr.msk.f32.mxu1 %vm203_vm0, %v8743_v53 }
 0x677   :  { %7042 = vmatprep.mubr.msk.f32.mxu0 %vm203_vm0, %v3896_v15  ;;  %6997 = vmatmul.mubr.msk.f32.gmra.mxu1 %vm203_vm0, %v8748_v11 }
 0x678   :  { %7043 = vmatmul.mubr.msk.f32.gmra.mxu0 %vm203_vm0, %v3897_v26  ;;  %7061 = vmatprep.mubr.msk.f32.mxu1 %vm203_vm0, %v8568_v47  ;;  %v5780_v47 = vld [vmem:[%s9085_s6 + $0xf8] sm:$0xff] }
 0x679   :  { %7091 = vmatprep.subr.mxu0 %v5780_v47 }
 0x67a   :  { %7092 = vmatpush3.msra.mxu0 %v5780_v47 }
 0x67b   :  { %7062 = vmatmul.mubr.msk.f32.vlgmr.msra.gmra.mxu1 %vm203_vm0, %v8589_v48  ;;  %v3898_v48 = vld [vmem:[#allocation2 + $0xa4] sm:$0xff] }
 0x67c   :  { %7064 = vmatprep.mubr.msk.f32.mxu1 %vm203_vm0, %v8591_v56  ;;  %v5779_v56 = vld [vmem:[%s9085_s6 + $0xf0] sm:$0xff] }
 0x67d   :  { %7093 = vmatprep.subr.mxu0 %v5779_v56 }
 0x67e   :  { %7094 = vmatpush3.msra.mxu0 %v5779_v56 }
 0x67f   :  { %7065 = vmatmul.mubr.msk.f32.gmra.mxu1 %vm203_vm0, %v8613_v17  ;;  %v5778_v17 = vld [vmem:[%s9085_s6 + $0xe8] sm:$0xff] }
 0x680   :  { %7067 = vmatprep.mubr.msk.f32.mxu1 %vm203_vm0, %v8615_v21  ;;  %7095 = vmatprep.subr.mxu0 %v5778_v17  ;;  %v5777_v21 = vld [vmem:[%s9085_s6 + $0xe0] sm:$0xff] }
 0x681   :  { %7096 = vmatpush3.msra.mxu0 %v5778_v17 }
 0x682   :  { %7097 = vmatprep.subr.mxu0 %v5777_v21 }
 0x683   :  { %7068 = vmatmul.mubr.msk.f32.gmra.mxu1 %vm203_vm0, %v8637_v58  ;;  %7098 = vmatpush3.msra.mxu0 %v5777_v21  ;;  %v5776_v58 = vld [vmem:[%s9085_s6 + $0xd8] sm:$0xff] }
 0x684   :  { %7070 = vmatprep.mubr.msk.f32.mxu1 %vm203_vm0, %v8639_v18  ;;  %7099 = vmatprep.subr.mxu0 %v5776_v58  ;;  %v5775_v18 = vld [vmem:[%s9085_s6 + $0xd0] sm:$0xff] }
 0x685   :  { %7100 = vmatpush3.msra.mxu0 %v5776_v58 }
 0x686   :  { %7101 = vmatprep.subr.mxu0 %v5775_v18 }
 0x687   :  { %7071 = vmatmul.mubr.msk.f32.gmra.mxu1 %vm203_vm0, %v8661_v31  ;;  %7102 = vmatpush3.msra.mxu0 %v5775_v18  ;;  %v5774_v31 = vld [vmem:[%s9085_s6 + $0xc8] sm:$0xff] }
 0x688   :  { %7073 = vmatprep.mubr.msk.f32.mxu1 %vm203_vm0, %v8663_v24  ;;  %7103 = vmatprep.subr.mxu0 %v5774_v31  ;;  %v5773_v24 = vld [vmem:[%s9085_s6 + $0xc0] sm:$0xff] }
 0x689   :  { %7104 = vmatpush3.msra.mxu0 %v5774_v31 }
 0x68a   :  { %7105 = vmatprep.subr.mxu0 %v5773_v24 }
 0x68b   :  { %7074 = vmatmul.mubr.msk.f32.gmra.mxu1 %vm203_vm0, %v8685_v60  ;;  %7106 = vmatpush3.msra.mxu0 %v5773_v24  ;;  %v4941_v60 = vld [vmem:[#allocation6 + $0x38] sm:$0xff] }
 0x68c   :  { %7076 = vmatprep.mubr.msk.f32.mxu1 %vm203_vm0, %v8687_v39  ;;  %v4940_v39 = vld [vmem:[#allocation6 + $0x30] sm:$0xff]  ;;  %7137 = vmatprep.subr.mxu1 %v4941_v60 }
 0x68d   :  { %7138 = vmatpush3.msra.mxu1 %v4941_v60 }
 0x68e   :  { %7139 = vmatprep.subr.mxu1 %v4940_v39 }
 0x68f   :  { %7077 = vmatmul.mubr.msk.f32.gmra.mxu1 %vm203_vm0, %v3890_v33  ;;  %v4939_v33 = vld [vmem:[#allocation6 + $0x28] sm:$0xff] }
 0x690   :  { %7079 = vmatprep.mubr.msk.f32.mxu1 %vm203_vm0, %v3891_v14  ;;  %7140 = vmatpush3.msra.mxu1 %v4940_v39  ;;  %v4938_v14 = vld [vmem:[#allocation6 + $0x20] sm:$0xff] }
 0x691   :  { %7141 = vmatprep.subr.mxu1 %v4939_v33 }
 0x692   :  { %7142 = vmatpush3.msra.mxu1 %v4939_v33 }
 0x693   :  { %7080 = vmatmul.mubr.msk.f32.gmra.mxu1 %vm203_vm0, %v3892_v43  ;;  %7143 = vmatprep.subr.mxu1 %v4938_v14 }
 0x694   :  { %7082 = vmatprep.mubr.msk.f32.mxu1 %vm203_vm0, %v3893_v49  ;;  %7144 = vmatpush3.msra.mxu1 %v4938_v14 }
 0x695   :  { %7145 = vmatprep.subr.mxu1 %v4937_v42 }
 0x696   :  { %7146 = vmatpush3.msra.mxu1 %v4937_v42 }
 0x697   :  { %7083 = vmatmul.mubr.msk.f32.gmra.mxu1 %vm203_vm0, %v3894_v29 }
 0x698   :  { %7085 = vmatprep.mubr.msk.f32.mxu1 %vm203_vm0, %v3895_v40 }
 0x69b   :  { %7086 = vmatmul.mubr.msk.f32.gmra.mxu1 %vm203_vm0, %v3896_v15 }
 0x69c   :  { %7088 = vmatprep.mubr.msk.f32.mxu1 %vm203_vm0, %v3897_v26 }
 0x69f   :  { %7089 = vmatmul.mubr.msk.f32.gmra.mxu1 %vm203_vm0, %v3898_v48 }
 0x712   :  { %v6971_v50 = vpop.f32.mrf.mxu1 }
 0x713   :  { %v7017_v54 = vpop.f32.mrf.mxu0 }
 0x714   :  { %v4043_v57 = vpop.f32.mrf.mxu1  ;;  %v4274_v52 = vadd.f32 %v7017_v54, %v6971_v50 }
 0x715   :  { %v4268_v12 = vpop.f32.mrf.mxu0 }
 0x716   :  { %v4269_v62 = vadd.f32 %v4268_v12, %v4043_v57 }
 0x717   :  { %v6974_v43 = vpop.f32.mrf.mxu1  ;;  %v7020_v49 = vpop.f32.mrf.mxu0 }
 0x718   :  { %v4284_v13 = vadd.f32 %v7020_v49, %v6974_v43 }
 0x719   :  { %v4053_v29 = vpop.f32.mrf.mxu1  ;;  %v4278_v15 = vpop.f32.mrf.mxu0 }
 0x71a   :  { %v4279_v51 = vadd.f32 %v4278_v15, %v4053_v29 }
 0x71b   :  { %v6977_v40 = vpop.f32.mrf.mxu1  ;;  %v7023_v48 = vpop.f32.mrf.mxu0 }
 0x71c   :  { %v4294_v57 = vadd.f32 %v7023_v48, %v6977_v40 }
 0x71d   :  { %v4063_v26 = vpop.f32.mrf.mxu1  ;;  %v4288_v21 = vpop.f32.mrf.mxu0 }
 0x71e   :  { %v4289_v46 = vadd.f32 %v4288_v21, %v4063_v26 }
 0x71f   :  { %v6980_v47 = vpop.f32.mrf.mxu1  ;;  %v7026_v31 = vpop.f32.mrf.mxu0 }
 0x721   :  { %v4073_v56 = vpop.f32.mrf.mxu1  ;;  %v4298_v39 = vpop.f32.mrf.mxu0 }
 0x723   :  { %v6983_v17 = vpop.f32.mrf.mxu1  ;;  %v7029_v42 = vpop.f32.mrf.mxu0 }
 0x724   :  { %v4314_v15 = vadd.f32 %v7029_v42, %v6983_v17 }
 0x725   :  { %v8808_v58 = vpop.f32.mrf.mxu1  ;;  %v4308_v38 = vpop.f32.mrf.mxu0 }
 0x726   :  { %v4309_v21 = vadd.f32 %v4308_v38, %v8808_v58 }
 0x727   :  { %v8810_v18 = vpop.f32.mrf.mxu1 }
 0x728   :  { %v7032_v59 = vpop.f32.mrf.mxu0 }
 0x729   :  { %v8812_v24 = vpop.f32.mrf.mxu1 }
 0x72a   :  { %v4318_v6 = vpop.f32.mrf.mxu0 }
 0x72b   :  { %v8814_v60 = vpop.f32.mrf.mxu1 }
 0x72c   :  { %v7035_v50 = vpop.f32.mrf.mxu0 }
 0x72d   :  { %v8816_v33 = vpop.f32.mrf.mxu1 }
 0x72f   :  { %v8818_v14 = vpop.f32.mrf.mxu1 }
 0x731   :  { %v8820_v4 = vpop.f32.mrf.mxu1 }
 0x733   :  { %v8822_v53 = vpop.f32.mrf.mxu1 }
 0x735   :  { %v8824_v11 = vpop.f32.mrf.mxu1 }
 0x737   :  { %v8826_v5 = vpop.f32.mrf.mxu1 }
 0x739   :  { %v8828_v45 = vpop.f32.mrf.mxu1 }
 0x73b   :  { %v7063_v55 = vpop.f32.mrf.mxu1 }
 0x73c   :  { %v4545_v34 = vadd.f32 %v7063_v55, %v4274_v52 }
 0x73d   :  { %v4445_v0 = vpop.f32.mrf.mxu1 }
 0x73e   :  { %v4544_v10 = vadd.f32 %v4445_v0, %v4269_v62  ;;  %v4573_v32 = vadd.f32 %v8833_v35, %v4545_v34  ;;  %v4328_v34 = vpop.f32.mrf.mxu0 }
 0x73f   :  { %v7066_v9 = vpop.f32.mrf.mxu1 }
 0x740   :  { %v4572_v8 = vadd.f32 %v8833_v35, %v4544_v10  ;;  %v4547_v30 = vadd.f32 %v7066_v9, %v4284_v13  ;;  %v4593_v12 = vmax.f32 %v4573_v32, 0.0  ;;  %v4304_v13 = vadd.f32 %v7026_v31, %v6980_v47 }
 0x741   :  { %v4455_v54 = vpop.f32.mrf.mxu1 }
 0x742   :  { %v4592_v55 = vmax.f32 %v4572_v8, 0.0  ;;  %v4546_v52 = vadd.f32 %v4455_v54, %v4279_v51  ;;  %v4575_v27 = vadd.f32 %v8833_v35, %v4547_v30  ;;  %v4299_v8 = vadd.f32 %v4298_v39, %v4073_v56 }
 0x743   :  { %v7069_v25 = vpop.f32.mrf.mxu1 }
 0x744   :  { %v4574_v43 = vadd.f32 %v8833_v35, %v4546_v52  ;;  %v4549_v0 = vadd.f32 %v7069_v25, %v4294_v57  ;;  %7107 = vmatprep.mubr.msk.f32.mxu0 %vm203_vm0, %v4592_v55  ;;  %v4595_v49 = vmax.f32 %v4575_v27, 0.0  ;;  %v7038_v25 = vpop.f32.mrf.mxu0  ;;  %v4324_v57 = vadd.f32 %v7032_v59, %v8810_v18 }
 0x745   :  { %v4465_v62 = vpop.f32.mrf.mxu1  ;;  %7108 = vmatmul.mubr.msk.f32.vlgmr.msra.gmra.mxu0 %vm203_vm0, %v4593_v12 }
 0x746   :  { %v4594_v9 = vmax.f32 %v4574_v43, 0.0  ;;  %v4548_v10 = vadd.f32 %v4465_v62, %v4289_v46  ;;  %v4577_v51 = vadd.f32 %v8833_v35, %v4549_v0  ;;  %v4338_v39 = vpop.f32.mrf.mxu0  ;;  %v4319_v43 = vadd.f32 %v4318_v6, %v8812_v24 }
 0x747   :  { %v7072_v32 = vpop.f32.mrf.mxu1 }
 0x748   :  { %v4576_v30 = vadd.f32 %v8833_v35, %v4548_v10  ;;  %v4551_v29 = vadd.f32 %v7072_v32, %v4304_v13  ;;  %7110 = vmatprep.mubr.msk.f32.mxu0 %vm203_vm0, %v4594_v9  ;;  %v4597_v47 = vmax.f32 %v4577_v51, 0.0  ;;  %v7041_v0 = vpop.f32.mrf.mxu0  ;;  %v4334_v13 = vadd.f32 %v7035_v50, %v8814_v60 }
 0x749   :  { %v4475_v40 = vpop.f32.mrf.mxu1  ;;  %7111 = vmatmul.mubr.msk.f32.gmra.mxu0 %vm203_vm0, %v4595_v49  ;;  %v4329_v51 = vadd.f32 %v4328_v34, %v8816_v33 }
 0x74a   :  { %v4596_v26 = vmax.f32 %v4576_v30, 0.0  ;;  %v4550_v48 = vadd.f32 %v4475_v40, %v4299_v8  ;;  %v4579_v46 = vadd.f32 %v8833_v35, %v4551_v29  ;;  %v4348_v32 = vpop.f32.mrf.mxu0  ;;  %v4344_v30 = vadd.f32 %v7038_v25, %v8818_v14 }
 0x74b   :  { %v7075_v27 = vpop.f32.mrf.mxu1 }
 0x74c   :  { %v4578_v56 = vadd.f32 %v8833_v35, %v4550_v48  ;;  %v4553_v31 = vadd.f32 %v7075_v27, %v4314_v15  ;;  %7113 = vmatprep.mubr.msk.f32.mxu0 %vm203_vm0, %v4596_v26  ;;  %v4599_v55 = vmax.f32 %v4579_v46, 0.0  ;;  %v4339_v26 = vadd.f32 %v4338_v39, %v8820_v4  ;;  %v7044_v48 = vpop.f32.mrf.mxu0 }
 0x74d   :  { %v4485_v54 = vpop.f32.mrf.mxu1  ;;  %7114 = vmatmul.mubr.msk.f32.gmra.mxu0 %vm203_vm0, %v4597_v47  ;;  %v4354_v46 = vadd.f32 %v7041_v0, %v8822_v53 }
 0x74e   :  { %v4598_v17 = vmax.f32 %v4578_v56, 0.0  ;;  %v4552_v42 = vadd.f32 %v4485_v54, %v4309_v21  ;;  %v4581_v52 = vadd.f32 %v8833_v35, %v4553_v31  ;;  %v4349_v31 = vadd.f32 %v4348_v32, %v8824_v11  ;;  %v4358_v54 = vpop.f32.mrf.mxu0  ;;  %v5205_v32 = vld [vmem:[#allocation8 + $0x58] sm:$0xff] }
 0x74f   :  { %v7078_v12 = vpop.f32.mrf.mxu1 }
 0x750   :  { %v4580_v38 = vadd.f32 %v8833_v35, %v4552_v42  ;;  %v4555_v58 = vadd.f32 %v7078_v12, %v4324_v57  ;;  %7116 = vmatprep.mubr.msk.f32.mxu0 %vm203_vm0, %v4598_v17  ;;  %v4601_v9 = vmax.f32 %v4581_v52, 0.0  ;;  %v4364_v17 = vadd.f32 %v7044_v48, %v8826_v5 }
 0x751   :  { %v4495_v62 = vpop.f32.mrf.mxu1  ;;  %7117 = vmatmul.mubr.msk.f32.gmra.mxu0 %vm203_vm0, %v4599_v55 }
 0x752   :  { %v4600_v59 = vmax.f32 %v4580_v38, 0.0  ;;  %v4554_v18 = vadd.f32 %v4495_v62, %v4319_v43  ;;  %v4583_v10 = vadd.f32 %v8833_v35, %v4555_v58  ;;  %v4359_v43 = vadd.f32 %v4358_v54, %v8828_v45 }
 0x753   :  { %v7081_v49 = vpop.f32.mrf.mxu1 }
 0x754   :  { %v4582_v6 = vadd.f32 %v8833_v35, %v4554_v18  ;;  %v4557_v24 = vadd.f32 %v7081_v49, %v4334_v13  ;;  %7119 = vmatprep.mubr.msk.f32.mxu0 %vm203_vm0, %v4600_v59  ;;  %v4603_v29 = vmax.f32 %v4583_v10, 0.0  ;;  %v4935_v10 = vld [vmem:[#allocation6 + $0x8] sm:$0xff]  ;;  %v4934_v49 = vld [vmem:[#allocation6] sm:$0xff] }
 0x755   :  { %v4505_v8 = vpop.f32.mrf.mxu1  ;;  %7120 = vmatmul.mubr.msk.f32.gmra.mxu0 %vm203_vm0, %v4601_v9  ;;  %v4936_v9 = vld [vmem:[#allocation6 + $0x10] sm:$0xff] }
 0x756   :  { %v4602_v60 = vmax.f32 %v4582_v6, 0.0  ;;  %v4556_v50 = vadd.f32 %v4505_v8, %v4329_v51  ;;  %v4585_v40 = vadd.f32 %v8833_v35, %v4557_v24  ;;  %7147 = vmatprep.subr.mxu1 %v4936_v9  ;;  %v5208_v51 = vld [vmem:[#allocation8 + $0x70] sm:$0xff]  ;;  %v5207_v6 = vld [vmem:[#allocation8 + $0x68] sm:$0xff]  ;;  %v5206_v24 = vld [vmem:[#allocation8 + $0x60] sm:$0xff] }
 0x757   :  { %v7084_v15 = vpop.f32.mrf.mxu1  ;;  %7148 = vmatpush3.msra.mxu1 %v4936_v9  ;;  %v5204_v8 = vld [vmem:[#allocation8 + $0x50] sm:$0xff] }
 0x758   :  { %v4584_v33 = vadd.f32 %v8833_v35, %v4556_v50  ;;  %v4559_v34 = vadd.f32 %v7084_v15, %v4344_v30  ;;  %7122 = vmatprep.mubr.msk.f32.mxu0 %vm203_vm0, %v4602_v60  ;;  %v4605_v27 = vmax.f32 %v4585_v40, 0.0  ;;  %7149 = vmatprep.subr.mxu1 %v4935_v10  ;;  %v5203_v30 = vld [vmem:[#allocation8 + $0x48] sm:$0xff]  ;;  %v5202_v60 = vld [vmem:[#allocation8 + $0x40] sm:$0xff]  ;;  %v5201_v50 = vld [vmem:[#allocation8 + $0x38] sm:$0xff] }
 0x759   :  { %v4515_v47 = vpop.f32.mrf.mxu1  ;;  %7123 = vmatmul.mubr.msk.f32.gmra.mxu0 %vm203_vm0, %v4603_v29  ;;  %7150 = vmatpush3.msra.mxu1 %v4935_v10  ;;  %v5200_v29 = vld [vmem:[#allocation8 + $0x30] sm:$0xff]  ;;  %v5199_v40 = vld [vmem:[#allocation8 + $0x28] sm:$0xff]  ;;  %v5198_v15 = vld [vmem:[#allocation8 + $0x20] sm:$0xff] }
 0x75a   :  { %v4604_v14 = vmax.f32 %v4584_v33, 0.0  ;;  %v4558_v25 = vadd.f32 %v4515_v47, %v4339_v26  ;;  %v4587_v21 = vadd.f32 %v8833_v35, %v4559_v34  ;;  %7151 = vmatprep.subr.mxu1 %v4934_v49  ;;  %v5197_v26 = vld [vmem:[#allocation8 + $0x18] sm:$0xff]  ;;  %v8889_v33 = vld [vmem:[%s9086_s7 + $0x3] ss:$0 sm:$0xff] }
 0x75b   :  { %v7087_v56 = vpop.f32.mrf.mxu1  ;;  %7152 = vmatpush3.msra.mxu1 %v4934_v49 }
 0x75c   :  { %v4586_v4 = vadd.f32 %v8833_v35, %v4558_v25  ;;  %v4561_v39 = vadd.f32 %v7087_v56, %v4354_v46  ;;  %7125 = vmatprep.mubr.msk.f32.mxu0 %vm203_vm0, %v4604_v14  ;;  %v4607_v55 = vmax.f32 %v4587_v21, 0.0 }
 0x75d   :  { %v4525_v57 = vpop.f32.mrf.mxu1  ;;  %7126 = vmatmul.mubr.msk.f32.gmra.mxu0 %vm203_vm0, %v4605_v27 }
 0x75e   :  { %v4606_v53 = vmax.f32 %v4586_v4, 0.0  ;;  %v4560_v42 = vadd.f32 %v4525_v57, %v4349_v31  ;;  %v4589_v52 = vadd.f32 %v8833_v35, %v4561_v39 }
 0x75f   :  { %v7090_v12 = vpop.f32.mrf.mxu1 }
 0x760   :  { %v4588_v11 = vadd.f32 %v8833_v35, %v4560_v42  ;;  %v4563_v38 = vadd.f32 %v7090_v12, %v4364_v17  ;;  %7128 = vmatprep.mubr.msk.f32.mxu0 %vm203_vm0, %v4606_v53  ;;  %v4609_v13 = vmax.f32 %v4589_v52, 0.0 }
 0x761   :  { %v4535_v58 = vpop.f32.mrf.mxu1  ;;  %7129 = vmatmul.mubr.msk.f32.gmra.mxu0 %vm203_vm0, %v4607_v55 }
 0x762   :  { %v4608_v0 = vmax.f32 %v4588_v11, 0.0  ;;  %v4562_v62 = vadd.f32 %v4535_v58, %v4359_v43  ;;  %v4591_v5 = vadd.f32 %v8833_v35, %v4563_v38 }
 0x764   :  { %v4590_v59 = vadd.f32 %v8833_v35, %v4562_v62  ;;  %7131 = vmatprep.mubr.msk.f32.mxu0 %vm203_vm0, %v4608_v0  ;;  %v4611_v18 = vmax.f32 %v4591_v5, 0.0  ;;  %v5209_v35 = vld [vmem:[#allocation8 + $0x78] sm:$0xff] }
 0x765   :  { %7132 = vmatmul.mubr.msk.f32.gmra.mxu0 %vm203_vm0, %v4609_v13  ;;  %7183 = vmatprep.subr.mxu0 %v5209_v35 }
 0x766   :  { %v4610_v45 = vmax.f32 %v4590_v59, 0.0  ;;  %7184 = vmatpush3.msra.mxu0 %v5209_v35 }
 0x767   :  { %7185 = vmatprep.subr.mxu0 %v5208_v51 }
 0x768   :  { %7134 = vmatprep.mubr.msk.f32.mxu0 %vm203_vm0, %v4610_v45  ;;  %7186 = vmatpush3.msra.mxu0 %v5208_v51 }
 0x769   :  { %7135 = vmatmul.mubr.msk.f32.gmra.mxu0 %vm203_vm0, %v4611_v18  ;;  %7187 = vmatprep.subr.mxu0 %v5207_v6  ;;  %v9260_v18 = vld [vmem:[#allocation26_spill] sm:$0xff] }
 0x76a   :  { %7188 = vmatpush3.msra.mxu0 %v5207_v6  ;;  %v9262_v6 = vld [vmem:[#allocation25_spill] sm:$0xff] }
 0x76b   :  { %7189 = vmatprep.subr.mxu0 %v5206_v24 }
 0x76c   :  { %7190 = vmatpush3.msra.mxu0 %v5206_v24 }
 0x76d   :  { %7191 = vmatprep.subr.mxu0 %v5205_v32 }
 0x76e   :  { %7192 = vmatpush3.msra.mxu0 %v5205_v32 }
 0x76f   :  { %7193 = vmatprep.subr.mxu0 %v5204_v8 }
 0x770   :  { %7194 = vmatpush3.msra.mxu0 %v5204_v8 }
 0x771   :  { %7195 = vmatprep.subr.mxu0 %v5203_v30 }
 0x772   :  { %7196 = vmatpush3.msra.mxu0 %v5203_v30 }
 0x773   :  { %7197 = vmatprep.subr.mxu0 %v5202_v60 }
 0x774   :  { %7198 = vmatpush3.msra.mxu0 %v5202_v60  ;;  %v9263_v60 = vld [vmem:[#allocation18_spill] sm:$0xff] }
 0x775   :  { %7199 = vmatprep.subr.mxu0 %v5201_v50 }
 0x776   :  { %7200 = vmatpush3.msra.mxu0 %v5201_v50 }
 0x777   :  { %7201 = vmatprep.subr.mxu0 %v5200_v29 }
 0x778   :  { %7202 = vmatpush3.msra.mxu0 %v5200_v29  ;;  %v9264_v29 = vld [vmem:[#allocation13_spill] sm:$0xff] }
 0x779   :  { %7203 = vmatprep.subr.mxu0 %v5199_v40 }
 0x77a   :  { %7204 = vmatpush3.msra.mxu0 %v5199_v40 }
 0x77b   :  { %7205 = vmatprep.subr.mxu0 %v5198_v15 }
 0x77c   :  { %7206 = vmatpush3.msra.mxu0 %v5198_v15 }
 0x77d   :  { %7207 = vmatprep.subr.mxu0 %v5197_v26 }
 0x77e   :  { %7208 = vmatpush3.msra.mxu0 %v5197_v26 }
 0x805   :  { %v7109_v34 = vpop.f32.mrf.mxu0 }
 0x806   :  { %v4761_v48 = vadd.f32 %v7109_v34, %v8889_v33 }
 0x807   :  { %v4755_v47 = vpop.f32.mrf.mxu0 }
 0x808   :  { %v4855_v46 = vadd.f32 %v4761_v48, %v8577_v41  ;;  %v4756_v14 = vadd.f32 %v8889_v33, %v4755_v47  ;;  %v9265_v48 = vld [vmem:[#allocation19_spill] sm:$0xff] }
 0x809   :  { %v7112_v25 = vpop.f32.mrf.mxu0 }
 0x80a   :  { %v4875_v27 = vmul.f32 %v4855_v46, %v7886_v2  ;;  %v4854_v21 = vadd.f32 %v4756_v14, %v8566_v22  ;;  %v4771_v56 = vadd.f32 %v7112_v25, %v8889_v33  ;;  %v9266_v46 = vld [vmem:[#allocation28_spill] sm:$0xff] }
 0x80b   :  { %v4765_v31 = vpop.f32.mrf.mxu0 }
 0x80c   :  { %4895 = vst.msk [vmem:[#allocation2 + $0x10] sm:$0xff] %vm203_vm0, %v4875_v27  ;;  %v4874_v4 = vmul.f32 %v4854_v21, %v7882_v23  ;;  %v4857_v39 = vadd.f32 %v4771_v56, %v8601_v61  ;;  %v4766_v54 = vadd.f32 %v8889_v33, %v4765_v31  ;;  %v9267_v56 = vld [vmem:[#allocation20_spill] sm:$0xff] }
 0x80d   :  { %v7115_v57 = vpop.f32.mrf.mxu0 }
 0x80e   :  { %4894 = vst.msk [vmem:[#allocation2 + $0x8] sm:$0xff] %vm203_vm0, %v4874_v4  ;;  %v4877_v41 = vmul.f32 %v4857_v39, %v7884_v1  ;;  %v4856_v17 = vadd.f32 %v4766_v54, %v8587_v20  ;;  %v4781_v22 = vadd.f32 %v7115_v57, %v8889_v33  ;;  %v9268_v4 = vld [vmem:[#allocation15_spill] sm:$0xff] }
 0x80f   :  { %v4775_v53 = vpop.f32.mrf.mxu0 }
 0x810   :  { %4897 = vst.msk [vmem:[#allocation2 + $0x20] sm:$0xff] %vm203_vm0, %v4877_v41  ;;  %v4876_v42 = vmul.f32 %v4856_v17, %v7880_v16  ;;  %v4859_v55 = vadd.f32 %v4781_v22, %v8625_v44  ;;  %v4776_v61 = vadd.f32 %v8889_v33, %v4775_v53  ;;  %v9269_v17 = vld [vmem:[#allocation21_spill] sm:$0xff] }
 0x811   :  { %v7118_v52 = vpop.f32.mrf.mxu0  ;;  %v9270_v53 = vld [vmem:[#allocation29_spill] sm:$0xff] }
 0x812   :  { %4896 = vst.msk [vmem:[#allocation2 + $0x18] sm:$0xff] %vm203_vm0, %v4876_v42  ;;  %v4879_v12 = vmul.f32 %v4859_v55, %v7888_v36  ;;  %v4858_v43 = vadd.f32 %v4776_v61, %v8611_v63  ;;  %v4791_v20 = vadd.f32 %v7118_v52, %v8889_v33 }
 0x813   :  { %v4785_v11 = vpop.f32.mrf.mxu0  ;;  %v4915_v59 = vld [vmem:[#allocation2 + $0x10] sm:$0xff] }
 0x814   :  { %4899 = vst.msk [vmem:[#allocation2 + $0x30] sm:$0xff] %vm203_vm0, %v4879_v12  ;;  %v4878_v38 = vmul.f32 %v4858_v43, %v7895_v3  ;;  %v4861_v58 = vadd.f32 %v4791_v20, %v8649_v37  ;;  %v4786_v44 = vadd.f32 %v8889_v33, %v4785_v11  ;;  %v9271_v12 = vld [vmem:[#allocation22_spill] sm:$0xff]  ;;  %v9272_v20 = vld [vmem:[#allocation32_spill] sm:$0xff] }
 0x815   :  { %v7121_v0 = vpop.f32.mrf.mxu0  ;;  %v4914_v62 = vld [vmem:[#allocation2 + $0x8] sm:$0xff] }
 0x816   :  { %4898 = vst.msk [vmem:[#allocation2 + $0x28] sm:$0xff] %vm203_vm0, %v4878_v38  ;;  %v4881_v13 = vmul.f32 %v4861_v58, %v7900_v28  ;;  %v4860_v5 = vadd.f32 %v4786_v44, %v8635_v19  ;;  %v4801_v63 = vadd.f32 %v7121_v0, %v8889_v33  ;;  %7153 = vmatprep.mubr.msk.f32.mxu1 %vm203_vm0, %v4914_v62  ;;  %v9261_v19 = vld [vmem:[#allocation17_spill] sm:$0xff]  ;;  %v9273_v0 = vld [vmem:[#allocation23_spill] sm:$0xff] }
 0x817   :  { %v4795_v45 = vpop.f32.mrf.mxu0  ;;  %7154 = vmatmul.mubr.msk.f32.vlgmr.msra.gmra.mxu1 %vm203_vm0, %v4915_v59  ;;  %v4917_v8 = vld [vmem:[#allocation2 + $0x20] sm:$0xff] }
 0x818   :  { %4901 = vst.msk [vmem:[#allocation2 + $0x40] sm:$0xff] %vm203_vm0, %v4881_v13  ;;  %v4880_v37 = vmul.f32 %v4860_v5, %v7905_v7  ;;  %v4863_v9 = vadd.f32 %v4801_v63, %v9260_v18  ;;  %v4796_v10 = vadd.f32 %v8889_v33, %v4795_v45  ;;  %v9274_v13 = vld [vmem:[#allocation31_spill] sm:$0xff] }
 0x819   :  { %v7124_v49 = vpop.f32.mrf.mxu0  ;;  %v4916_v35 = vld [vmem:[#allocation2 + $0x18] sm:$0xff] }
 0x81a   :  { %4900 = vst.msk [vmem:[#allocation2 + $0x38] sm:$0xff] %vm203_vm0, %v4880_v37  ;;  %v4883_v51 = vmul.f32 %v4863_v9, %v9261_v19  ;;  %v4862_v24 = vadd.f32 %v4796_v10, %v9262_v6  ;;  %v4811_v32 = vadd.f32 %v7124_v49, %v8889_v33  ;;  %7156 = vmatprep.mubr.msk.f32.mxu1 %vm203_vm0, %v4916_v35  ;;  %v9275_v37 = vld [vmem:[#allocation24_spill] sm:$0xff]  ;;  %v9276_v9 = vld [vmem:[#allocation34_spill] sm:$0xff]  ;;  %v9277_v6 = vld [vmem:[#allocation27_spill] sm:$0xff] }
 0x81b   :  { %v4805_v30 = vpop.f32.mrf.mxu0  ;;  %7157 = vmatmul.mubr.msk.f32.gmra.mxu1 %vm203_vm0, %v4917_v8  ;;  %v4919_v27 = vld [vmem:[#allocation2 + $0x30] sm:$0xff] }
 0x81c   :  { %4903 = vst.msk [vmem:[#allocation2 + $0x50] sm:$0xff] %vm203_vm0, %v4883_v51  ;;  %v4882_v50 = vmul.f32 %v4862_v24, %v9263_v60  ;;  %v4865_v40 = vadd.f32 %v4811_v32, %v9264_v29  ;;  %v4806_v15 = vadd.f32 %v8889_v33, %v4805_v30  ;;  %v9278_v32 = vld [vmem:[#allocation33_spill] sm:$0xff] }
 0x81d   :  { %v7127_v26 = vpop.f32.mrf.mxu0  ;;  %v4918_v34 = vld [vmem:[#allocation2 + $0x28] sm:$0xff] }
 0x81e   :  { %4902 = vst.msk [vmem:[#allocation2 + $0x48] sm:$0xff] %vm203_vm0, %v4882_v50  ;;  %v4885_v47 = vmul.f32 %v4865_v40, %v9265_v48  ;;  %v4864_v14 = vadd.f32 %v4806_v15, %v9266_v46  ;;  %v4821_v25 = vadd.f32 %v7127_v26, %v8889_v33  ;;  %7159 = vmatprep.mubr.msk.f32.mxu1 %vm203_vm0, %v4918_v34  ;;  %v9279_v40 = vld [vmem:[#allocation14_spill] sm:$0xff]  ;;  %v9280_v26 = vld [vmem:[#allocation36_spill] sm:$0xff] }
 0x81f   :  { %v4815_v21 = vpop.f32.mrf.mxu0  ;;  %7160 = vmatmul.mubr.msk.f32.gmra.mxu1 %vm203_vm0, %v4919_v27  ;;  %v4921_v61 = vld [vmem:[#allocation2 + $0x40] sm:$0xff] }
 0x820   :  { %4905 = vst.msk [vmem:[#allocation2 + $0x60] sm:$0xff] %vm203_vm0, %v4885_v47  ;;  %v4884_v31 = vmul.f32 %v4864_v14, %v9267_v56  ;;  %v4867_v39 = vadd.f32 %v4821_v25, %v9268_v4  ;;  %v4816_v54 = vadd.f32 %v8889_v33, %v4815_v21  ;;  %v9281_v14 = vld [vmem:[#allocation16_spill] sm:$0xff]  ;;  %v9282_v27 = vld [vmem:[#allocation35_spill] sm:$0xff]  ;;  %v9283_v4 = vld [vmem:[#allocation30_spill] sm:$0xff] }
 0x821   :  { %v7130_v57 = vpop.f32.mrf.mxu0  ;;  %v4920_v41 = vld [vmem:[#allocation2 + $0x38] sm:$0xff] }
 0x822   :  { %4904 = vst.msk [vmem:[#allocation2 + $0x58] sm:$0xff] %vm203_vm0, %v4884_v31  ;;  %v4887_v22 = vmul.f32 %v4867_v39, %v9269_v17  ;;  %v4866_v42 = vadd.f32 %v4816_v54, %v9270_v53  ;;  %v4831_v55 = vadd.f32 %v7130_v57, %v8889_v33  ;;  %7162 = vmatprep.mubr.msk.f32.mxu1 %vm203_vm0, %v4920_v41 }
 0x823   :  { %v4825_v52 = vpop.f32.mrf.mxu0  ;;  %7163 = vmatmul.mubr.msk.f32.gmra.mxu1 %vm203_vm0, %v4921_v61  ;;  %v4923_v59 = vld [vmem:[#allocation2 + $0x50] sm:$0xff] }
 0x824   :  { %4907 = vst.msk [vmem:[#allocation2 + $0x70] sm:$0xff] %vm203_vm0, %v4887_v22  ;;  %v4886_v43 = vmul.f32 %v4866_v42, %v9271_v12  ;;  %v4869_v11 = vadd.f32 %v4831_v55, %v9272_v20  ;;  %v4826_v38 = vadd.f32 %v8889_v33, %v4825_v52  ;;  %v5196_v42 = vld [vmem:[#allocation8 + $0x10] sm:$0xff]  ;;  %v5195_v55 = vld [vmem:[#allocation8 + $0x8] sm:$0xff]  ;;  %v5194_v61 = vld [vmem:[#allocation8] sm:$0xff] }
 0x825   :  { %v7133_v58 = vpop.f32.mrf.mxu0  ;;  %v4922_v44 = vld [vmem:[#allocation2 + $0x48] sm:$0xff]  ;;  %7209 = vmatprep.subr.mxu0 %v5196_v42  ;;  %v8994_v52 = vld [vmem:[%s9088_s9] ss:$0 sm:$0xff] }
 0x826   :  { %4906 = vst.msk [vmem:[#allocation2 + $0x68] sm:$0xff] %vm203_vm0, %v4886_v43  ;;  %v4889_v62 = vmul.f32 %v4869_v11, %v9273_v0  ;;  %v4868_v5 = vadd.f32 %v4826_v38, %v9274_v13  ;;  %v4841_v63 = vadd.f32 %v7133_v58, %v8889_v33  ;;  %7165 = vmatprep.mubr.msk.f32.mxu1 %vm203_vm0, %v4922_v44 }
 0x827   :  { %v4835_v45 = vpop.f32.mrf.mxu0  ;;  %7166 = vmatmul.mubr.msk.f32.gmra.mxu1 %vm203_vm0, %v4923_v59  ;;  %v4925_v50 = vld [vmem:[#allocation2 + $0x60] sm:$0xff]  ;;  %7210 = vmatpush3.msra.mxu0 %v5196_v42 }
 0x828   :  { %4909 = vst.msk [vmem:[#allocation2 + $0x80] sm:$0xff] %vm203_vm0, %v4889_v62  ;;  %v4888_v18 = vmul.f32 %v4868_v5, %v9275_v37  ;;  %v4871_v10 = vadd.f32 %v4841_v63, %v9276_v9  ;;  %v4836_v49 = vadd.f32 %v8889_v33, %v4835_v45  ;;  %7211 = vmatprep.subr.mxu0 %v5195_v55 }
 0x829   :  { %v7136_v35 = vpop.f32.mrf.mxu0  ;;  %v4924_v51 = vld [vmem:[#allocation2 + $0x58] sm:$0xff]  ;;  %7212 = vmatpush3.msra.mxu0 %v5195_v55 }
 0x82a   :  { %4908 = vst.msk [vmem:[#allocation2 + $0x78] sm:$0xff] %vm203_vm0, %v4888_v18  ;;  %v4891_v24 = vmul.f32 %v4871_v10, %v9277_v6  ;;  %v4870_v8 = vadd.f32 %v4836_v49, %v9278_v32  ;;  %v4851_v30 = vadd.f32 %v7136_v35, %v8889_v33  ;;  %7168 = vmatprep.mubr.msk.f32.mxu1 %vm203_vm0, %v4924_v51 }
 0x82b   :  { %v4845_v29 = vpop.f32.mrf.mxu0  ;;  %7169 = vmatmul.mubr.msk.f32.gmra.mxu1 %vm203_vm0, %v4925_v50  ;;  %v4927_v31 = vld [vmem:[#allocation2 + $0x70] sm:$0xff]  ;;  %7213 = vmatprep.subr.mxu0 %v5194_v61 }
 0x82c   :  { %4911 = vst.msk [vmem:[#allocation2 + $0x90] sm:$0xff] %vm203_vm0, %v4891_v24  ;;  %v4890_v15 = vmul.f32 %v4870_v8, %v9279_v40  ;;  %v4873_v34 = vadd.f32 %v4851_v30, %v9280_v26  ;;  %v4846_v47 = vadd.f32 %v8889_v33, %v4845_v29  ;;  %7214 = vmatpush3.msra.mxu0 %v5194_v61 }
 0x82d   :  { %v4926_v46 = vld [vmem:[#allocation2 + $0x68] sm:$0xff] }
 0x82e   :  { %4910 = vst.msk [vmem:[#allocation2 + $0x88] sm:$0xff] %vm203_vm0, %v4890_v15  ;;  %v4893_v25 = vmul.f32 %v4873_v34, %v9281_v14  ;;  %v4872_v21 = vadd.f32 %v4846_v47, %v9282_v27  ;;  %7171 = vmatprep.mubr.msk.f32.mxu1 %vm203_vm0, %v4926_v46 }
 0x82f   :  { %7172 = vmatmul.mubr.msk.f32.gmra.mxu1 %vm203_vm0, %v4927_v31  ;;  %v4929_v33 = vld [vmem:[#allocation2 + $0x80] sm:$0xff] }
 0x830   :  { %4913 = vst.msk [vmem:[#allocation2 + $0xa0] sm:$0xff] %vm203_vm0, %v4893_v25  ;;  %v4892_v39 = vmul.f32 %v4872_v21, %v9283_v4 }
 0x831   :  { %v4928_v54 = vld [vmem:[#allocation2 + $0x78] sm:$0xff] }
 0x832   :  { %4912 = vst.msk [vmem:[#allocation2 + $0x98] sm:$0xff] %vm203_vm0, %v4892_v39  ;;  %7174 = vmatprep.mubr.msk.f32.mxu1 %vm203_vm0, %v4928_v54 }
 0x833   :  { %7175 = vmatmul.mubr.msk.f32.gmra.mxu1 %vm203_vm0, %v4929_v33  ;;  %v4931_v41 = vld [vmem:[#allocation2 + $0x90] sm:$0xff] }
 0x835   :  { %v4930_v57 = vld [vmem:[#allocation2 + $0x88] sm:$0xff] }
 0x836   :  { %7177 = vmatprep.mubr.msk.f32.mxu1 %vm203_vm0, %v4930_v57 }
 0x837   :  { %7178 = vmatmul.mubr.msk.f32.gmra.mxu1 %vm203_vm0, %v4931_v41  ;;  %v4933_v53 = vld [vmem:[#allocation2 + $0xa0] sm:$0xff] }
 0x839   :  { %v4932_v22 = vld [vmem:[#allocation2 + $0x98] sm:$0xff] }
 0x83a   :  { %7180 = vmatprep.mubr.msk.f32.mxu1 %vm203_vm0, %v4932_v22 }
 0x83b   :  { %7181 = vmatmul.mubr.msk.f32.gmra.mxu1 %vm203_vm0, %v4933_v53 }
 0x8d7   :  { %v7155_v43 = vpop.f32.mrf.mxu1 }
 0x8d8   :  { %v5081_v20 = vadd.f32 %v7155_v43, %v8994_v52 }
 0x8d9   :  { %v5075_v11 = vpop.f32.mrf.mxu1 }
 0x8da   :  { %v5076_v38 = vadd.f32 %v8994_v52, %v5075_v11  ;;  %v5175_v62 = vmul.f32 %v5081_v20, %v7886_v2 }
 0x8db   :  { %v7158_v58 = vpop.f32.mrf.mxu1 }
 0x8dc   :  { %v5174_v44 = vmul.f32 %v5076_v38, %v7882_v23  ;;  %v5091_v13 = vadd.f32 %v7158_v58, %v8994_v52 }
 0x8dd   :  { %v5085_v5 = vpop.f32.mrf.mxu1 }
 0x8de   :  { %v5086_v63 = vadd.f32 %v8994_v52, %v5085_v5  ;;  %7215 = vmatprep.mubr.f32.mxu0 %v5174_v44  ;;  %v5177_v18 = vmul.f32 %v5091_v13, %v7884_v1 }
 0x8df   :  { %v7161_v59 = vpop.f32.mrf.mxu1  ;;  %7216 = vmatmul.mubr.f32.vlgmr.msra.gmra.mxu0 %v5175_v62 }
 0x8e0   :  { %v5176_v45 = vmul.f32 %v5086_v63, %v7880_v16  ;;  %v5101_v9 = vadd.f32 %v7161_v59, %v8994_v52 }
 0x8e1   :  { %v5095_v10 = vpop.f32.mrf.mxu1 }
 0x8e2   :  { %v5096_v49 = vadd.f32 %v8994_v52, %v5095_v10  ;;  %7218 = vmatprep.mubr.f32.mxu0 %v5176_v45  ;;  %v5179_v51 = vmul.f32 %v5101_v9, %v7888_v36  ;;  %v9039_v10 = vld [vmem:[%s9090_s11] ss:$0 sm:$0xff]  ;;  %s7364_s11 = smov [#allocation9]  }
 0x8e3   :  { %v7164_v23 = vpop.f32.mrf.mxu1  ;;  %7219 = vmatmul.mubr.f32.gmra.mxu0 %v5177_v18  ;;  %s5415_s16 = sshll.u32 %s7364_s11, 4  ;;  %s5416_s16 = int_to_ptr.vmem [resolvable:$true] %s5415_s16 }
 0x8e4   :  { %v5178_v35 = vmul.f32 %v5096_v49, %v7895_v3  ;;  %v5111_v24 = vadd.f32 %v7164_v23, %v8994_v52  ;;  %s7331_s17 = scalar_lea.vmem %s5416_s16, 2048  ;;  %p7336_p2 = scmp.lt.s32.totalorder %s5416_s16, %s5416_s16 }
 0x8e5   :  { %v5105_v32 = vpop.f32.mrf.mxu1  ;;  %p7332_p1 = scmp.ne.s32.totalorder %s5416_s16, %s7331_s17  ;;  %p7337_p3 = scmp.lt.s32.totalorder %s7331_s17, %s7331_s17 }
 0x8e6   :  { %v5106_v8 = vadd.f32 %v8994_v52, %v5105_v32  ;;  %7221 = vmatprep.mubr.f32.mxu0 %v5178_v35  ;;  %v5181_v29 = vmul.f32 %v5111_v24, %v7900_v28 }
 0x8e7   :  { %v7167_v30 = vpop.f32.mrf.mxu1  ;;  %7222 = vmatmul.mubr.f32.gmra.mxu0 %v5179_v51  ;;  %p7338_p4 = por %p7337_p3, %p7336_p2 }
 0x8e8   :  { %v5180_v50 = vmul.f32 %v5106_v8, %v7905_v7  ;;  %v5121_v15 = vadd.f32 %v7167_v30, %v8994_v52 }
 0x8e9   :  { %v5115_v26 = vpop.f32.mrf.mxu1  ;;  %p7339_p5 = pnand %p7338_p4, %p7332_p1 }
 0x8ea   :  { %v5116_v34 = vadd.f32 %v8994_v52, %v5115_v26  ;;  %7224 = vmatprep.mubr.f32.mxu0 %v5180_v50  ;;  %v5183_v25 = vmul.f32 %v5121_v15, %v9261_v19 }
 0x8eb   :  { %v7170_v47 = vpop.f32.mrf.mxu1  ;;  %7225 = vmatmul.mubr.f32.gmra.mxu0 %v5181_v29 }
 0x8ec   :  { %v5182_v46 = vmul.f32 %v5116_v34, %v9263_v60  ;;  %v5131_v27 = vadd.f32 %v7170_v47, %v8994_v52 }
 0x8ed   :  { %v5125_v21 = vpop.f32.mrf.mxu1 }
 0x8ee   :  { %v5126_v31 = vadd.f32 %v8994_v52, %v5125_v21  ;;  %7227 = vmatprep.mubr.f32.mxu0 %v5182_v46  ;;  %v5185_v33 = vmul.f32 %v5131_v27, %v9265_v48 }
 0x8ef   :  { %v7173_v39 = vpop.f32.mrf.mxu1  ;;  %7228 = vmatmul.mubr.f32.gmra.mxu0 %v5183_v25 }
 0x8f0   :  { %v5184_v54 = vmul.f32 %v5126_v31, %v9267_v56  ;;  %v5141_v57 = vadd.f32 %v7173_v39, %v8994_v52 }
 0x8f1   :  { %v5135_v41 = vpop.f32.mrf.mxu1 }
 0x8f2   :  { %v5136_v22 = vadd.f32 %v8994_v52, %v5135_v41  ;;  %7230 = vmatprep.mubr.f32.mxu0 %v5184_v54  ;;  %v5187_v42 = vmul.f32 %v5141_v57, %v9269_v17 }
 0x8f3   :  { %v7176_v53 = vpop.f32.mrf.mxu1  ;;  %7231 = vmatmul.mubr.f32.gmra.mxu0 %v5185_v33 }
 0x8f4   :  { %v5186_v19 = vmul.f32 %v5136_v22, %v9271_v12  ;;  %v5151_v55 = vadd.f32 %v7176_v53, %v8994_v52 }
 0x8f5   :  { %v5145_v61 = vpop.f32.mrf.mxu1 }
 0x8f6   :  { %v5146_v43 = vadd.f32 %v8994_v52, %v5145_v61  ;;  %7233 = vmatprep.mubr.f32.mxu0 %v5186_v19  ;;  %v5189_v11 = vmul.f32 %v5151_v55, %v9273_v0 }
 0x8f7   :  { %v7179_v56 = vpop.f32.mrf.mxu1  ;;  %7234 = vmatmul.mubr.f32.gmra.mxu0 %v5187_v42 }
 0x8f8   :  { %v5188_v20 = vmul.f32 %v5146_v43, %v9275_v37  ;;  %v5161_v38 = vadd.f32 %v7179_v56, %v8994_v52 }
 0x8f9   :  { %v5155_v58 = vpop.f32.mrf.mxu1 }
 0x8fa   :  { %v5156_v44 = vadd.f32 %v8994_v52, %v5155_v58  ;;  %7236 = vmatprep.mubr.f32.mxu0 %v5188_v20  ;;  %v5191_v5 = vmul.f32 %v5161_v38, %v9277_v6 }
 0x8fb   :  { %v7182_v62 = vpop.f32.mrf.mxu1  ;;  %7237 = vmatmul.mubr.f32.gmra.mxu0 %v5189_v11 }
 0x8fc   :  { %v5190_v13 = vmul.f32 %v5156_v44, %v9279_v40  ;;  %v5171_v63 = vadd.f32 %v7182_v62, %v8994_v52 }
 0x8fd   :  { %v5165_v59 = vpop.f32.mrf.mxu1 }
 0x8fe   :  { %v5166_v45 = vadd.f32 %v8994_v52, %v5165_v59  ;;  %7239 = vmatprep.mubr.f32.mxu0 %v5190_v13  ;;  %v5193_v9 = vmul.f32 %v5171_v63, %v9281_v14 }
 0x8ff   :  { %7240 = vmatmul.mubr.f32.gmra.mxu0 %v5191_v5 }
 0x900   :  { %v5192_v18 = vmul.f32 %v5166_v45, %v9283_v4 }
 0x902   :  { %7242 = vmatprep.mubr.f32.mxu0 %v5192_v18 }
 0x903   :  { %7243 = vmatmul.mubr.f32.gmra.mxu0 %v5193_v9 }
 0x99f   :  { %v7217_v49 = vpop.f32.mrf.mxu0 }
 0x9a0   :  { %v5288_v23 = vadd.f32 %v7217_v49, %v9039_v10 }
 0x9a1   :  { %v5283_v35 = vpop.f32.mrf.mxu0 }
 0x9a2   :  { %v5378_v51 = vmul.f32 %v5288_v23, %v7886_v2 }
 0x9a3   :  { %v7220_v52 = vpop.f32.mrf.mxu0 }
 0x9a4   :  { %5394 = vst [vmem:[#allocation9] sm:$0xff] %v5378_v51  ;;  %v5298_v24 = vadd.f32 %v7220_v52, %v9039_v10 }
 0x9a5   :  { %v5292_v32 = vpop.f32.mrf.mxu0 }
 0x9a6   :  { %v5380_v14 = vmul.f32 %v5298_v24, %v7884_v1  ;;  %v5293_v8 = vadd.f32 %v9039_v10, %v5292_v32 }
 0x9a7   :  { %v7223_v30 = vpop.f32.mrf.mxu0 }
 0x9a8   :  { %5396 = vst [vmem:[#allocation9 + $0x10] sm:$0xff] %v5380_v14  ;;  %v5379_v50 = vmul.f32 %v5293_v8, %v7880_v16  ;;  %v5308_v29 = vadd.f32 %v7223_v30, %v9039_v10 }
 0x9a9   :  { %v5302_v15 = vpop.f32.mrf.mxu0 }
 0x9aa   :  { %5395 = vst [vmem:[#allocation9 + $0x8] sm:$0xff] %v5379_v50  ;;  %v5382_v26 = vmul.f32 %v5308_v29, %v7888_v36  ;;  %v5303_v2 = vadd.f32 %v9039_v10, %v5302_v15 }
 0x9ab   :  { %v7226_v34 = vpop.f32.mrf.mxu0 }
 0x9ac   :  { %5398 = vst [vmem:[#allocation9 + $0x20] sm:$0xff] %v5382_v26  ;;  %v5381_v47 = vmul.f32 %v5303_v2, %v7895_v3  ;;  %v5318_v1 = vadd.f32 %v7226_v34, %v9039_v10 }
 0x9ad   :  { %v5312_v46 = vpop.f32.mrf.mxu0 }
 0x9ae   :  { %5397 = vst [vmem:[#allocation9 + $0x18] sm:$0xff] %v5381_v47  ;;  %v5384_v25 = vmul.f32 %v5318_v1, %v7900_v28  ;;  %v5313_v16 = vadd.f32 %v9039_v10, %v5312_v46 }
 0x9af   :  { %v7229_v27 = vpop.f32.mrf.mxu0 }
 0x9b0   :  { %5400 = vst [vmem:[#allocation9 + $0x30] sm:$0xff] %v5384_v25  ;;  %v5383_v21 = vmul.f32 %v5313_v16, %v7905_v7 }
 0x9b1   :  { %v5322_v31 = vpop.f32.mrf.mxu0 }
 0x9b2   :  { %5399 = vst [vmem:[#allocation9 + $0x28] sm:$0xff] %v5383_v21  ;;  %v5323_v36 = vadd.f32 %v9039_v10, %v5322_v31 }
 0x9b3   :  { %v7232_v39 = vpop.f32.mrf.mxu0 }
 0x9b4   :  { %v5385_v54 = vmul.f32 %v5323_v36, %v9263_v60  ;;  %v5336_v3 = vadd.f32 %v7232_v39, %v9039_v10 }
 0x9b5   :  { %v5331_v33 = vpop.f32.mrf.mxu0 }
 0x9b6   :  { %5401 = vst [vmem:[#allocation9 + $0x38] sm:$0xff] %v5385_v54  ;;  %v5386_v57 = vmul.f32 %v5336_v3, %v9265_v48 }
 0x9b7   :  { %v7235_v28 = vpop.f32.mrf.mxu0 }
 0x9b8   :  { %5402 = vst [vmem:[#allocation9 + $0x40] sm:$0xff] %v5386_v57  ;;  %v5346_v41 = vadd.f32 %v7235_v28, %v9039_v10 }
 0x9b9   :  { %v5340_v22 = vpop.f32.mrf.mxu0 }
 0x9ba   :  { %v5388_v7 = vmul.f32 %v5346_v41, %v9269_v17  ;;  %v5341_v53 = vadd.f32 %v9039_v10, %v5340_v22 }
 0x9bb   :  { %v7238_v19 = vpop.f32.mrf.mxu0 }
 0x9bc   :  { %5404 = vst [vmem:[#allocation9 + $0x50] sm:$0xff] %v5388_v7  ;;  %v5387_v42 = vmul.f32 %v5341_v53, %v9271_v12  ;;  %v5356_v60 = vadd.f32 %v7238_v19, %v9039_v10 }
 0x9bd   :  { %v5350_v55 = vpop.f32.mrf.mxu0 }
 0x9be   :  { %5403 = vst [vmem:[#allocation9 + $0x48] sm:$0xff] %v5387_v42  ;;  %v5390_v61 = vmul.f32 %v5356_v60, %v9273_v0  ;;  %v5351_v48 = vadd.f32 %v9039_v10, %v5350_v55 }
 0x9bf   :  { %v7241_v43 = vpop.f32.mrf.mxu0 }
 0x9c0   :  { %5406 = vst [vmem:[#allocation9 + $0x60] sm:$0xff] %v5390_v61  ;;  %v5389_v56 = vmul.f32 %v5351_v48, %v9275_v37  ;;  %v5366_v17 = vadd.f32 %v7241_v43, %v9039_v10 }
 0x9c1   :  { %v5360_v20 = vpop.f32.mrf.mxu0 }
 0x9c2   :  { %5405 = vst [vmem:[#allocation9 + $0x58] sm:$0xff] %v5389_v56  ;;  %v5392_v11 = vmul.f32 %v5366_v17, %v9277_v6  ;;  %v5361_v12 = vadd.f32 %v9039_v10, %v5360_v20 }
 0x9c3   :  { %v7244_v38 = vpop.f32.mrf.mxu0 }
 0x9c4   :  { %5408 = vst [vmem:[#allocation9 + $0x70] sm:$0xff] %v5392_v11  ;;  %v5391_v58 = vmul.f32 %v5361_v12, %v9279_v40 }
 0x9c5   :  { %v5370_v44 = vpop.f32.mrf.mxu0 }
 0x9c6   :  { %5407 = vst [vmem:[#allocation9 + $0x68] sm:$0xff] %v5391_v58  ;;  %v5371_v0 = vadd.f32 %v9039_v10, %v5370_v44 }
 0x9c8   :  { %v5393_v37 = vmul.f32 %v5371_v0, %v9283_v4 }
 0x9ca   :  { %5409 = vst [vmem:[#allocation9 + $0x78] sm:$0xff] %v5393_v37 }
 0x9cb   :  { %7342 = shalt.err (!%p7339_p5)
}
 0x9cc   :  { %5421 = dma.vmem_to_hbm [thread:$0]  %s5416_s16, 2048, %s9091_s12, [#allocation5], %s7359_s26, %s7359_s26, %s7360_s27  }
 0x9cd   :  { %7355 = dma.done.wait [#allocation5], 2048  }
 0x9ce   :  { %7356 = vsyncadd [#allocation5], 4294965248 }
 0x9cf   :  { %5425 = vsyncpa [#allocation4], 1 }
 0x9d0   :  { %5426 = vsyncpa [#allocation7], 1 }
 0x9d1   :  { %5427 = vsyncpa [#allocation5], 1 }

</bundles_post_ra>
